<compile_context>
chip_gen: v6e
topology: v6e:2x2x1
jax: 0.10.0
libtpu: 0.0.40
codegen_flags: <defaults>
</compile_context>

<pallas_src>
import functools

import numpy as np
import jax
import jax.numpy as jnp
from jax import lax
from jax.experimental import pallas as pl
from jax.experimental.pallas import tpu as pltpu


# ---------------------------------------------------------------------------
# Fused BasicBlock kernel (one grid step = Bt samples)
# ---------------------------------------------------------------------------

def _basic_block_kernel(ab_ref, patches_ref, red_w_ref, red_b_ref, g1_ref, b1_ref,
                        qv_w_ref, qv_b_ref, pool_ref, vmask_ref, hind_ref,
                        fc2_w_ref, fc2_b_ref, g2_ref, b2_ref,
                        m1_w_ref, m1_b_ref, m2_w_ref, m2_b_ref,
                        o_ref, *, bt, hw, c, dd, heads, eps):
    f32 = jnp.float32
    R = bt * hw                       # token rows in this tile (Bt*HW)
    RC = pool_ref.shape[0]            # bt * (fold^2 * proposal^2) center rows
    RH = heads * RC                   # head-stacked center rows
    alpha = ab_ref[0]
    beta = ab_ref[1]

    def group_norm(t2d, g_ref, bb_ref):
        # GroupNorm(num_groups=1): per-sample stats over (HW, C), one-pass.
        t = t2d.reshape(bt, hw, c)
        inv_n = 1.0 / (hw * c)
        s1 = jnp.sum(jnp.sum(t, axis=2, keepdims=True), axis=1, keepdims=True)
        s2 = jnp.sum(jnp.sum(t * t, axis=2, keepdims=True), axis=1, keepdims=True)
        mu = s1 * inv_n
        var = s2 * inv_n - mu * mu
        tn = (t - mu) * lax.rsqrt(var + eps)
        return tn.reshape(R, c) * g_ref[...] + bb_ref[...]

    # ---- PointReducer: Conv2d(k=2,s=2) as one (R, Cin*4)@(Cin*4, C) matmul
    pr = patches_ref[...].reshape(R, patches_ref.shape[-1])
    xr = jnp.dot(pr, red_w_ref[...], preferred_element_type=f32) + red_b_ref[...]   # (R, C)

    # ---- GroupNorm1 + fused fc1|fcv (lane-dense (R, 2D) output)
    n1 = group_norm(xr, g1_ref, b1_ref)
    fv = jnp.dot(n1, qv_w_ref[...], preferred_element_type=f32) + qv_b_ref[...]     # (R, 2D)
    feat = fv[:, :dd]
    vals = fv[:, dd:]

    # ---- cluster centers & center values for every (sample, region) at once:
    #      block-diagonal adaptive-avg-pool matrix, one matmul for [centers|cvals]
    cen_cv = jnp.dot(pool_ref[...], fv, preferred_element_type=f32)                 # (RC, 2D)
    cent = cen_cv[:, :dd]
    cvals = cen_cv[:, dd:]

    hind = hind_ref[...]                                                            # (heads, D)

    def l2norm_per_head(t):
        # F.normalize(dim=-1) per 16-channel head block, via head-indicator matmuls
        s = lax.dot_general(t * t, hind, (((1,), (1,)), ((), ())),
                            preferred_element_type=f32)                             # (rows, heads)
        inv = lax.rsqrt(jnp.maximum(s, 1e-24))        # == 1 / max(||x||, 1e-12)
        return t * jnp.dot(inv, hind, preferred_element_type=f32)

    fn = l2norm_per_head(feat)
    cn = l2norm_per_head(cent)

    # ---- head-stacked cosine similarity: zero out other heads' channels per row
    #      so a single (RH, D)@(D, R) matmul yields per-head dot products.
    cn_stack = (cn[None, :, :] * hind[:, None, :]).reshape(RH, dd)
    sim = lax.dot_general(cn_stack, fn, (((1,), (1,)), ((), ())),
                          preferred_element_type=f32)                               # (RH, R)
    vmask = vmask_ref[...]                      # 1 iff same sample & same fold region
    sim = jax.nn.sigmoid(beta + alpha * sim) * vmask

    # ---- one-hot argmax over each point's region centers (per head), first match
    sim3 = sim.reshape(heads, RC, R)
    m_iota = lax.broadcasted_iota(jnp.int32, sim3.shape, 1)
    smax = jnp.max(sim3, axis=1, keepdims=True)
    first = jnp.min(jnp.where(sim3 >= smax, m_iota, RC), axis=1, keepdims=True)
    onehot = (m_iota == first).astype(f32).reshape(RH, R) * vmask
    simm = sim * onehot
    cnt = jnp.sum(onehot, axis=1, keepdims=True)                                    # (RH, 1)

    # ---- aggregate values into centers, collapse head stack back to lane blocks
    aggs = jnp.dot(simm, vals, preferred_element_type=f32)                          # (RH, D)
    agg = jnp.sum(aggs.reshape(heads, RC, dd) * hind[:, None, :], axis=0)           # (RC, D)
    cntl = jnp.sum(cnt.reshape(heads, RC, 1) * hind[:, None, :], axis=0)            # (RC, D)
    agg = (agg + cvals) / (cntl + 1.0)

    # ---- dispatch aggregated centers back onto tokens (already in original order)
    agg_stack = (agg[None, :, :] * hind[:, None, :]).reshape(RH, dd)
    t_tok = jnp.dot(simm.T, agg_stack, preferred_element_type=f32)                  # (R, D)

    # ---- fc2 + cluster residual, GroupNorm2, MLP(GELU, GELU), MLP residual
    x1 = xr + jnp.dot(t_tok, fc2_w_ref[...], preferred_element_type=f32) + fc2_b_ref[...]
    n2 = group_norm(x1, g2_ref, b2_ref)
    # TODO(synk): PyTorch nn.GELU defaults to exact erf; tanh approximation used.
    h = jax.nn.gelu(jnp.dot(n2, m1_w_ref[...], preferred_element_type=f32) + m1_b_ref[...],
                    approximate=True)
    y = jax.nn.gelu(jnp.dot(h, m2_w_ref[...], preferred_element_type=f32) + m2_b_ref[...],
                    approximate=True)
    o_ref[...] = (x1 + y).reshape(bt, hw, c)


# ---------------------------------------------------------------------------
# Constant builders (hoisted out of the forward path, cached per geometry)
# ---------------------------------------------------------------------------

@functools.lru_cache(maxsize=None)
def _cluster_constants(bt, ho, wo, fold, prop, heads, head_dim):
    """Block-diagonal adaptive-pool matrix, (sample,region) validity mask (head-
    stacked), and per-head channel indicator."""
    hh, ww = ho // fold, wo // fold
    m_per = prop * prop
    n_cent = fold * fold * m_per
    hw = ho * wo
    rc, r = bt * n_cent, bt * hw

    pool = np.zeros((rc, r), np.float32)
    valid = np.zeros((rc, r), np.float32)
    for b in range(bt):
        for f1 in range(fold):
            for f2 in range(fold):
                reg = f1 * fold + f2
                toks = [(f1 * hh + i) * wo + (f2 * ww + j)
                        for i in range(hh) for j in range(ww)]
                for mi in range(prop):
                    i0, i1 = (mi * hh) // prop, -((-(mi + 1) * hh) // prop)
                    for mj in range(prop):
                        j0, j1 = (mj * ww) // prop, -((-(mj + 1) * ww) // prop)
                        wgt = 1.0 / ((i1 - i0) * (j1 - j0))
                        row = b * n_cent + reg * m_per + mi * prop + mj
                        for i in range(i0, i1):
                            for j in range(j0, j1):
                                col = b * hw + (f1 * hh + i) * wo + (f2 * ww + j)
                                pool[row, col] = wgt
                for m in range(m_per):
                    row = b * n_cent + reg * m_per + m
                    for t in toks:
                        valid[row, b * hw + t] = 1.0

    vmask = np.tile(valid, (heads, 1))                       # head-stacked rows
    dd = heads * head_dim
    hind = np.zeros((heads, dd), np.float32)
    for e in range(heads):
        hind[e, e * head_dim:(e + 1) * head_dim] = 1.0
    return jnp.asarray(pool), jnp.asarray(vmask), jnp.asarray(hind)


def _pick_batch_tile(batch, hw, target_rows=256):
    """Largest divisor of batch keeping matmul rows <= 256 (v6e/v7x MXU height;
    128 rows already saturates v5e).  More samples -> more 'parallel' grid steps."""
    bt = 1
    for cand in range(1, batch + 1):
        if batch % cand == 0 and cand * hw <= target_rows:
            bt = cand
    return bt


def _const2d(a):
    return pl.BlockSpec(a.shape, lambda i: (0, 0))


# ---------------------------------------------------------------------------
# Forward wrapper
# ---------------------------------------------------------------------------

def basic_block_forward(x, p):
    """BasicBlock.forward: PointReducer -> ClusterBlock (N=1); mask is discarded."""
    B, Cin, H, W = x.shape
    heads, head_dim = p["heads"], p["head_dim"]
    fold, prop = p["fold"], p["proposal"]
    Ho, Wo = H // 2, W // 2
    HW = Ho * Wo
    C = p["red_w"].shape[1]
    D = heads * head_dim
    K = Cin * 4

    # Conv2d(k=2,s=2) patch extraction (single XLA transpose feeding the kernel).
    # TODO(synk): fold into the kernel via strided tap reads on an NHWC input.
    patches = x.reshape(B, Cin, Ho, 2, Wo, 2)
    patches = jnp.transpose(patches, (0, 2, 4, 1, 3, 5)).reshape(B, HW, K)

    Bt = _pick_batch_tile(B, HW)
    pool_bd, vmask, hind = _cluster_constants(Bt, Ho, Wo, fold, prop, heads, head_dim)

    consts = [p["red_w"], p["red_b"], p["gn1_g"], p["gn1_b"],
              p["qv_w"], p["qv_b"], pool_bd, vmask, hind,
              p["fc2_w"], p["fc2_b"], p["gn2_g"], p["gn2_b"],
              p["mlp1_w"], p["mlp1_b"], p["mlp2_w"], p["mlp2_b"]]

    kern = functools.partial(_basic_block_kernel, bt=Bt, hw=HW, c=C, dd=D,
                             heads=heads, eps=1e-5)

    out_tok = pl.pallas_call(
        kern,
        out_shape=jax.ShapeDtypeStruct((B, HW, C), jnp.float32),
        grid=(B // Bt,),
        in_specs=[pl.BlockSpec(memory_space=pltpu.MemorySpace.SMEM),       # alpha/beta
                  pl.BlockSpec((Bt, HW, K), lambda i: (i, 0, 0))]
                 + [_const2d(a) for a in consts],
        out_specs=pl.BlockSpec((Bt, HW, C), lambda i: (i, 0, 0)),
        compiler_params=pltpu.CompilerParams(dimension_semantics=("parallel",)),
    )(p["alpha_beta"], patches, *consts)

    return jnp.transpose(out_tok.reshape(B, Ho, Wo, C), (0, 3, 1, 2))


# ---------------------------------------------------------------------------
# Deterministic parameter init (synthetic; matches PyTorch module shapes)
# ---------------------------------------------------------------------------

def init_params(seed=0, in_channels=32, out_channels=64, heads=4, head_dim=16,
                mlp_ratio=4, fold=2, proposal=2):
    key = jax.random.PRNGKey(seed)
    ks = jax.random.split(key, 6)

    def w(k, shape, scale=0.05):
        return scale * jax.random.normal(k, shape, dtype=jnp.float32)

    D = heads * head_dim                      # must equal out_channels (64)
    hidden = mlp_ratio * out_channels
    f32 = jnp.float32
    fc1_w = w(ks[1], (out_channels, D))
    fcv_w = w(ks[2], (out_channels, D))
    return dict(
        heads=heads, head_dim=head_dim, fold=fold, proposal=proposal,
        # PointReducer: Conv2d(in, out, k=2, s=2) flattened to (in*2*2, out)
        red_w=w(ks[0], (in_channels * 4, out_channels)),
        red_b=jnp.zeros((1, out_channels), f32),
        # GroupNorm(1, out_channels) x2
        gn1_g=jnp.ones((1, out_channels), f32), gn1_b=jnp.zeros((1, out_channels), f32),
        gn2_g=jnp.ones((1, out_channels), f32), gn2_b=jnp.zeros((1, out_channels), f32),
        # Cluster: fc1|fcv fused once at init (hoisted), fc2, alpha=1, beta=0
        qv_w=jnp.concatenate([fc1_w, fcv_w], axis=1),
        qv_b=jnp.zeros((1, 2 * D), f32),
        fc2_w=w(ks[3], (D, out_channels)), fc2_b=jnp.zeros((1, out_channels), f32),
        alpha_beta=jnp.array([1.0, 0.0], f32),
        # MLP (1x1 convs)
        mlp1_w=w(ks[4], (out_channels, hidden)), mlp1_b=jnp.zeros((1, hidden), f32),
        mlp2_w=w(ks[5], (hidden, out_channels)), mlp2_b=jnp.zeros((1, out_channels), f32),
    )


if __name__ == "__main__":
    params = init_params(seed=0)
    x = jax.random.normal(jax.random.PRNGKey(0), (2, 32, 16, 16), dtype=jnp.float32)
    out = basic_block_forward(x, params)
    out = jax.block_until_ready(out)
    assert out.shape == (2, 64, 8, 8), out.shape
    assert bool(jnp.all(jnp.isfinite(out)))
    print("KERNEL_OK")
</pallas_src>

<mosaic_0001>
module attributes {stable_mosaic.version = 11 : i64} {
  func.func @_basic_block_kernel(%arg0: i32, %arg1: memref<2xf32, #tpu.memory_space<smem>>, %arg2: memref<2x64x128xf32, #tpu.memory_space<vmem>>, %arg3: memref<128x64xf32, #tpu.memory_space<vmem>>, %arg4: memref<1x64xf32, #tpu.memory_space<vmem>>, %arg5: memref<1x64xf32, #tpu.memory_space<vmem>>, %arg6: memref<1x64xf32, #tpu.memory_space<vmem>>, %arg7: memref<64x128xf32, #tpu.memory_space<vmem>>, %arg8: memref<1x128xf32, #tpu.memory_space<vmem>>, %arg9: memref<32x128xf32, #tpu.memory_space<vmem>>, %arg10: memref<128x128xf32, #tpu.memory_space<vmem>>, %arg11: memref<4x64xf32, #tpu.memory_space<vmem>>, %arg12: memref<64x64xf32, #tpu.memory_space<vmem>>, %arg13: memref<1x64xf32, #tpu.memory_space<vmem>>, %arg14: memref<1x64xf32, #tpu.memory_space<vmem>>, %arg15: memref<1x64xf32, #tpu.memory_space<vmem>>, %arg16: memref<64x256xf32, #tpu.memory_space<vmem>>, %arg17: memref<1x256xf32, #tpu.memory_space<vmem>>, %arg18: memref<256x64xf32, #tpu.memory_space<vmem>>, %arg19: memref<1x64xf32, #tpu.memory_space<vmem>>, %arg20: memref<2x64x64xf32, #tpu.memory_space<vmem>>) attributes {dimension_semantics = [#tpu.dimension_semantics<parallel>], iteration_bounds = array<i64: 1>, scalar_prefetch = 0 : i64, scratch_operands = 0 : i64, tpu.core_type = #tpu.core_type<tc>, window_params = [{transform_indices = @transform_0, window_bounds = array<i64: 2>}, {transform_indices = @transform_1, window_bounds = array<i64: 2, 64, 128>}, {pipeline_mode = #tpu.pipeline_mode<synchronous>, transform_indices = @transform_2, window_bounds = array<i64: 128, 64>}, {pipeline_mode = #tpu.pipeline_mode<synchronous>, transform_indices = @transform_3, window_bounds = array<i64: 1, 64>}, {pipeline_mode = #tpu.pipeline_mode<synchronous>, transform_indices = @transform_4, window_bounds = array<i64: 1, 64>}, {pipeline_mode = #tpu.pipeline_mode<synchronous>, transform_indices = @transform_5, window_bounds = array<i64: 1, 64>}, {pipeline_mode = #tpu.pipeline_mode<synchronous>, transform_indices = @transform_6, window_bounds = array<i64: 64, 128>}, {pipeline_mode = #tpu.pipeline_mode<synchronous>, transform_indices = @transform_7, window_bounds = array<i64: 1, 128>}, {pipeline_mode = #tpu.pipeline_mode<synchronous>, transform_indices = @transform_8, window_bounds = array<i64: 32, 128>}, {pipeline_mode = #tpu.pipeline_mode<synchronous>, transform_indices = @transform_9, window_bounds = array<i64: 128, 128>}, {pipeline_mode = #tpu.pipeline_mode<synchronous>, transform_indices = @transform_10, window_bounds = array<i64: 4, 64>}, {pipeline_mode = #tpu.pipeline_mode<synchronous>, transform_indices = @transform_11, window_bounds = array<i64: 64, 64>}, {pipeline_mode = #tpu.pipeline_mode<synchronous>, transform_indices = @transform_12, window_bounds = array<i64: 1, 64>}, {pipeline_mode = #tpu.pipeline_mode<synchronous>, transform_indices = @transform_13, window_bounds = array<i64: 1, 64>}, {pipeline_mode = #tpu.pipeline_mode<synchronous>, transform_indices = @transform_14, window_bounds = array<i64: 1, 64>}, {pipeline_mode = #tpu.pipeline_mode<synchronous>, transform_indices = @transform_15, window_bounds = array<i64: 64, 256>}, {pipeline_mode = #tpu.pipeline_mode<synchronous>, transform_indices = @transform_16, window_bounds = array<i64: 1, 256>}, {pipeline_mode = #tpu.pipeline_mode<synchronous>, transform_indices = @transform_17, window_bounds = array<i64: 256, 64>}, {pipeline_mode = #tpu.pipeline_mode<synchronous>, transform_indices = @transform_18, window_bounds = array<i64: 1, 64>}, {transform_indices = @transform_19, window_bounds = array<i64: 2, 64, 64>}]} {
    %c0 = arith.constant 0 : index
    %0 = memref.load %arg1[%c0] : memref<2xf32, #tpu.memory_space<smem>>
    %c1 = arith.constant 1 : index
    %1 = memref.load %arg1[%c1] : memref<2xf32, #tpu.memory_space<smem>>
    %c0_0 = arith.constant 0 : index
    %c0_1 = arith.constant 0 : index
    %c0_2 = arith.constant 0 : index
    %2 = vector.load %arg2[%c0_0, %c0_1, %c0_2] : memref<2x64x128xf32, #tpu.memory_space<vmem>>, vector<2x64x128xf32>
    %3 = vector.shape_cast %2 : vector<2x64x128xf32> to vector<128x128xf32>
    %c0_3 = arith.constant 0 : index
    %c0_4 = arith.constant 0 : index
    %4 = vector.load %arg3[%c0_3, %c0_4] : memref<128x64xf32, #tpu.memory_space<vmem>>, vector<128x64xf32>
    %cst = arith.constant dense<0.000000e+00> : vector<128x64xf32>
    %5 = tpu.matmul %3, %4, %cst {dimension_numbers = #tpu.dot_dimension_numbers<[1], [0], [0], [1], [0, 0, 1, 1], [], []>} : vector<128x128xf32>, vector<128x64xf32>, vector<128x64xf32> -> vector<128x64xf32>
    %c0_5 = arith.constant 0 : index
    %c0_6 = arith.constant 0 : index
    %6 = vector.load %arg4[%c0_5, %c0_6] : memref<1x64xf32, #tpu.memory_space<vmem>>, vector<1x64xf32>
    %7 = vector.broadcast %6 : vector<1x64xf32> to vector<128x64xf32>
    %8 = arith.addf %5, %7 : vector<128x64xf32>
    %9 = vector.shape_cast %8 : vector<128x64xf32> to vector<2x64x64xf32>
    %cst_7 = arith.constant dense<0.000000e+00> : vector<2x64xf32>
    %10 = vector.multi_reduction <add>, %9, %cst_7 [2] : vector<2x64x64xf32> to vector<2x64xf32>
    %11 = vector.shape_cast %10 : vector<2x64xf32> to vector<2x64x1xf32>
    %cst_8 = arith.constant dense<0.000000e+00> : vector<2x1xf32>
    %12 = vector.multi_reduction <add>, %11, %cst_8 [1] : vector<2x64x1xf32> to vector<2x1xf32>
    %13 = vector.shape_cast %12 : vector<2x1xf32> to vector<2x1x1xf32>
    %14 = arith.mulf %9, %9 : vector<2x64x64xf32>
    %cst_9 = arith.constant dense<0.000000e+00> : vector<2x64xf32>
    %15 = vector.multi_reduction <add>, %14, %cst_9 [2] : vector<2x64x64xf32> to vector<2x64xf32>
    %16 = vector.shape_cast %15 : vector<2x64xf32> to vector<2x64x1xf32>
    %cst_10 = arith.constant dense<0.000000e+00> : vector<2x1xf32>
    %17 = vector.multi_reduction <add>, %16, %cst_10 [1] : vector<2x64x1xf32> to vector<2x1xf32>
    %18 = vector.shape_cast %17 : vector<2x1xf32> to vector<2x1x1xf32>
    %cst_11 = arith.constant 2.44140625E-4 : f32
    %19 = vector.broadcast %cst_11 : f32 to vector<2x1x1xf32>
    %20 = arith.mulf %13, %19 : vector<2x1x1xf32>
    %cst_12 = arith.constant 2.44140625E-4 : f32
    %21 = vector.broadcast %cst_12 : f32 to vector<2x1x1xf32>
    %22 = arith.mulf %18, %21 : vector<2x1x1xf32>
    %23 = arith.mulf %20, %20 : vector<2x1x1xf32>
    %24 = arith.subf %22, %23 : vector<2x1x1xf32>
    %25 = vector.broadcast %20 : vector<2x1x1xf32> to vector<2x64x64xf32>
    %26 = arith.subf %9, %25 : vector<2x64x64xf32>
    %cst_13 = arith.constant 9.99999974E-6 : f32
    %27 = vector.broadcast %cst_13 : f32 to vector<2x1x1xf32>
    %28 = arith.addf %24, %27 : vector<2x1x1xf32>
    %29 = math.rsqrt %28 : vector<2x1x1xf32>
    %30 = vector.broadcast %29 : vector<2x1x1xf32> to vector<2x64x64xf32>
    %31 = arith.mulf %26, %30 : vector<2x64x64xf32>
    %32 = vector.shape_cast %31 : vector<2x64x64xf32> to vector<128x64xf32>
    %c0_14 = arith.constant 0 : index
    %c0_15 = arith.constant 0 : index
    %33 = vector.load %arg5[%c0_14, %c0_15] : memref<1x64xf32, #tpu.memory_space<vmem>>, vector<1x64xf32>
    %34 = vector.broadcast %33 : vector<1x64xf32> to vector<128x64xf32>
    %35 = arith.mulf %32, %34 : vector<128x64xf32>
    %c0_16 = arith.constant 0 : index
    %c0_17 = arith.constant 0 : index
    %36 = vector.load %arg6[%c0_16, %c0_17] : memref<1x64xf32, #tpu.memory_space<vmem>>, vector<1x64xf32>
    %37 = vector.broadcast %36 : vector<1x64xf32> to vector<128x64xf32>
    %38 = arith.addf %35, %37 : vector<128x64xf32>
    %c0_18 = arith.constant 0 : index
    %c0_19 = arith.constant 0 : index
    %39 = vector.load %arg7[%c0_18, %c0_19] : memref<64x128xf32, #tpu.memory_space<vmem>>, vector<64x128xf32>
    %cst_20 = arith.constant dense<0.000000e+00> : vector<128x128xf32>
    %40 = tpu.matmul %38, %39, %cst_20 {dimension_numbers = #tpu.dot_dimension_numbers<[1], [0], [0], [1], [0, 0, 1, 1], [], []>} : vector<128x64xf32>, vector<64x128xf32>, vector<128x128xf32> -> vector<128x128xf32>
    %c0_21 = arith.constant 0 : index
    %c0_22 = arith.constant 0 : index
    %41 = vector.load %arg8[%c0_21, %c0_22] : memref<1x128xf32, #tpu.memory_space<vmem>>, vector<1x128xf32>
    %42 = vector.broadcast %41 : vector<1x128xf32> to vector<128x128xf32>
    %43 = arith.addf %40, %42 : vector<128x128xf32>
    %44 = vector.extract_strided_slice %43 {offsets = [0, 0], sizes = [128, 64], strides = [1, 1]} : vector<128x128xf32> to vector<128x64xf32>
    %45 = vector.extract_strided_slice %43 {offsets = [0, 64], sizes = [128, 64], strides = [1, 1]} : vector<128x128xf32> to vector<128x64xf32>
    %c0_23 = arith.constant 0 : index
    %c0_24 = arith.constant 0 : index
    %46 = vector.load %arg9[%c0_23, %c0_24] : memref<32x128xf32, #tpu.memory_space<vmem>>, vector<32x128xf32>
    %cst_25 = arith.constant dense<0.000000e+00> : vector<32x128xf32>
    %47 = tpu.matmul %46, %43, %cst_25 {dimension_numbers = #tpu.dot_dimension_numbers<[1], [0], [0], [1], [0, 0, 1, 1], [], []>} : vector<32x128xf32>, vector<128x128xf32>, vector<32x128xf32> -> vector<32x128xf32>
    %48 = vector.extract_strided_slice %47 {offsets = [0, 0], sizes = [32, 64], strides = [1, 1]} : vector<32x128xf32> to vector<32x64xf32>
    %49 = vector.extract_strided_slice %47 {offsets = [0, 64], sizes = [32, 64], strides = [1, 1]} : vector<32x128xf32> to vector<32x64xf32>
    %c0_26 = arith.constant 0 : index
    %c0_27 = arith.constant 0 : index
    %50 = vector.load %arg11[%c0_26, %c0_27] : memref<4x64xf32, #tpu.memory_space<vmem>>, vector<4x64xf32>
    %51 = arith.mulf %44, %44 : vector<128x64xf32>
    %cst_28 = arith.constant dense<0.000000e+00> : vector<128x4xf32>
    %52 = tpu.matmul %51, %50, %cst_28 {dimension_numbers = #tpu.dot_dimension_numbers<[1], [1], [0], [0], [0, 0, 1, 0], [], []>} : vector<128x64xf32>, vector<4x64xf32>, vector<128x4xf32> -> vector<128x4xf32>
    %cst_29 = arith.constant 1.000000e-24 : f32
    %53 = vector.broadcast %cst_29 : f32 to vector<128x4xf32>
    %54 = arith.maximumf %52, %53 : vector<128x4xf32>
    %55 = math.rsqrt %54 : vector<128x4xf32>
    %cst_30 = arith.constant dense<0.000000e+00> : vector<128x64xf32>
    %56 = tpu.matmul %55, %50, %cst_30 {dimension_numbers = #tpu.dot_dimension_numbers<[1], [0], [0], [1], [0, 0, 1, 1], [], []>} : vector<128x4xf32>, vector<4x64xf32>, vector<128x64xf32> -> vector<128x64xf32>
    %57 = arith.mulf %44, %56 : vector<128x64xf32>
    %58 = arith.mulf %48, %48 : vector<32x64xf32>
    %cst_31 = arith.constant dense<0.000000e+00> : vector<32x4xf32>
    %59 = tpu.matmul %58, %50, %cst_31 {dimension_numbers = #tpu.dot_dimension_numbers<[1], [1], [0], [0], [0, 0, 1, 0], [], []>} : vector<32x64xf32>, vector<4x64xf32>, vector<32x4xf32> -> vector<32x4xf32>
    %cst_32 = arith.constant 1.000000e-24 : f32
    %60 = vector.broadcast %cst_32 : f32 to vector<32x4xf32>
    %61 = arith.maximumf %59, %60 : vector<32x4xf32>
    %62 = math.rsqrt %61 : vector<32x4xf32>
    %cst_33 = arith.constant dense<0.000000e+00> : vector<32x64xf32>
    %63 = tpu.matmul %62, %50, %cst_33 {dimension_numbers = #tpu.dot_dimension_numbers<[1], [0], [0], [1], [0, 0, 1, 1], [], []>} : vector<32x4xf32>, vector<4x64xf32>, vector<32x64xf32> -> vector<32x64xf32>
    %64 = arith.mulf %48, %63 : vector<32x64xf32>
    %65 = vector.shape_cast %64 : vector<32x64xf32> to vector<1x32x64xf32>
    %66 = vector.shape_cast %50 : vector<4x64xf32> to vector<4x1x64xf32>
    %67 = vector.broadcast %65 : vector<1x32x64xf32> to vector<4x32x64xf32>
    %68 = vector.broadcast %66 : vector<4x1x64xf32> to vector<4x32x64xf32>
    %69 = arith.mulf %67, %68 : vector<4x32x64xf32>
    %70 = vector.shape_cast %69 : vector<4x32x64xf32> to vector<128x64xf32>
    %cst_34 = arith.constant dense<0.000000e+00> : vector<128x128xf32>
    %71 = tpu.matmul %70, %57, %cst_34 {dimension_numbers = #tpu.dot_dimension_numbers<[1], [1], [0], [0], [0, 0, 1, 0], [], []>} : vector<128x64xf32>, vector<128x64xf32>, vector<128x128xf32> -> vector<128x128xf32>
    %c0_35 = arith.constant 0 : index
    %c0_36 = arith.constant 0 : index
    %72 = vector.load %arg10[%c0_35, %c0_36] : memref<128x128xf32, #tpu.memory_space<vmem>>, vector<128x128xf32>
    %73 = vector.broadcast %0 : f32 to vector<128x128xf32>
    %74 = arith.mulf %73, %71 : vector<128x128xf32>
    %75 = vector.broadcast %1 : f32 to vector<128x128xf32>
    %76 = arith.addf %75, %74 : vector<128x128xf32>
    %77 = arith.negf %76 : vector<128x128xf32>
    %78 = math.exp %77 : vector<128x128xf32>
    %cst_37 = arith.constant 1.000000e+00 : f32
    %79 = vector.broadcast %cst_37 : f32 to vector<128x128xf32>
    %80 = arith.addf %79, %78 : vector<128x128xf32>
    %81 = arith.divf %79, %80 : vector<128x128xf32>
    %82 = arith.mulf %81, %72 : vector<128x128xf32>
    %83 = vector.shape_cast %82 : vector<128x128xf32> to vector<4x32x128xf32>
    %84 = tpu.iota {dimensions = array<i32: 1>} : vector<4x32x128xi32>
    %cst_38 = arith.constant dense<0xFF800000> : vector<4x128xf32>
    %85 = vector.multi_reduction <maximumf>, %83, %cst_38 [1] : vector<4x32x128xf32> to vector<4x128xf32>
    %86 = vector.shape_cast %85 : vector<4x128xf32> to vector<4x1x128xf32>
    %87 = vector.broadcast %86 : vector<4x1x128xf32> to vector<4x32x128xf32>
    %88 = arith.cmpf oge, %83, %87 : vector<4x32x128xf32>
    %c32_i32 = arith.constant 32 : i32
    %89 = vector.broadcast %c32_i32 : i32 to vector<4x32x128xi32>
    %90 = arith.select %88, %84, %89 : vector<4x32x128xi1>, vector<4x32x128xi32>
    %cst_39 = arith.constant dense<2147483647> : vector<4x128xi32>
    %91 = vector.multi_reduction <minsi>, %90, %cst_39 [1] : vector<4x32x128xi32> to vector<4x128xi32>
    %92 = vector.shape_cast %91 : vector<4x128xi32> to vector<4x1x128xi32>
    %93 = vector.broadcast %92 : vector<4x1x128xi32> to vector<4x32x128xi32>
    %94 = arith.cmpi eq, %84, %93 : vector<4x32x128xi32>
    %95 = arith.extui %94 : vector<4x32x128xi1> to vector<4x32x128xi32>
    %96 = arith.sitofp %95 : vector<4x32x128xi32> to vector<4x32x128xf32>
    %97 = vector.shape_cast %96 : vector<4x32x128xf32> to vector<128x128xf32>
    %98 = arith.mulf %97, %72 : vector<128x128xf32>
    %99 = arith.mulf %82, %98 : vector<128x128xf32>
    %cst_40 = arith.constant dense<0.000000e+00> : vector<128xf32>
    %100 = vector.multi_reduction <add>, %98, %cst_40 [1] : vector<128x128xf32> to vector<128xf32>
    %101 = vector.shape_cast %100 : vector<128xf32> to vector<128x1xf32>
    %cst_41 = arith.constant dense<0.000000e+00> : vector<128x64xf32>
    %102 = tpu.matmul %99, %45, %cst_41 {dimension_numbers = #tpu.dot_dimension_numbers<[1], [0], [0], [1], [0, 0, 1, 1], [], []>} : vector<128x128xf32>, vector<128x64xf32>, vector<128x64xf32> -> vector<128x64xf32>
    %103 = vector.shape_cast %102 : vector<128x64xf32> to vector<4x32x64xf32>
    %104 = vector.shape_cast %50 : vector<4x64xf32> to vector<4x1x64xf32>
    %105 = vector.broadcast %104 : vector<4x1x64xf32> to vector<4x32x64xf32>
    %106 = arith.mulf %103, %105 : vector<4x32x64xf32>
    %cst_42 = arith.constant dense<0.000000e+00> : vector<32x64xf32>
    %107 = vector.multi_reduction <add>, %106, %cst_42 [0] : vector<4x32x64xf32> to vector<32x64xf32>
    %108 = vector.shape_cast %101 : vector<128x1xf32> to vector<4x32x1xf32>
    %109 = vector.shape_cast %50 : vector<4x64xf32> to vector<4x1x64xf32>
    %110 = vector.broadcast %108 : vector<4x32x1xf32> to vector<4x32x64xf32>
    %111 = vector.broadcast %109 : vector<4x1x64xf32> to vector<4x32x64xf32>
    %112 = arith.mulf %110, %111 : vector<4x32x64xf32>
    %cst_43 = arith.constant dense<0.000000e+00> : vector<32x64xf32>
    %113 = vector.multi_reduction <add>, %112, %cst_43 [0] : vector<4x32x64xf32> to vector<32x64xf32>
    %114 = arith.addf %107, %49 : vector<32x64xf32>
    %cst_44 = arith.constant 1.000000e+00 : f32
    %115 = vector.broadcast %cst_44 : f32 to vector<32x64xf32>
    %116 = arith.addf %113, %115 : vector<32x64xf32>
    %117 = arith.divf %114, %116 : vector<32x64xf32>
    %118 = vector.shape_cast %117 : vector<32x64xf32> to vector<1x32x64xf32>
    %119 = vector.shape_cast %50 : vector<4x64xf32> to vector<4x1x64xf32>
    %120 = vector.broadcast %118 : vector<1x32x64xf32> to vector<4x32x64xf32>
    %121 = vector.broadcast %119 : vector<4x1x64xf32> to vector<4x32x64xf32>
    %122 = arith.mulf %120, %121 : vector<4x32x64xf32>
    %123 = vector.shape_cast %122 : vector<4x32x64xf32> to vector<128x64xf32>
    %124 = tpu.transpose %99, [1, 0] : vector<128x128xf32> -> vector<128x128xf32>
    %cst_45 = arith.constant dense<0.000000e+00> : vector<128x64xf32>
    %125 = tpu.matmul %124, %123, %cst_45 {dimension_numbers = #tpu.dot_dimension_numbers<[1], [0], [0], [1], [0, 0, 1, 1], [], []>} : vector<128x128xf32>, vector<128x64xf32>, vector<128x64xf32> -> vector<128x64xf32>
    %c0_46 = arith.constant 0 : index
    %c0_47 = arith.constant 0 : index
    %126 = vector.load %arg12[%c0_46, %c0_47] : memref<64x64xf32, #tpu.memory_space<vmem>>, vector<64x64xf32>
    %cst_48 = arith.constant dense<0.000000e+00> : vector<128x64xf32>
    %127 = tpu.matmul %125, %126, %cst_48 {dimension_numbers = #tpu.dot_dimension_numbers<[1], [0], [0], [1], [0, 0, 1, 1], [], []>} : vector<128x64xf32>, vector<64x64xf32>, vector<128x64xf32> -> vector<128x64xf32>
    %128 = arith.addf %8, %127 : vector<128x64xf32>
    %c0_49 = arith.constant 0 : index
    %c0_50 = arith.constant 0 : index
    %129 = vector.load %arg13[%c0_49, %c0_50] : memref<1x64xf32, #tpu.memory_space<vmem>>, vector<1x64xf32>
    %130 = vector.broadcast %129 : vector<1x64xf32> to vector<128x64xf32>
    %131 = arith.addf %128, %130 : vector<128x64xf32>
    %132 = vector.shape_cast %131 : vector<128x64xf32> to vector<2x64x64xf32>
    %cst_51 = arith.constant dense<0.000000e+00> : vector<2x64xf32>
    %133 = vector.multi_reduction <add>, %132, %cst_51 [2] : vector<2x64x64xf32> to vector<2x64xf32>
    %134 = vector.shape_cast %133 : vector<2x64xf32> to vector<2x64x1xf32>
    %cst_52 = arith.constant dense<0.000000e+00> : vector<2x1xf32>
    %135 = vector.multi_reduction <add>, %134, %cst_52 [1] : vector<2x64x1xf32> to vector<2x1xf32>
    %136 = vector.shape_cast %135 : vector<2x1xf32> to vector<2x1x1xf32>
    %137 = arith.mulf %132, %132 : vector<2x64x64xf32>
    %cst_53 = arith.constant dense<0.000000e+00> : vector<2x64xf32>
    %138 = vector.multi_reduction <add>, %137, %cst_53 [2] : vector<2x64x64xf32> to vector<2x64xf32>
    %139 = vector.shape_cast %138 : vector<2x64xf32> to vector<2x64x1xf32>
    %cst_54 = arith.constant dense<0.000000e+00> : vector<2x1xf32>
    %140 = vector.multi_reduction <add>, %139, %cst_54 [1] : vector<2x64x1xf32> to vector<2x1xf32>
    %141 = vector.shape_cast %140 : vector<2x1xf32> to vector<2x1x1xf32>
    %cst_55 = arith.constant 2.44140625E-4 : f32
    %142 = vector.broadcast %cst_55 : f32 to vector<2x1x1xf32>
    %143 = arith.mulf %136, %142 : vector<2x1x1xf32>
    %cst_56 = arith.constant 2.44140625E-4 : f32
    %144 = vector.broadcast %cst_56 : f32 to vector<2x1x1xf32>
    %145 = arith.mulf %141, %144 : vector<2x1x1xf32>
    %146 = arith.mulf %143, %143 : vector<2x1x1xf32>
    %147 = arith.subf %145, %146 : vector<2x1x1xf32>
    %148 = vector.broadcast %143 : vector<2x1x1xf32> to vector<2x64x64xf32>
    %149 = arith.subf %132, %148 : vector<2x64x64xf32>
    %cst_57 = arith.constant 9.99999974E-6 : f32
    %150 = vector.broadcast %cst_57 : f32 to vector<2x1x1xf32>
    %151 = arith.addf %147, %150 : vector<2x1x1xf32>
    %152 = math.rsqrt %151 : vector<2x1x1xf32>
    %153 = vector.broadcast %152 : vector<2x1x1xf32> to vector<2x64x64xf32>
    %154 = arith.mulf %149, %153 : vector<2x64x64xf32>
    %155 = vector.shape_cast %154 : vector<2x64x64xf32> to vector<128x64xf32>
    %c0_58 = arith.constant 0 : index
    %c0_59 = arith.constant 0 : index
    %156 = vector.load %arg14[%c0_58, %c0_59] : memref<1x64xf32, #tpu.memory_space<vmem>>, vector<1x64xf32>
    %157 = vector.broadcast %156 : vector<1x64xf32> to vector<128x64xf32>
    %158 = arith.mulf %155, %157 : vector<128x64xf32>
    %c0_60 = arith.constant 0 : index
    %c0_61 = arith.constant 0 : index
    %159 = vector.load %arg15[%c0_60, %c0_61] : memref<1x64xf32, #tpu.memory_space<vmem>>, vector<1x64xf32>
    %160 = vector.broadcast %159 : vector<1x64xf32> to vector<128x64xf32>
    %161 = arith.addf %158, %160 : vector<128x64xf32>
    %c0_62 = arith.constant 0 : index
    %c0_63 = arith.constant 0 : index
    %162 = vector.load %arg16[%c0_62, %c0_63] : memref<64x256xf32, #tpu.memory_space<vmem>>, vector<64x256xf32>
    %cst_64 = arith.constant dense<0.000000e+00> : vector<128x256xf32>
    %163 = tpu.matmul %161, %162, %cst_64 {dimension_numbers = #tpu.dot_dimension_numbers<[1], [0], [0], [1], [0, 0, 1, 1], [], []>} : vector<128x64xf32>, vector<64x256xf32>, vector<128x256xf32> -> vector<128x256xf32>
    %c0_65 = arith.constant 0 : index
    %c0_66 = arith.constant 0 : index
    %164 = vector.load %arg17[%c0_65, %c0_66] : memref<1x256xf32, #tpu.memory_space<vmem>>, vector<1x256xf32>
    %165 = vector.broadcast %164 : vector<1x256xf32> to vector<128x256xf32>
    %166 = arith.addf %163, %165 : vector<128x256xf32>
    %167 = arith.mulf %166, %166 : vector<128x256xf32>
    %168 = arith.mulf %166, %167 : vector<128x256xf32>
    %cst_67 = arith.constant 4.471500e-02 : f32
    %169 = vector.broadcast %cst_67 : f32 to vector<128x256xf32>
    %170 = arith.mulf %169, %168 : vector<128x256xf32>
    %171 = arith.addf %166, %170 : vector<128x256xf32>
    %cst_68 = arith.constant 0.797884583 : f32
    %172 = vector.broadcast %cst_68 : f32 to vector<128x256xf32>
    %173 = arith.mulf %172, %171 : vector<128x256xf32>
    %174 = math.tanh %173 : vector<128x256xf32>
    %cst_69 = arith.constant 1.000000e+00 : f32
    %175 = vector.broadcast %cst_69 : f32 to vector<128x256xf32>
    %176 = arith.addf %175, %174 : vector<128x256xf32>
    %cst_70 = arith.constant 5.000000e-01 : f32
    %177 = vector.broadcast %cst_70 : f32 to vector<128x256xf32>
    %178 = arith.mulf %177, %176 : vector<128x256xf32>
    %179 = arith.mulf %166, %178 : vector<128x256xf32>
    %c0_71 = arith.constant 0 : index
    %c0_72 = arith.constant 0 : index
    %180 = vector.load %arg18[%c0_71, %c0_72] : memref<256x64xf32, #tpu.memory_space<vmem>>, vector<256x64xf32>
    %cst_73 = arith.constant dense<0.000000e+00> : vector<128x64xf32>
    %181 = tpu.matmul %179, %180, %cst_73 {dimension_numbers = #tpu.dot_dimension_numbers<[1], [0], [0], [1], [0, 0, 1, 1], [], []>} : vector<128x256xf32>, vector<256x64xf32>, vector<128x64xf32> -> vector<128x64xf32>
    %c0_74 = arith.constant 0 : index
    %c0_75 = arith.constant 0 : index
    %182 = vector.load %arg19[%c0_74, %c0_75] : memref<1x64xf32, #tpu.memory_space<vmem>>, vector<1x64xf32>
    %183 = vector.broadcast %182 : vector<1x64xf32> to vector<128x64xf32>
    %184 = arith.addf %181, %183 : vector<128x64xf32>
    %185 = arith.mulf %184, %184 : vector<128x64xf32>
    %186 = arith.mulf %184, %185 : vector<128x64xf32>
    %cst_76 = arith.constant 4.471500e-02 : f32
    %187 = vector.broadcast %cst_76 : f32 to vector<128x64xf32>
    %188 = arith.mulf %187, %186 : vector<128x64xf32>
    %189 = arith.addf %184, %188 : vector<128x64xf32>
    %cst_77 = arith.constant 0.797884583 : f32
    %190 = vector.broadcast %cst_77 : f32 to vector<128x64xf32>
    %191 = arith.mulf %190, %189 : vector<128x64xf32>
    %192 = math.tanh %191 : vector<128x64xf32>
    %cst_78 = arith.constant 1.000000e+00 : f32
    %193 = vector.broadcast %cst_78 : f32 to vector<128x64xf32>
    %194 = arith.addf %193, %192 : vector<128x64xf32>
    %cst_79 = arith.constant 5.000000e-01 : f32
    %195 = vector.broadcast %cst_79 : f32 to vector<128x64xf32>
    %196 = arith.mulf %195, %194 : vector<128x64xf32>
    %197 = arith.mulf %184, %196 : vector<128x64xf32>
    %198 = arith.addf %131, %197 : vector<128x64xf32>
    %199 = vector.shape_cast %198 : vector<128x64xf32> to vector<2x64x64xf32>
    %c0_80 = arith.constant 0 : index
    %c0_81 = arith.constant 0 : index
    %c0_82 = arith.constant 0 : index
    %200 = vector.load %arg20[%c0_80, %c0_81, %c0_82] : memref<2x64x64xf32, #tpu.memory_space<vmem>>, vector<2x64x64xf32>
    tpu.vector_store %arg20[%c0_80, %c0_81, %c0_82], %199 {strides = array<i32>} : memref<2x64x64xf32, #tpu.memory_space<vmem>>, vector<2x64x64xf32>,
    return
  }
  func.func @transform_0(%arg0: i32) -> i32 {
    %c0_i32 = arith.constant 0 : i32
    %c0_i32_0 = arith.constant 0 : i32
    return %c0_i32 : i32
  }
  func.func @transform_1(%arg0: i32) -> (i32, i32, i32) {
    %c0_i32 = arith.constant 0 : i32
    %c0_i32_0 = arith.constant 0 : i32
    %c0_i32_1 = arith.constant 0 : i32
    return %arg0, %c0_i32, %c0_i32_0 : i32, i32, i32
  }
  func.func @transform_2(%arg0: i32) -> (i32, i32) {
    %c0_i32 = arith.constant 0 : i32
    %c0_i32_0 = arith.constant 0 : i32
    %c0_i32_1 = arith.constant 0 : i32
    return %c0_i32, %c0_i32_0 : i32, i32
  }
  func.func @transform_3(%arg0: i32) -> (i32, i32) {
    %c0_i32 = arith.constant 0 : i32
    %c0_i32_0 = arith.constant 0 : i32
    %c0_i32_1 = arith.constant 0 : i32
    return %c0_i32, %c0_i32_0 : i32, i32
  }
  func.func @transform_4(%arg0: i32) -> (i32, i32) {
    %c0_i32 = arith.constant 0 : i32
    %c0_i32_0 = arith.constant 0 : i32
    %c0_i32_1 = arith.constant 0 : i32
    return %c0_i32, %c0_i32_0 : i32, i32
  }
  func.func @transform_5(%arg0: i32) -> (i32, i32) {
    %c0_i32 = arith.constant 0 : i32
    %c0_i32_0 = arith.constant 0 : i32
    %c0_i32_1 = arith.constant 0 : i32
    return %c0_i32, %c0_i32_0 : i32, i32
  }
  func.func @transform_6(%arg0: i32) -> (i32, i32) {
    %c0_i32 = arith.constant 0 : i32
    %c0_i32_0 = arith.constant 0 : i32
    %c0_i32_1 = arith.constant 0 : i32
    return %c0_i32, %c0_i32_0 : i32, i32
  }
  func.func @transform_7(%arg0: i32) -> (i32, i32) {
    %c0_i32 = arith.constant 0 : i32
    %c0_i32_0 = arith.constant 0 : i32
    %c0_i32_1 = arith.constant 0 : i32
    return %c0_i32, %c0_i32_0 : i32, i32
  }
  func.func @transform_8(%arg0: i32) -> (i32, i32) {
    %c0_i32 = arith.constant 0 : i32
    %c0_i32_0 = arith.constant 0 : i32
    %c0_i32_1 = arith.constant 0 : i32
    return %c0_i32, %c0_i32_0 : i32, i32
  }
  func.func @transform_9(%arg0: i32) -> (i32, i32) {
    %c0_i32 = arith.constant 0 : i32
    %c0_i32_0 = arith.constant 0 : i32
    %c0_i32_1 = arith.constant 0 : i32
    return %c0_i32, %c0_i32_0 : i32, i32
  }
  func.func @transform_10(%arg0: i32) -> (i32, i32) {
    %c0_i32 = arith.constant 0 : i32
    %c0_i32_0 = arith.constant 0 : i32
    %c0_i32_1 = arith.constant 0 : i32
    return %c0_i32, %c0_i32_0 : i32, i32
  }
  func.func @transform_11(%arg0: i32) -> (i32, i32) {
    %c0_i32 = arith.constant 0 : i32
    %c0_i32_0 = arith.constant 0 : i32
    %c0_i32_1 = arith.constant 0 : i32
    return %c0_i32, %c0_i32_0 : i32, i32
  }
  func.func @transform_12(%arg0: i32) -> (i32, i32) {
    %c0_i32 = arith.constant 0 : i32
    %c0_i32_0 = arith.constant 0 : i32
    %c0_i32_1 = arith.constant 0 : i32
    return %c0_i32, %c0_i32_0 : i32, i32
  }
  func.func @transform_13(%arg0: i32) -> (i32, i32) {
    %c0_i32 = arith.constant 0 : i32
    %c0_i32_0 = arith.constant 0 : i32
    %c0_i32_1 = arith.constant 0 : i32
    return %c0_i32, %c0_i32_0 : i32, i32
  }
  func.func @transform_14(%arg0: i32) -> (i32, i32) {
    %c0_i32 = arith.constant 0 : i32
    %c0_i32_0 = arith.constant 0 : i32
    %c0_i32_1 = arith.constant 0 : i32
    return %c0_i32, %c0_i32_0 : i32, i32
  }
  func.func @transform_15(%arg0: i32) -> (i32, i32) {
    %c0_i32 = arith.constant 0 : i32
    %c0_i32_0 = arith.constant 0 : i32
    %c0_i32_1 = arith.constant 0 : i32
    return %c0_i32, %c0_i32_0 : i32, i32
  }
  func.func @transform_16(%arg0: i32) -> (i32, i32) {
    %c0_i32 = arith.constant 0 : i32
    %c0_i32_0 = arith.constant 0 : i32
    %c0_i32_1 = arith.constant 0 : i32
    return %c0_i32, %c0_i32_0 : i32, i32
  }
  func.func @transform_17(%arg0: i32) -> (i32, i32) {
    %c0_i32 = arith.constant 0 : i32
    %c0_i32_0 = arith.constant 0 : i32
    %c0_i32_1 = arith.constant 0 : i32
    return %c0_i32, %c0_i32_0 : i32, i32
  }
  func.func @transform_18(%arg0: i32) -> (i32, i32) {
    %c0_i32 = arith.constant 0 : i32
    %c0_i32_0 = arith.constant 0 : i32
    %c0_i32_1 = arith.constant 0 : i32
    return %c0_i32, %c0_i32_0 : i32, i32
  }
  func.func @transform_19(%arg0: i32) -> (i32, i32, i32) {
    %c0_i32 = arith.constant 0 : i32
    %c0_i32_0 = arith.constant 0 : i32
    %c0_i32_1 = arith.constant 0 : i32
    return %arg0, %c0_i32, %c0_i32_0 : i32, i32, i32
  }
}

</mosaic_0001>

<bundles_post_ra>
// kernel: tpu_custom_call.1
= control target key start
LH: loop header
LB: loop body
LE: loop exit
PB: predicated region body
PF: predicated region fallthrough
CT: control target
= control target key end

     0   :  { %s7454_s0 = inlined_call_operand.vmem [shape: f32[2], index: 0, kind: input, shape index: {}]   ;;  %s7455_s1 = inlined_call_operand.vmem [shape: f32[2,64,128], index: 1, kind: input, shape index: {}]   ;;  %s7456_s2 = inlined_call_operand.vmem [shape: f32[128,64], index: 2, kind: input, shape index: {}]   ;;  %s7457_s3 = inlined_call_operand.vmem [shape: f32[1,64], index: 3, kind: input, shape index: {}]   ;;  %s7458_s4 = inlined_call_operand.vmem [shape: f32[1,64], index: 4, kind: input, shape index: {}]   ;;  %s7459_s5 = inlined_call_operand.vmem [shape: f32[1,64], index: 5, kind: input, shape index: {}]   ;;  %s7460_s6 = inlined_call_operand.vmem [shape: f32[64,128], index: 6, kind: input, shape index: {}]   ;;  %s7461_s7 = inlined_call_operand.vmem [shape: f32[1,128], index: 7, kind: input, shape index: {}]   ;;  %s7462_s8 = inlined_call_operand.hbm [shape: f32[32,128], index: 8, kind: input, shape index: {}]   ;;  %s7463_s9 = inlined_call_operand.vmem [shape: f32[128,128], index: 9, kind: input, shape index: {}]   ;;  %s7464_s10 = inlined_call_operand.vmem [shape: f32[4,64], index: 10, kind: input, shape index: {}]   ;;  %s7465_s11 = inlined_call_operand.hbm [shape: f32[64,64], index: 11, kind: input, shape index: {}]   ;;  %s7466_s12 = inlined_call_operand.vmem [shape: f32[1,64], index: 12, kind: input, shape index: {}]   ;;  %s7467_s13 = inlined_call_operand.vmem [shape: f32[1,64], index: 13, kind: input, shape index: {}]   ;;  %s7468_s14 = inlined_call_operand.vmem [shape: f32[1,64], index: 14, kind: input, shape index: {}]   ;;  %s7469_s15 = inlined_call_operand.vmem [shape: f32[64,256], index: 15, kind: input, shape index: {}]   ;;  %s7470_s16 = inlined_call_operand.vmem [shape: f32[1,256], index: 16, kind: input, shape index: {}]   ;;  %s7471_s17 = inlined_call_operand.vmem [shape: f32[256,64], index: 17, kind: input, shape index: {}]   ;;  %s7472_s18 = inlined_call_operand.vmem [shape: f32[1,64], index: 18, kind: input, shape index: {}]   ;;  %s7473_s19 = inlined_call_operand.hbm [shape: f32[2,64,64], index: 19, kind: output, shape index: {}]  }
   0x1   :  { %7491 = sst [smem:[#allocation29_spill]] %s7454_s0 }
   0x2   :  { %7492 = sst [smem:[#allocation30_spill]] %s7455_s1 }
   0x3   :  { %7493 = sst [smem:[#allocation31_spill]] %s7456_s2 }
   0x4   :  { %7494 = sst [smem:[#allocation32_spill]] %s7457_s3 }
   0x5   :  { %24 = vsyncpa [#allocation5], 0 }
   0x6   :  { %25 = vsyncpa [#allocation3], 0 }
   0x7   :  { %26 = vsyncpa [#allocation8], 0 }
   0x8   :  { %27 = vsyncpa [#allocation4], 0  ;;  %s7495_s20 = sld [smem:[#allocation29_spill]] }
   0xe   :  { %s34_s21 = sshll.u32 %s7495_s20, 4  ;;  %s35_s21 = int_to_ptr.vmem [resolvable:$true] %s34_s21 }
   0xf   :  { %s5258_s1 = scalar_lea.vmem %s35_s21, 16  ;;  %p5263_p1 = scmp.lt.s32.totalorder %s35_s21, %s35_s21 }
  0x10   :  { %p5259_p0 = scmp.ne.s32.totalorder %s35_s21, %s5258_s1  ;;  %p5264_p2 = scmp.lt.s32.totalorder %s5258_s1, %s5258_s1 }
  0x12   :  { %p5265_p3 = por %p5264_p2, %p5263_p1 }
  0x14   :  { %p5266_p4 = pnand %p5265_p3, %p5259_p0 }
  0x16   :  { %5269 = shalt.err (!%p5266_p4)
}
  0x17   :  { %s5338_s22 = smov [#allocation2]   ;;  %s5339_s2 = smov [#allocation6]  }
  0x18   :  { %37 = dma.vmem_to_smem %s35_s21, 16, %s5338_s22, [#allocation5]  }
  0x19   :  { %s57_s23 = sshll.u32 %s5339_s2, 4  ;;  %s58_s23 = int_to_ptr.vmem [resolvable:$true] %s57_s23 }
  0x1a   :  { %s5278_s24 = scalar_lea.vmem %s58_s23, 512  ;;  %p5283_p6 = scmp.lt.s32.totalorder %s58_s23, %s58_s23 }
  0x1b   :  { %p5279_p5 = scmp.ne.s32.totalorder %s58_s23, %s5278_s24  ;;  %p5284_p7 = scmp.lt.s32.totalorder %s5278_s24, %s5278_s24 }
  0x1d   :  { %p5285_p8 = por %p5284_p7, %p5283_p6 }
  0x1f   :  { %p5286_p9 = pnand %p5285_p8, %p5279_p5 }
  0x21   :  { %5289 = shalt.err (!%p5286_p9)
}
  0x22   :  { %s5340_s25 = smov 128   ;;  %s5341_s3 = smov 8  }
  0x23   :  { %63 = dma.hbm_to_vmem [thread:$0]  %s7462_s8, 512, %s58_s23, [#allocation3], %s5340_s25, %s5340_s25, %s5341_s3  }
  0x24   :  { %s5342_s28 = smov [#allocation7]  }
  0x25   :  { %s73_s29 = sshll.u32 %s5342_s28, 4  ;;  %s74_s29 = int_to_ptr.vmem [resolvable:$true] %s73_s29 }
  0x26   :  { %s5298_s0 = scalar_lea.vmem %s74_s29, 1024  ;;  %p5303_p11 = scmp.lt.s32.totalorder %s74_s29, %s74_s29 }
  0x27   :  { %p5299_p10 = scmp.ne.s32.totalorder %s74_s29, %s5298_s0  ;;  %p5304_p12 = scmp.lt.s32.totalorder %s5298_s0, %s5298_s0 }
  0x29   :  { %p5305_p13 = por %p5304_p12, %p5303_p11 }
  0x2b   :  { %p5306_p0 = pnand %p5305_p13, %p5299_p10 }
  0x2d   :  { %5309 = shalt.err (!%p5306_p0)
}
  0x2e   :  { %79 = dma.hbm_to_vmem [thread:$0]  %s7465_s11, 1024, %s74_s29, [#allocation8], %s5340_s25, %s5340_s25, %s5341_s3  }
  0x2f   :  { %5330 = dma.done.wait [#allocation5], 16  }
  0x30   :  { %5331 = vsyncadd [#allocation5], 4294967280 }
  0x31   :  { %5332 = dma.done.wait [#allocation3], 512  }
  0x32   :  { %5333 = vsyncadd [#allocation3], 4294966784 }
  0x33   :  { %5334 = dma.done.wait [#allocation8], 1024  }
  0x34   :  { %5335 = vsyncadd [#allocation8], 4294966272 }
  0x35   :  { %103 = sfence }
  0x36   :  { %s7496_s1 = sld [smem:[#allocation31_spill]]  ;;  %vm290_vm0 = vcmask 523264   ;;  %s5343_s22 = smov 64   ;;  %vm1136_vm1 = vcmask 1043456   ;;  %vm1087_vm2 = vcmask 31744  }
  0x37   :  { %s7497_s29 = sld [smem:[#allocation30_spill]] }
  0x38   :  { %s7498_s20 = sld [smem:[#allocation32_spill]] }
  0x39   :  { %s4138_s23 = sld [smem:[#allocation2 + $0x1]] }
  0x3c   :  { %v137_v0 = vld [vmem:[%s7496_s1 + $0x78] sm:$0xff]  ;;  %v136_v1 = vld [vmem:[%s7496_s1 + $0x70] sm:$0xff]  ;;  %v135_v2 = vld [vmem:[%s7496_s1 + $0x68] sm:$0xff] }
  0x3d   :  { %4623 = vmatprep.subr.mxu0 %v137_v0  ;;  %v134_v3 = vld [vmem:[%s7496_s1 + $0x60] sm:$0xff]  ;;  %v133_v5 = vld [vmem:[%s7496_s1 + $0x58] sm:$0xff]  ;;  %v132_v6 = vld [vmem:[%s7496_s1 + $0x50] sm:$0xff] }
  0x3e   :  { %4624 = vmatpush3.msra.mxu0 %v137_v0  ;;  %v106_v4 = vld [vmem:[%s7497_s29] sm:$0xff]  ;;  %v131_v7 = vld [vmem:[%s7496_s1 + $0x48] sm:$0xff]  ;;  %v129_v9 = vld [vmem:[%s7496_s1 + $0x38] sm:$0xff] }
  0x3f   :  { %4625 = vmatprep.subr.mxu0 %v136_v1  ;;  %4655 = vmatprep.mubr.f32.mxu0 %v106_v4  ;;  %v130_v8 = vld [vmem:[%s7496_s1 + $0x40] sm:$0xff]  ;;  %v128_v10 = vld [vmem:[%s7496_s1 + $0x30] sm:$0xff]  ;;  %v127_v11 = vld [vmem:[%s7496_s1 + $0x28] sm:$0xff] }
  0x40   :  { %4626 = vmatpush3.msra.mxu0 %v136_v1  ;;  %v126_v12 = vld [vmem:[%s7496_s1 + $0x20] sm:$0xff]  ;;  %v125_v13 = vld [vmem:[%s7496_s1 + $0x18] sm:$0xff]  ;;  %v124_v14 = vld [vmem:[%s7496_s1 + $0x10] sm:$0xff] }
  0x41   :  { %4627 = vmatprep.subr.mxu0 %v135_v2  ;;  %v123_v15 = vld [vmem:[%s7496_s1 + $0x8] sm:$0xff]  ;;  %v122_v16 = vld [vmem:[%s7496_s1] sm:$0xff]  ;;  %v108_v18 = vld [vmem:[%s7497_s29 + $0x10] sm:$0xff] }
  0x42   :  { %4628 = vmatpush3.msra.mxu0 %v135_v2  ;;  %v107_v17 = vld [vmem:[%s7497_s29 + $0x8] sm:$0xff]  ;;  %v109_v19 = vld [vmem:[%s7497_s29 + $0x18] sm:$0xff]  ;;  %v110_v20 = vld [vmem:[%s7497_s29 + $0x20] sm:$0xff] }
  0x43   :  { %4629 = vmatprep.subr.mxu0 %v134_v3  ;;  %v111_v21 = vld [vmem:[%s7497_s29 + $0x28] sm:$0xff]  ;;  %v112_v22 = vld [vmem:[%s7497_s29 + $0x30] sm:$0xff]  ;;  %v113_v23 = vld [vmem:[%s7497_s29 + $0x38] sm:$0xff] }
  0x44   :  { %4630 = vmatpush3.msra.mxu0 %v134_v3  ;;  %v114_v24 = vld [vmem:[%s7497_s29 + $0x40] sm:$0xff]  ;;  %v115_v25 = vld [vmem:[%s7497_s29 + $0x48] sm:$0xff]  ;;  %v116_v26 = vld [vmem:[%s7497_s29 + $0x50] sm:$0xff] }
  0x45   :  { %4631 = vmatprep.subr.mxu0 %v133_v5  ;;  %v117_v27 = vld [vmem:[%s7497_s29 + $0x58] sm:$0xff]  ;;  %v118_v28 = vld [vmem:[%s7497_s29 + $0x60] sm:$0xff]  ;;  %v119_v29 = vld [vmem:[%s7497_s29 + $0x68] sm:$0xff] }
  0x46   :  { %4632 = vmatpush3.msra.mxu0 %v133_v5  ;;  %v120_v30 = vld [vmem:[%s7497_s29 + $0x70] sm:$0xff]  ;;  %v121_v31 = vld [vmem:[%s7497_s29 + $0x78] sm:$0xff]  ;;  %v5561_v32 = vld [vmem:[%s7498_s20] ss:$0 sm:$0xff] }
  0x47   :  { %4633 = vmatprep.subr.mxu0 %v132_v6 }
  0x48   :  { %4634 = vmatpush3.msra.mxu0 %v132_v6 }
  0x49   :  { %4635 = vmatprep.subr.mxu0 %v131_v7 }
  0x4a   :  { %4636 = vmatpush3.msra.mxu0 %v131_v7 }
  0x4b   :  { %4637 = vmatprep.subr.mxu0 %v130_v8 }
  0x4c   :  { %4638 = vmatpush3.msra.mxu0 %v130_v8 }
  0x4d   :  { %4639 = vmatprep.subr.mxu0 %v129_v9 }
  0x4e   :  { %4640 = vmatpush3.msra.mxu0 %v129_v9 }
  0x4f   :  { %4641 = vmatprep.subr.mxu0 %v128_v10 }
  0x50   :  { %4642 = vmatpush3.msra.mxu0 %v128_v10 }
  0x51   :  { %4643 = vmatprep.subr.mxu0 %v127_v11 }
  0x52   :  { %4644 = vmatpush3.msra.mxu0 %v127_v11 }
  0x53   :  { %4645 = vmatprep.subr.mxu0 %v126_v12 }
  0x54   :  { %4646 = vmatpush3.msra.mxu0 %v126_v12 }
  0x55   :  { %4647 = vmatprep.subr.mxu0 %v125_v13 }
  0x56   :  { %4648 = vmatpush3.msra.mxu0 %v125_v13 }
  0x57   :  { %4649 = vmatprep.subr.mxu0 %v124_v14 }
  0x58   :  { %4650 = vmatpush3.msra.mxu0 %v124_v14 }
  0x59   :  { %4651 = vmatprep.subr.mxu0 %v123_v15 }
  0x5a   :  { %4652 = vmatpush3.msra.mxu0 %v123_v15 }
  0x5b   :  { %4653 = vmatprep.subr.mxu0 %v122_v16 }
  0x5c   :  { %4654 = vmatpush3.msra.mxu0 %v122_v16 }
  0x5d   :  { %4656 = vmatmul.mubr.f32.vlgmr.msra.gmra.mxu0 %v107_v17 }
  0x5e   :  { %4658 = vmatprep.mubr.f32.mxu0 %v108_v18 }
  0x61   :  { %4659 = vmatmul.mubr.f32.gmra.mxu0 %v109_v19 }
  0x62   :  { %4661 = vmatprep.mubr.f32.mxu0 %v110_v20 }
  0x65   :  { %4662 = vmatmul.mubr.f32.gmra.mxu0 %v111_v21 }
  0x66   :  { %4664 = vmatprep.mubr.f32.mxu0 %v112_v22 }
  0x69   :  { %4665 = vmatmul.mubr.f32.gmra.mxu0 %v113_v23 }
  0x6a   :  { %4667 = vmatprep.mubr.f32.mxu0 %v114_v24 }
  0x6d   :  { %4668 = vmatmul.mubr.f32.gmra.mxu0 %v115_v25 }
  0x6e   :  { %4670 = vmatprep.mubr.f32.mxu0 %v116_v26 }
  0x71   :  { %4671 = vmatmul.mubr.f32.gmra.mxu0 %v117_v27 }
  0x72   :  { %4673 = vmatprep.mubr.f32.mxu0 %v118_v28 }
  0x75   :  { %4674 = vmatmul.mubr.f32.gmra.mxu0 %v119_v29 }
  0x76   :  { %4676 = vmatprep.mubr.f32.mxu0 %v120_v30 }
  0x79   :  { %4677 = vmatmul.mubr.f32.gmra.mxu0 %v121_v31 }
 0x11d   :  { %v4657_v33 = vpop.f32.mrf.mxu0 }
 0x11e   :  { %v5564_v34 = vadd.f32 %v4657_v33, %v5561_v32 }
 0x11f   :  { %v211_v35 = vpop.f32.mrf.mxu0 }
 0x120   :  { %v5567_v36 = vadd.f32 %v5561_v32, %v211_v35  ;;  %v294_v37 = vsel %vm290_vm0, %v5564_v34, 0.0  ;;  %v366_v43 = vmul.f32 %v5564_v34, %v5564_v34 }
 0x121   :  { %295 = vadd.xlane.f32.xlu0 %v294_v37  ;;  %v4660_v38 = vpop.f32.mrf.mxu0 }
 0x122   :  { %v5572_v39 = vadd.f32 %v4660_v38, %v5561_v32  ;;  %v365_v40 = vmul.f32 %v5567_v36, %v5567_v36  ;;  %v291_v42 = vsel %vm290_vm0, %v5567_v36, 0.0  ;;  %v384_v48 = vsel %vm290_vm0, %v366_v43, 0.0 }
 0x123   :  { %v221_v44 = vpop.f32.mrf.mxu0 }
 0x124   :  { %7499 = vst [vmem:[#allocation14_spill] sm:$0xff] %v5572_v39  ;;  %v381_v41 = vsel %vm290_vm0, %v365_v40, 0.0  ;;  %v300_v45 = vsel %vm290_vm0, %v5572_v39, 0.0  ;;  %v5584_v47 = vadd.f32 %v5561_v32, %v221_v44  ;;  %v368_v49 = vmul.f32 %v5572_v39, %v5572_v39 }
 0x125   :  { %382 = vadd.xlane.f32.xlu1 %v381_v41  ;;  %292 = vadd.xlane.f32.xlu0 %v291_v42  ;;  %v4663_v46 = vpop.f32.mrf.mxu0 }
 0x126   :  { %7500 = vst [vmem:[#allocation15_spill] sm:$0xff] %v5584_v47  ;;  %v5590_v50 = vadd.f32 %v4663_v46, %v5561_v32  ;;  %v297_v52 = vsel %vm290_vm0, %v5584_v47, 0.0  ;;  %v390_v53 = vsel %vm290_vm0, %v368_v49, 0.0  ;;  %v367_v54 = vmul.f32 %v5584_v47, %v5584_v47 }
 0x127   :  { %v231_v51 = vpop.f32.mrf.mxu0 }
 0x128   :  { %7501 = vst [vmem:[#allocation16_spill] sm:$0xff] %v5590_v50  ;;  %v306_v56 = vsel %vm290_vm0, %v5590_v50, 0.0  ;;  %v5600_v57 = vadd.f32 %v5561_v32, %v231_v51  ;;  %v387_v58 = vsel %vm290_vm0, %v367_v54, 0.0  ;;  %v370_v59 = vmul.f32 %v5590_v50, %v5590_v50  ;;  %v552_v54 = vld [vmem:[%s7460_s6 + $0x38] sm:$0xff] }
 0x129   :  { %301 = vadd.xlane.f32.xlu1 %v300_v45  ;;  %385 = vadd.xlane.f32.xlu0 %v384_v48  ;;  %v4666_v55 = vpop.f32.mrf.mxu0 }
 0x12a   :  { %7502 = vst [vmem:[#allocation17_spill] sm:$0xff] %v5600_v57  ;;  %v5606_v61 = vadd.f32 %v4666_v55, %v5561_v32  ;;  %v303_v0 = vsel %vm290_vm0, %v5600_v57, 0.0  ;;  %v396_v1 = vsel %vm290_vm0, %v370_v59, 0.0  ;;  %v369_v2 = vmul.f32 %v5600_v57, %v5600_v57  ;;  %v551_v55 = vld [vmem:[%s7460_s6 + $0x30] sm:$0xff]  ;;  %4679 = vmatprep.subr.mxu1 %v552_v54  ;;  %v548_v59 = vld [vmem:[%s7460_s6 + $0x18] sm:$0xff] }
 0x12b   :  { %v241_v60 = vpop.f32.mrf.mxu0  ;;  %4680 = vmatpush3.msra.mxu1 %v552_v54 }
 0x12c   :  { %7503 = vst [vmem:[#allocation18_spill] sm:$0xff] %v5606_v61  ;;  %v5609_v63 = vadd.f32 %v5561_v32, %v241_v60  ;;  %v312_v3 = vsel %vm290_vm0, %v5606_v61, 0.0  ;;  %v393_v5 = vsel %vm290_vm0, %v369_v2, 0.0  ;;  %v372_v12 = vmul.f32 %v5606_v61, %v5606_v61  ;;  %4681 = vmatprep.subr.mxu1 %v551_v55  ;;  %v547_v60 = vld [vmem:[%s7460_s6 + $0x10] sm:$0xff] }
 0x12d   :  { %298 = vadd.xlane.f32.xlu1 %v297_v52  ;;  %391 = vadd.xlane.f32.xlu0 %v390_v53  ;;  %v4669_v62 = vpop.f32.mrf.mxu0 }
 0x12e   :  { %7504 = vst [vmem:[#allocation19_spill] sm:$0xff] %v5609_v63  ;;  %v371_v6 = vmul.f32 %v5609_v63, %v5609_v63  ;;  %v5625_v9 = vadd.f32 %v4669_v62, %v5561_v32  ;;  %v309_v10 = vsel %vm290_vm0, %v5609_v63, 0.0  ;;  %v402_v15 = vsel %vm290_vm0, %v372_v12, 0.0  ;;  %4682 = vmatpush3.msra.mxu1 %v551_v55  ;;  %v546_v62 = vld [vmem:[%s7460_s6 + $0x8] sm:$0xff] }
 0x12f   :  { %v251_v4 = vpop.f32.mrf.mxu0 }
 0x130   :  { %v5622_v7 = vadd.f32 %v5561_v32, %v251_v4  ;;  %7506 = vst [vmem:[#allocation21_spill] sm:$0xff] %v5625_v9  ;;  %v399_v11 = vsel %vm290_vm0, %v371_v6, 0.0  ;;  %v374_v16 = vmul.f32 %v5625_v9, %v5625_v9  ;;  %v318_v19 = vsel %vm290_vm0, %v5625_v9, 0.0 }
 0x131   :  { %307 = vadd.xlane.f32.xlu1 %v306_v56  ;;  %388 = vadd.xlane.f32.xlu0 %v387_v58  ;;  %v4672_v8 = vpop.f32.mrf.mxu0  ;;  %v550_v56 = vld [vmem:[%s7460_s6 + $0x28] sm:$0xff]  ;;  %v549_v58 = vld [vmem:[%s7460_s6 + $0x20] sm:$0xff] }
 0x132   :  { %7505 = vst [vmem:[#allocation20_spill] sm:$0xff] %v5622_v7  ;;  %v315_v13 = vsel %vm290_vm0, %v5622_v7, 0.0  ;;  %v5641_v18 = vadd.f32 %v4672_v8, %v5561_v32  ;;  %v408_v20 = vsel %vm290_vm0, %v374_v16, 0.0  ;;  %v373_v21 = vmul.f32 %v5622_v7, %v5622_v7  ;;  %4683 = vmatprep.subr.mxu1 %v550_v56 }
 0x133   :  { %v261_v14 = vpop.f32.mrf.mxu0  ;;  %4684 = vmatpush3.msra.mxu1 %v550_v56 }
 0x134   :  { %v5638_v17 = vadd.f32 %v5561_v32, %v261_v14  ;;  %7508 = vst [vmem:[#allocation23_spill] sm:$0xff] %v5641_v18  ;;  %v405_v24 = vsel %vm290_vm0, %v373_v21, 0.0  ;;  %v376_v25 = vmul.f32 %v5641_v18, %v5641_v18  ;;  %v324_v28 = vsel %vm290_vm0, %v5641_v18, 0.0  ;;  %4685 = vmatprep.subr.mxu1 %v549_v58 }
 0x135   :  { %304 = vadd.xlane.f32.xlu1 %v303_v0  ;;  %397 = vadd.xlane.f32.xlu0 %v396_v1  ;;  %v4675_v23 = vpop.f32.mrf.mxu0  ;;  %v545_v0 = vld [vmem:[%s7460_s6] sm:$0xff] }
 0x136   :  { %7507 = vst [vmem:[#allocation22_spill] sm:$0xff] %v5638_v17  ;;  %v321_v22 = vsel %vm290_vm0, %v5638_v17, 0.0  ;;  %v5654_v26 = vadd.f32 %v4675_v23, %v5561_v32  ;;  %v414_v29 = vsel %vm290_vm0, %v376_v25, 0.0  ;;  %v375_v30 = vmul.f32 %v5638_v17, %v5638_v17  ;;  %4686 = vmatpush3.msra.mxu1 %v549_v58 }
 0x137   :  { %v271_v27 = vpop.f32.mrf.mxu0  ;;  %4687 = vmatprep.subr.mxu1 %v548_v59 }
 0x138   :  { %7509 = vst [vmem:[#allocation24_spill] sm:$0xff] %v5654_v26  ;;  %v330_v33 = vsel %vm290_vm0, %v5654_v26, 0.0  ;;  %v5664_v35 = vadd.f32 %v5561_v32, %v271_v27  ;;  %v411_v37 = vsel %vm290_vm0, %v375_v30, 0.0  ;;  %v378_v38 = vmul.f32 %v5654_v26, %v5654_v26  ;;  %4688 = vmatpush3.msra.mxu1 %v548_v59 }
 0x139   :  { %313 = vadd.xlane.f32.xlu1 %v312_v3  ;;  %394 = vadd.xlane.f32.xlu0 %v393_v5  ;;  %v4678_v31 = vpop.f32.mrf.mxu0 }
 0x13a   :  { %7510 = vst [vmem:[#allocation25_spill] sm:$0xff] %v5664_v35  ;;  %v5670_v41 = vadd.f32 %v4678_v31, %v5561_v32  ;;  %v327_v43 = vsel %vm290_vm0, %v5664_v35, 0.0  ;;  %v420_v44 = vsel %vm290_vm0, %v378_v38, 0.0  ;;  %v377_v45 = vmul.f32 %v5664_v35, %v5664_v35  ;;  %4689 = vmatprep.subr.mxu1 %v547_v60 }
 0x13b   :  { %v281_v40 = vpop.f32.mrf.mxu0  ;;  %4690 = vmatpush3.msra.mxu1 %v547_v60 }
 0x13c   :  { %7511 = vst [vmem:[#allocation26_spill] sm:$0xff] %v5670_v41  ;;  %v5673_v42 = vadd.f32 %v5561_v32, %v281_v40  ;;  %v336_v46 = vsel %vm290_vm0, %v5670_v41, 0.0  ;;  %v417_v48 = vsel %vm290_vm0, %v377_v45, 0.0  ;;  %v380_v52 = vmul.f32 %v5670_v41, %v5670_v41  ;;  %4691 = vmatprep.subr.mxu1 %v546_v62 }
 0x13d   :  { %310 = vadd.xlane.f32.xlu1 %v309_v10  ;;  %400 = vadd.xlane.f32.xlu0 %v399_v11 }
 0x13e   :  { %7512 = vst [vmem:[#allocation27_spill] sm:$0xff] %v5673_v42  ;;  %v379_v49 = vmul.f32 %v5673_v42, %v5673_v42  ;;  %v333_v32 = vsel %vm290_vm0, %v5673_v42, 0.0  ;;  %v426_v53 = vsel %vm290_vm0, %v380_v52, 0.0  ;;  %4692 = vmatpush3.msra.mxu1 %v546_v62 }
 0x13f   :  { %4693 = vmatprep.subr.mxu1 %v545_v0 }
 0x140   :  { %v423_v51 = vsel %vm290_vm0, %v379_v49, 0.0  ;;  %4694 = vmatpush3.msra.mxu1 %v545_v0 }
 0x141   :  { %403 = vadd.xlane.f32.xlu1 %v402_v15  ;;  %316 = vadd.xlane.f32.xlu0 %v315_v13 }
 0x145   :  { %319 = vadd.xlane.f32.xlu1 %v318_v19  ;;  %409 = vadd.xlane.f32.xlu0 %v408_v20 }
 0x149   :  { %406 = vadd.xlane.f32.xlu1 %v405_v24  ;;  %322 = vadd.xlane.f32.xlu0 %v321_v22 }
 0x14d   :  { %325 = vadd.xlane.f32.xlu1 %v324_v28  ;;  %415 = vadd.xlane.f32.xlu0 %v414_v29 }
 0x151   :  { %331 = vadd.xlane.f32.xlu1 %v330_v33  ;;  %412 = vadd.xlane.f32.xlu0 %v411_v37 }
 0x155   :  { %328 = vadd.xlane.f32.xlu1 %v327_v43  ;;  %421 = vadd.xlane.f32.xlu0 %v420_v44 }
 0x159   :  { %337 = vadd.xlane.f32.xlu1 %v336_v46  ;;  %418 = vadd.xlane.f32.xlu0 %v417_v48 }
 0x15d   :  { %334 = vadd.xlane.f32.xlu1 %v333_v32  ;;  %424 = vadd.xlane.f32.xlu0 %v423_v51 }
 0x161   :  { %427 = vadd.xlane.f32.xlu1 %v426_v53 }
 0x1aa   :  { %v296_v1 = vpop.xlane.xlu0 %295 }
 0x1ae   :  { %v383_v2 = vpop.xlane.xlu1 %382  ;;  %v293_v3 = vpop.xlane.xlu0 %292 }
 0x1af   :  { %v339_v10 = vadd.f32 %v296_v1, %v293_v3 }
 0x1b2   :  { %v302_v4 = vpop.xlane.xlu1 %301  ;;  %v386_v5 = vpop.xlane.xlu0 %385 }
 0x1b3   :  { %v429_v13 = vadd.f32 %v386_v5, %v383_v2 }
 0x1b6   :  { %v299_v6 = vpop.xlane.xlu1 %298  ;;  %v392_v8 = vpop.xlane.xlu0 %391 }
 0x1b7   :  { %v340_v14 = vadd.f32 %v339_v10, %v299_v6 }
 0x1b9   :  { %v341_v20 = vadd.f32 %v340_v14, %v302_v4 }
 0x1ba   :  { %v308_v11 = vpop.xlane.xlu1 %307  ;;  %v389_v12 = vpop.xlane.xlu0 %388 }
 0x1bb   :  { %v430_v15 = vadd.f32 %v429_v13, %v389_v12 }
 0x1bd   :  { %v431_v22 = vadd.f32 %v430_v15, %v392_v8 }
 0x1be   :  { %v305_v16 = vpop.xlane.xlu1 %304  ;;  %v398_v19 = vpop.xlane.xlu0 %397 }
 0x1bf   :  { %v342_v21 = vadd.f32 %v341_v20, %v305_v16 }
 0x1c1   :  { %v343_v27 = vadd.f32 %v342_v21, %v308_v11 }
 0x1c2   :  { %v314_v23 = vpop.xlane.xlu1 %313  ;;  %v395_v24 = vpop.xlane.xlu0 %394 }
 0x1c3   :  { %v432_v25 = vadd.f32 %v431_v22, %v395_v24 }
 0x1c5   :  { %v433_v28 = vadd.f32 %v432_v25, %v398_v19 }
 0x1c6   :  { %v311_v29 = vpop.xlane.xlu1 %310  ;;  %v401_v30 = vpop.xlane.xlu0 %400 }
 0x1c7   :  { %v344_v31 = vadd.f32 %v343_v27, %v311_v29  ;;  %v434_v37 = vadd.f32 %v433_v28, %v401_v30 }
 0x1c9   :  { %v345_v33 = vadd.f32 %v344_v31, %v314_v23 }
 0x1ca   :  { %v404_v38 = vpop.xlane.xlu1 %403  ;;  %v317_v40 = vpop.xlane.xlu0 %316 }
 0x1cb   :  { %v346_v43 = vrot.slane %v345_v33, 4  ;;  %v435_v44 = vadd.f32 %v434_v37, %v404_v38 }
 0x1cd   :  { %v347_v45 = vadd.f32 %v346_v43, %v345_v33  ;;  %v436_v46 = vrot.slane %v435_v44, 4 }
 0x1ce   :  { %v320_v48 = vpop.xlane.xlu1 %319  ;;  %v410_v49 = vpop.xlane.xlu0 %409 }
 0x1cf   :  { %v348_v32 = vrot.slane %v347_v45, 2  ;;  %v437_v51 = vadd.f32 %v436_v46, %v435_v44  ;;  %v352_v10 = vadd.f32 %v320_v48, %v317_v40  ;;  %v5726_v46 = vld [vmem:[%s7458_s4] ss:$0 sm:$0xff] }
 0x1d1   :  { %v349_v52 = vadd.f32 %v348_v32, %v347_v45  ;;  %v438_v53 = vrot.slane %v437_v51, 2 }
 0x1d2   :  { %v407_v54 = vpop.xlane.xlu1 %406  ;;  %v323_v55 = vpop.xlane.xlu0 %322 }
 0x1d3   :  { %v350_v56 = vrot.slane %v349_v52, 1  ;;  %v439_v58 = vadd.f32 %v438_v53, %v437_v51  ;;  %v442_v11 = vadd.f32 %v410_v49, %v407_v54  ;;  %v353_v13 = vadd.f32 %v352_v10, %v323_v55  ;;  %v5737_v55 = vld [vmem:[%s7459_s5] ss:$0 sm:$0xff] }
 0x1d5   :  { %v351_v59 = vadd.f32 %v350_v56, %v349_v52  ;;  %v440_v60 = vrot.slane %v439_v58, 1 }
 0x1d6   :  { %v326_v62 = vpop.xlane.xlu1 %325  ;;  %v416_v0 = vpop.xlane.xlu0 %415 }
 0x1d7   :  { %v5715_v1 = vmul.f32 0.00024414063, %v351_v59  ;;  %v441_v2 = vadd.f32 %v440_v60, %v439_v58  ;;  %v354_v19 = vadd.f32 %v353_v13, %v326_v62 }
 0x1d9   :  { %v457_v3 = vmul.f32 0.00024414063, %v441_v2  ;;  %v459_v4 = vmul.f32 %v5715_v1, %v5715_v1  ;;  %v463_v43 = vsub.f32 %v5567_v36, %v5715_v1  ;;  %v464_v44 = vsub.f32 %v5564_v34, %v5715_v1 }
 0x1da   :  { %v332_v5 = vpop.xlane.xlu1 %331  ;;  %v413_v6 = vpop.xlane.xlu0 %412  ;;  %v465_v48 = vsub.f32 %v5584_v47, %v5715_v1  ;;  %v466_v49 = vsub.f32 %v5572_v39, %v5715_v1  ;;  %v467_v32 = vsub.f32 %v5600_v57, %v5715_v1 }
 0x1db   :  { %v461_v8 = vsub.f32 %v457_v3, %v459_v4  ;;  %v443_v14 = vadd.f32 %v442_v11, %v413_v6  ;;  %v468_v4 = vsub.f32 %v5590_v50, %v5715_v1 }
 0x1dd   :  { %v479_v12 = vadd.f32 1e-05, %v461_v8  ;;  %v444_v21 = vadd.f32 %v443_v14, %v416_v0 }
 0x1de   :  { %v329_v15 = vpop.xlane.xlu1 %328  ;;  %v422_v16 = vpop.xlane.xlu0 %421 }
 0x1df   :  { %5042 = vrsqrt.f32 %v479_v12  ;;  %v355_v20 = vadd.f32 %v354_v19, %v329_v15 }
 0x1e1   :  { %v356_v25 = vadd.f32 %v355_v20, %v332_v5  ;;  %v469_v5 = vsub.f32 %v5609_v63, %v5715_v1 }
 0x1e2   :  { %v338_v22 = vpop.xlane.xlu1 %337  ;;  %v419_v23 = vpop.xlane.xlu0 %418 }
 0x1e3   :  { %v445_v24 = vadd.f32 %v444_v21, %v419_v23  ;;  %v470_v21 = vsub.f32 %v5606_v61, %v5715_v1 }
 0x1e5   :  { %v446_v27 = vadd.f32 %v445_v24, %v422_v16 }
 0x1e6   :  { %v335_v28 = vpop.xlane.xlu1 %334  ;;  %v425_v29 = vpop.xlane.xlu0 %424 }
 0x1e7   :  { %v357_v30 = vadd.f32 %v356_v25, %v335_v28  ;;  %v447_v33 = vadd.f32 %v446_v27, %v425_v29 }
 0x1e9   :  { %v358_v31 = vadd.f32 %v357_v30, %v338_v22 }
 0x1ea   :  { %v428_v37 = vpop.xlane.xlu1 %427 }
 0x1eb   :  { %v359_v38 = vrot.slane %v358_v31, 4  ;;  %v448_v40 = vadd.f32 %v447_v33, %v428_v37 }
 0x1ec   :  { %v5043_v45 = vpop.eup %5042 }
 0x1ed   :  { %v360_v51 = vadd.f32 %v359_v38, %v358_v31  ;;  %v449_v52 = vrot.slane %v448_v40, 4  ;;  %v483_v53 = vmul.f32 %v5043_v45, %v463_v43  ;;  %v484_v54 = vmul.f32 %v5043_v45, %v464_v44 }
 0x1ee   :  { %v485_v56 = vmul.f32 %v5043_v45, %v465_v48  ;;  %v486_v58 = vmul.f32 %v5043_v45, %v466_v49  ;;  %v487_v59 = vmul.f32 %v5043_v45, %v467_v32  ;;  %v488_v14 = vmul.f32 %v5043_v45, %v468_v4 }
 0x1ef   :  { %v361_v60 = vrot.slane %v360_v51, 2  ;;  %v450_v62 = vadd.f32 %v449_v52, %v448_v40  ;;  %v506_v0 = vmul.f32 %v5726_v46, %v483_v53  ;;  %v507_v2 = vmul.f32 %v5726_v46, %v484_v54 }
 0x1f0   :  { %v508_v3 = vmul.f32 %v5726_v46, %v485_v56  ;;  %v509_v12 = vmul.f32 %v5726_v46, %v486_v58  ;;  %v510_v13 = vmul.f32 %v5726_v46, %v487_v59  ;;  %v489_v20 = vmul.f32 %v5043_v45, %v469_v5 }
 0x1f1   :  { %v362_v6 = vadd.f32 %v361_v60, %v360_v51  ;;  %v451_v8 = vrot.slane %v450_v62, 2  ;;  %v529_v10 = vadd.f32 %v5737_v55, %v506_v0  ;;  %v530_v11 = vadd.f32 %v5737_v55, %v507_v2 }
 0x1f2   :  { %v531_v19 = vadd.f32 %v5737_v55, %v508_v3  ;;  %v532_v24 = vadd.f32 %v5737_v55, %v509_v12  ;;  %v511_v25 = vmul.f32 %v5726_v46, %v488_v14  ;;  %v490_v27 = vmul.f32 %v5043_v45, %v470_v21 }
 0x1f3   :  { %v363_v15 = vrot.slane %v362_v6, 1  ;;  %v452_v16 = vadd.f32 %v451_v8, %v450_v62  ;;  %4695 = vmatprep.mubr.msk.f32.mxu1 %vm290_vm0, %v529_v10  ;;  %v533_v30 = vadd.f32 %v5737_v55, %v510_v13  ;;  %v512_v31 = vmul.f32 %v5726_v46, %v489_v20 }
 0x1f4   :  { %4696 = vmatmul.mubr.msk.f32.vlgmr.msra.gmra.mxu1 %vm290_vm0, %v530_v11  ;;  %v534_v1 = vadd.f32 %v5737_v55, %v511_v25  ;;  %v513_v38 = vmul.f32 %v5726_v46, %v490_v27  ;;  %v753_v27 = vld [vmem:[#allocation6] sm:$0xff] }
 0x1f5   :  { %v364_v22 = vadd.f32 %v363_v15, %v362_v6  ;;  %v453_v23 = vrot.slane %v452_v16, 1  ;;  %4698 = vmatprep.mubr.msk.f32.mxu1 %vm290_vm0, %v531_v19  ;;  %v535_v43 = vadd.f32 %v5737_v55, %v512_v31 }
 0x1f6   :  { %v536_v45 = vadd.f32 %v5737_v55, %v513_v38 }
 0x1f7   :  { %v456_v28 = vmul.f32 0.00024414063, %v364_v22  ;;  %v454_v29 = vadd.f32 %v453_v23, %v452_v16 }
 0x1f8   :  { %4699 = vmatmul.mubr.msk.f32.gmra.mxu1 %vm290_vm0, %v532_v24 }
 0x1f9   :  { %v458_v33 = vmul.f32 0.00024414063, %v454_v29  ;;  %v460_v37 = vmul.f32 %v456_v28, %v456_v28  ;;  %4701 = vmatprep.mubr.msk.f32.mxu1 %vm290_vm0, %v533_v30  ;;  %v471_v48 = vsub.f32 %v5622_v7, %v456_v28  ;;  %v472_v49 = vsub.f32 %v5625_v9, %v456_v28 }
 0x1fa   :  { %v473_v32 = vsub.f32 %v5638_v17, %v456_v28  ;;  %v474_v52 = vsub.f32 %v5641_v18, %v456_v28  ;;  %v475_v58 = vsub.f32 %v5664_v35, %v456_v28  ;;  %v476_v3 = vsub.f32 %v5654_v26, %v456_v28 }
 0x1fb   :  { %v462_v40 = vsub.f32 %v458_v33, %v460_v37  ;;  %v477_v6 = vsub.f32 %v5673_v42, %v456_v28  ;;  %v478_v14 = vsub.f32 %v5670_v41, %v456_v28 }
 0x1fc   :  { %4702 = vmatmul.mubr.msk.f32.gmra.mxu1 %vm290_vm0, %v534_v1 }
 0x1fd   :  { %v480_v44 = vadd.f32 1e-05, %v462_v40  ;;  %4704 = vmatprep.mubr.msk.f32.mxu1 %vm290_vm0, %v535_v43 }
 0x1ff   :  { %5044 = vrsqrt.f32 %v480_v44 }
 0x200   :  { %4705 = vmatmul.mubr.msk.f32.gmra.mxu1 %vm290_vm0, %v536_v45 }
 0x20c   :  { %v5045_v51 = vpop.eup %5044 }
 0x20d   :  { %v491_v53 = vmul.f32 %v5045_v51, %v471_v48  ;;  %v492_v54 = vmul.f32 %v5045_v51, %v472_v49  ;;  %v493_v56 = vmul.f32 %v5045_v51, %v473_v32  ;;  %v494_v59 = vmul.f32 %v5045_v51, %v474_v52 }
 0x20e   :  { %v495_v2 = vmul.f32 %v5045_v51, %v475_v58  ;;  %v496_v10 = vmul.f32 %v5045_v51, %v476_v3  ;;  %v497_v13 = vmul.f32 %v5045_v51, %v477_v6  ;;  %v498_v19 = vmul.f32 %v5045_v51, %v478_v14  ;;  %v5885_v3 = vld [vmem:[%s7464_s10] sm:$0xf]  ;;  %s104_s10 = sld [smem:[#allocation2]] }
 0x20f   :  { %v514_v60 = vmul.f32 %v5726_v46, %v491_v53  ;;  %v515_v62 = vmul.f32 %v5726_v46, %v492_v54  ;;  %v516_v0 = vmul.f32 %v5726_v46, %v493_v56  ;;  %v517_v8 = vmul.f32 %v5726_v46, %v494_v59  ;;  %4783 = vmatprep.subr.msk.mxu0 %vm1136_vm1, %v5885_v3 }
 0x210   :  { %v518_v12 = vmul.f32 %v5726_v46, %v495_v2  ;;  %v519_v16 = vmul.f32 %v5726_v46, %v496_v10  ;;  %v520_v21 = vmul.f32 %v5726_v46, %v497_v13  ;;  %v521_v23 = vmul.f32 %v5726_v46, %v498_v19  ;;  %4784 = vmatpush3.msk.msra.mxu0 %vm1136_vm1, %v5885_v3  ;;  %v756_v13 = vld [vmem:[#allocation6 + $0x18] sm:$0xff] }
 0x211   :  { %v537_v4 = vadd.f32 %v5737_v55, %v514_v60  ;;  %v538_v5 = vadd.f32 %v5737_v55, %v515_v62  ;;  %v539_v11 = vadd.f32 %v5737_v55, %v516_v0  ;;  %v540_v15 = vadd.f32 %v5737_v55, %v517_v8  ;;  %4809 = vmatprep.subr.msk.mxu0 %vm290_vm0, %v5885_v3 }
 0x212   :  { %v541_v20 = vadd.f32 %v5737_v55, %v518_v12  ;;  %v542_v22 = vadd.f32 %v5737_v55, %v519_v16  ;;  %v543_v24 = vadd.f32 %v5737_v55, %v520_v21  ;;  %v544_v25 = vadd.f32 %v5737_v55, %v521_v23  ;;  %v5810_v55 = vld [vmem:[%s7461_s7] ss:$0 sm:$0xff]  ;;  %v755_v12 = vld [vmem:[#allocation6 + $0x10] sm:$0xff] }
 0x213   :  { %4707 = vmatprep.mubr.msk.f32.mxu1 %vm290_vm0, %v537_v4 }
 0x214   :  { %4708 = vmatmul.mubr.msk.f32.gmra.mxu1 %vm290_vm0, %v538_v5 }
 0x215   :  { %4710 = vmatprep.mubr.msk.f32.mxu1 %vm290_vm0, %v539_v11  ;;  %v754_v11 = vld [vmem:[#allocation6 + $0x8] sm:$0xff] }
 0x218   :  { %4711 = vmatmul.mubr.msk.f32.gmra.mxu1 %vm290_vm0, %v540_v15 }
 0x219   :  { %4713 = vmatprep.mubr.msk.f32.mxu1 %vm290_vm0, %v541_v20 }
 0x21c   :  { %4714 = vmatmul.mubr.msk.f32.gmra.mxu1 %vm290_vm0, %v542_v22 }
 0x21d   :  { %4716 = vmatprep.mubr.msk.f32.mxu1 %vm290_vm0, %v543_v24 }
 0x220   :  { %4717 = vmatmul.mubr.msk.f32.gmra.mxu1 %vm290_vm0, %v544_v25 }
 0x221   :  { %4751 = vmatprep.mubr.f32.mxu1 %v753_v27 }
 0x2b4   :  { %v5801_v28 = vpop.f32.mrf.mxu1 }
 0x2b5   :  { %v5910_v6 = vadd.f32 %v5801_v28, %v5810_v55 }
 0x2b6   :  { %v5803_v29 = vpop.f32.mrf.mxu1 }
 0x2b7   :  { %v5930_v10 = vadd.f32 %v5810_v55, %v5803_v29  ;;  %v844_v15 = vmul.f32 %v5910_v6, %v5910_v6 }
 0x2b8   :  { %v4700_v30 = vpop.f32.mrf.mxu1 }
 0x2b9   :  { %v5891_v4 = vadd.f32 %v4700_v30, %v5810_v55  ;;  %v843_v14 = vmul.f32 %v5930_v10, %v5930_v10 }
 0x2ba   :  { %v5805_v31 = vpop.f32.mrf.mxu1 }
 0x2bb   :  { %v5918_v8 = vadd.f32 %v5810_v55, %v5805_v31  ;;  %v846_v19 = vmul.f32 %v5891_v4, %v5891_v4 }
 0x2bc   :  { %v4703_v46 = vpop.f32.mrf.mxu1 }
 0x2bd   :  { %v5870_v0 = vadd.f32 %v4703_v46, %v5810_v55  ;;  %v845_v16 = vmul.f32 %v5918_v8, %v5918_v8 }
 0x2be   :  { %v694_v33 = vpop.f32.mrf.mxu1 }
 0x2bf   :  { %v5900_v5 = vadd.f32 %v5810_v55, %v694_v33  ;;  %v848_v21 = vmul.f32 %v5870_v0, %v5870_v0 }
 0x2c0   :  { %v4706_v37 = vpop.f32.mrf.mxu1 }
 0x2c1   :  { %v5856_v60 = vadd.f32 %v4706_v37, %v5810_v55  ;;  %v847_v20 = vmul.f32 %v5900_v5, %v5900_v5 }
 0x2c2   :  { %v704_v1 = vpop.f32.mrf.mxu1 }
 0x2c3   :  { %v5877_v2 = vadd.f32 %v5810_v55, %v704_v1  ;;  %v850_v23 = vmul.f32 %v5856_v60, %v5856_v60 }
 0x2c5   :  { %v849_v22 = vmul.f32 %v5877_v2, %v5877_v2 }
 0x2d4   :  { %v4709_v38 = vpop.f32.mrf.mxu1 }
 0x2d5   :  { %v5842_v58 = vadd.f32 %v4709_v38, %v5810_v55 }
 0x2d6   :  { %v714_v40 = vpop.f32.mrf.mxu1 }
 0x2d7   :  { %v5863_v62 = vadd.f32 %v5810_v55, %v714_v40  ;;  %v852_v25 = vmul.f32 %v5842_v58, %v5842_v58 }
 0x2d8   :  { %v4712_v43 = vpop.f32.mrf.mxu1 }
 0x2d9   :  { %v5828_v54 = vadd.f32 %v4712_v43, %v5810_v55  ;;  %v851_v24 = vmul.f32 %v5863_v62, %v5863_v62 }
 0x2da   :  { %v724_v44 = vpop.f32.mrf.mxu1 }
 0x2db   :  { %v5849_v59 = vadd.f32 %v5810_v55, %v724_v44  ;;  %v854_v28 = vmul.f32 %v5828_v54, %v5828_v54 }
 0x2dc   :  { %v4715_v45 = vpop.f32.mrf.mxu1 }
 0x2dd   :  { %v5813_v48 = vadd.f32 %v4715_v45, %v5810_v55  ;;  %v853_v27 = vmul.f32 %v5849_v59, %v5849_v59 }
 0x2de   :  { %v734_v49 = vpop.f32.mrf.mxu1 }
 0x2df   :  { %2260 = vrot.lane.b32.xlu1 %v5813_v48, %s5343_s22  ;;  %v5835_v56 = vadd.f32 %v5810_v55, %v734_v49  ;;  %v856_v30 = vmul.f32 %v5813_v48, %v5813_v48 }
 0x2e0   :  { %v4718_v32 = vpop.f32.mrf.mxu1 }
 0x2e1   :  { %v5818_v51 = vadd.f32 %v4718_v32, %v5810_v55  ;;  %v855_v29 = vmul.f32 %v5835_v56, %v5835_v56 }
 0x2e2   :  { %v744_v52 = vpop.f32.mrf.mxu1 }
 0x2e3   :  { %v5821_v53 = vadd.f32 %v5810_v55, %v744_v52  ;;  %2264 = vrot.lane.b32.xlu0 %v5818_v51, %s5343_s22  ;;  %4719 = vmatprep.subr.mxu1 %v5818_v51  ;;  %v858_v46 = vmul.f32 %v5818_v51, %v5818_v51 }
 0x2e4   :  { %4720 = vmatpush3.msra.mxu1 %v5818_v51 }
 0x2e5   :  { %2262 = vrot.lane.b32.xlu1 %v5821_v53, %s5343_s22  ;;  %4721 = vmatprep.subr.mxu1 %v5821_v53  ;;  %v857_v31 = vmul.f32 %v5821_v53, %v5821_v53 }
 0x2e6   :  { %4722 = vmatpush3.msra.mxu1 %v5821_v53 }
 0x2e7   :  { %2256 = vrot.lane.b32.xlu0 %v5828_v54, %s5343_s22  ;;  %4723 = vmatprep.subr.mxu1 %v5813_v48 }
 0x2e8   :  { %4724 = vmatpush3.msra.mxu1 %v5813_v48 }
 0x2e9   :  { %2258 = vrot.lane.b32.xlu1 %v5835_v56, %s5343_s22  ;;  %4725 = vmatprep.subr.mxu1 %v5835_v56 }
 0x2ea   :  { %4726 = vmatpush3.msra.mxu1 %v5835_v56 }
 0x2eb   :  { %2252 = vrot.lane.b32.xlu0 %v5842_v58, %s5343_s22  ;;  %4727 = vmatprep.subr.mxu1 %v5828_v54 }
 0x2ec   :  { %4728 = vmatpush3.msra.mxu1 %v5828_v54 }
 0x2ed   :  { %2254 = vrot.lane.b32.xlu1 %v5849_v59, %s5343_s22  ;;  %4729 = vmatprep.subr.mxu1 %v5849_v59 }
 0x2ee   :  { %4730 = vmatpush3.msra.mxu1 %v5849_v59 }
 0x2ef   :  { %2248 = vrot.lane.b32.xlu0 %v5856_v60, %s5343_s22  ;;  %4731 = vmatprep.subr.mxu1 %v5842_v58 }
 0x2f0   :  { %4732 = vmatpush3.msra.mxu1 %v5842_v58 }
 0x2f1   :  { %2250 = vrot.lane.b32.xlu1 %v5863_v62, %s5343_s22  ;;  %4733 = vmatprep.subr.mxu1 %v5863_v62 }
 0x2f2   :  { %4734 = vmatpush3.msra.mxu1 %v5863_v62 }
 0x2f3   :  { %2244 = vrot.lane.b32.xlu0 %v5870_v0, %s5343_s22  ;;  %4735 = vmatprep.subr.mxu1 %v5856_v60 }
 0x2f4   :  { %4736 = vmatpush3.msra.mxu1 %v5856_v60 }
 0x2f5   :  { %2246 = vrot.lane.b32.xlu1 %v5877_v2, %s5343_s22  ;;  %4737 = vmatprep.subr.mxu1 %v5877_v2 }
 0x2f6   :  { %4738 = vmatpush3.msra.mxu1 %v5877_v2 }
 0x2f7   :  { %2240 = vrot.lane.b32.xlu0 %v5891_v4, %s5343_s22  ;;  %4739 = vmatprep.subr.mxu1 %v5870_v0 }
 0x2f8   :  { %4740 = vmatpush3.msra.mxu1 %v5870_v0 }
 0x2f9   :  { %2242 = vrot.lane.b32.xlu1 %v5900_v5, %s5343_s22  ;;  %4741 = vmatprep.subr.mxu1 %v5900_v5 }
 0x2fa   :  { %4742 = vmatpush3.msra.mxu1 %v5900_v5 }
 0x2fb   :  { %2236 = vrot.lane.b32.xlu0 %v5910_v6, %s5343_s22  ;;  %4743 = vmatprep.subr.mxu1 %v5891_v4 }
 0x2fc   :  { %4744 = vmatpush3.msra.mxu1 %v5891_v4 }
 0x2fd   :  { %2238 = vrot.lane.b32.xlu1 %v5918_v8, %s5343_s22  ;;  %4745 = vmatprep.subr.mxu1 %v5918_v8 }
 0x2fe   :  { %4746 = vmatpush3.msra.mxu1 %v5918_v8 }
 0x2ff   :  { %4747 = vmatprep.subr.mxu1 %v5910_v6 }
 0x300   :  { %4748 = vmatpush3.msra.mxu1 %v5910_v6 }
 0x301   :  { %2234 = vrot.lane.b32.xlu1 %v5930_v10, %s5343_s22  ;;  %4749 = vmatprep.subr.mxu1 %v5930_v10 }
 0x302   :  { %4750 = vmatpush3.msra.mxu1 %v5930_v10 }
 0x303   :  { %4752 = vmatmul.mubr.f32.vlgmr.msra.gmra.mxu1 %v754_v11  ;;  %4757 = vmatprep.subr.msk.mxu1 %vm290_vm0, %v5885_v3 }
 0x304   :  { %4758 = vmatpush3.xpose.msk.msra.mxu1 %vm290_vm0, %v5885_v3  ;;  %4754 = vmatprep.mubr.f32.mxu1 %v755_v12 }
 0x307   :  { %4755 = vmatmul.mubr.f32.gmra.mxu1 %v756_v13 }
 0x308   :  { %4759 = vmatprep.mubr.msk.f32.mxu1 %vm290_vm0, %v843_v14 }
 0x30b   :  { %4760 = vmatmul.mubr.msk.f32.vlgmr.msra.gmra.mxu1 %vm290_vm0, %v844_v15 }
 0x30c   :  { %4762 = vmatprep.mubr.msk.f32.mxu1 %vm290_vm0, %v845_v16 }
 0x30f   :  { %4763 = vmatmul.mubr.msk.f32.gmra.mxu1 %vm290_vm0, %v846_v19 }
 0x310   :  { %4765 = vmatprep.mubr.msk.f32.mxu1 %vm290_vm0, %v847_v20 }
 0x313   :  { %4766 = vmatmul.mubr.msk.f32.gmra.mxu1 %vm290_vm0, %v848_v21 }
 0x314   :  { %4768 = vmatprep.mubr.msk.f32.mxu1 %vm290_vm0, %v849_v22 }
 0x317   :  { %4769 = vmatmul.mubr.msk.f32.gmra.mxu1 %vm290_vm0, %v850_v23 }
 0x318   :  { %4771 = vmatprep.mubr.msk.f32.mxu1 %vm290_vm0, %v851_v24 }
 0x31b   :  { %4772 = vmatmul.mubr.msk.f32.gmra.mxu1 %vm290_vm0, %v852_v25 }
 0x31c   :  { %4774 = vmatprep.mubr.msk.f32.mxu1 %vm290_vm0, %v853_v27 }
 0x31f   :  { %4775 = vmatmul.mubr.msk.f32.gmra.mxu1 %vm290_vm0, %v854_v28 }
 0x320   :  { %4777 = vmatprep.mubr.msk.f32.mxu1 %vm290_vm0, %v855_v29 }
 0x323   :  { %4778 = vmatmul.mubr.msk.f32.gmra.mxu1 %vm290_vm0, %v856_v30 }
 0x324   :  { %4780 = vmatprep.mubr.msk.f32.mxu1 %vm290_vm0, %v857_v31 }
 0x327   :  { %4781 = vmatmul.mubr.msk.f32.gmra.mxu1 %vm290_vm0, %v858_v46 }
 0x3c3   :  { %v5990_v33 = vpop.f32.mrf.mxu1 }
 0x3c4   :  { %2521 = vrot.lane.b32.xlu1 %v5990_v33, %s5343_s22 }
 0x3c5   :  { %v5994_v37 = vpop.f32.mrf.mxu1 }
 0x3c7   :  { %v5996_v1 = vpop.f32.mrf.mxu1 }
 0x3c8   :  { %2525 = vrot.lane.b32.xlu0 %v5996_v1, %s5343_s22 }
 0x3c9   :  { %v6000_v38 = vpop.f32.mrf.mxu1 }
 0x3ca   :  { %2523 = vrot.lane.b32.xlu1 %v6000_v38, %s5343_s22 }
 0x3cb   :  { %v4761_v40 = vpop.f32.mrf.mxu1 }
 0x3cc   :  { %v1056_v43 = vmax.f32 %v4761_v40, 1e-24 }
 0x3cd   :  { %v976_v44 = vpop.f32.mrf.mxu1 }
 0x3ce   :  { %v1055_v55 = vmax.f32 %v976_v44, 1e-24 }
 0x3cf   :  { %v4764_v45 = vpop.f32.mrf.mxu1 }
 0x3d0   :  { %5046 = vrsqrt.f32 %v1055_v55  ;;  %v1058_v49 = vmax.f32 %v4764_v45, 1e-24 }
 0x3d1   :  { %5048 = vrsqrt.f32 %v1056_v43  ;;  %v986_v32 = vpop.f32.mrf.mxu1 }
 0x3d2   :  { %v1057_v52 = vmax.f32 %v986_v32, 1e-24 }
 0x3d3   :  { %v4767_v11 = vpop.f32.mrf.mxu1 }
 0x3d4   :  { %5050 = vrsqrt.f32 %v1057_v52  ;;  %v1060_v12 = vmax.f32 %v4767_v11, 1e-24 }
 0x3d5   :  { %5052 = vrsqrt.f32 %v1058_v49  ;;  %v996_v13 = vpop.f32.mrf.mxu1 }
 0x3d6   :  { %v1059_v14 = vmax.f32 %v996_v13, 1e-24 }
 0x3d7   :  { %v4770_v15 = vpop.f32.mrf.mxu1 }
 0x3d8   :  { %5054 = vrsqrt.f32 %v1059_v14  ;;  %v1062_v16 = vmax.f32 %v4770_v15, 1e-24 }
 0x3d9   :  { %5056 = vrsqrt.f32 %v1060_v12  ;;  %v1006_v19 = vpop.f32.mrf.mxu1 }
 0x3da   :  { %v1061_v20 = vmax.f32 %v1006_v19, 1e-24 }
 0x3db   :  { %v4773_v21 = vpop.f32.mrf.mxu1 }
 0x3dc   :  { %5058 = vrsqrt.f32 %v1061_v20  ;;  %v1064_v23 = vmax.f32 %v4773_v21, 1e-24 }
 0x3dd   :  { %v5047_v22 = vpop.eup %5046  ;;  %5060 = vrsqrt.f32 %v1062_v16  ;;  %v1016_v24 = vpop.f32.mrf.mxu1 }
 0x3de   :  { %v5049_v25 = vpop.eup %5048  ;;  %v1063_v27 = vmax.f32 %v1016_v24, 1e-24  ;;  %4785 = vmatprep.mubr.msk.f32.mxu0 %vm1087_vm2, %v5047_v22 }
 0x3df   :  { %v4776_v28 = vpop.f32.mrf.mxu1  ;;  %4786 = vmatmul.mubr.msk.f32.vlgmr.msra.gmra.mxu0 %vm1087_vm2, %v5049_v25 }
 0x3e0   :  { %5062 = vrsqrt.f32 %v1063_v27  ;;  %4810 = vmatpush3.xpose.msk.msra.mxu0 %vm290_vm0, %v5885_v3  ;;  %v1066_v30 = vmax.f32 %v4776_v28, 1e-24  ;;  %v1300_v27 = vmul.f32 %v5994_v37, %v5994_v37  ;;  %v1301_v28 = vmul.f32 %v5990_v33, %v5990_v33 }
 0x3e1   :  { %v5051_v29 = vpop.eup %5050  ;;  %5064 = vrsqrt.f32 %v1064_v23  ;;  %v1026_v31 = vpop.f32.mrf.mxu1  ;;  %4817 = vmatprep.subr.msk.mxu0 %vm1136_vm1, %v5885_v3 }
 0x3e2   :  { %v5053_v46 = vpop.eup %5052  ;;  %v1065_v40 = vmax.f32 %v1026_v31, 1e-24  ;;  %4788 = vmatprep.mubr.msk.f32.mxu0 %vm1087_vm2, %v5051_v29  ;;  %v1302_v29 = vmul.f32 %v6000_v38, %v6000_v38  ;;  %v1303_v31 = vmul.f32 %v5996_v1, %v5996_v1 }
 0x3e3   :  { %v4779_v43 = vpop.f32.mrf.mxu1  ;;  %4789 = vmatmul.mubr.msk.f32.gmra.mxu0 %vm1087_vm2, %v5053_v46 }
 0x3e4   :  { %5066 = vrsqrt.f32 %v1065_v40  ;;  %v1068_v55 = vmax.f32 %v4779_v43, 1e-24 }
 0x3e5   :  { %v5055_v44 = vpop.eup %5054  ;;  %5068 = vrsqrt.f32 %v1066_v30  ;;  %v1036_v45 = vpop.f32.mrf.mxu1 }
 0x3e6   :  { %v5057_v49 = vpop.eup %5056  ;;  %v1067_v32 = vmax.f32 %v1036_v45, 1e-24  ;;  %4791 = vmatprep.mubr.msk.f32.mxu0 %vm1087_vm2, %v5055_v44  ;;  %v2265_v30 = vpop.permute.xlu0 %2264 }
 0x3e7   :  { %v4782_v52 = vpop.f32.mrf.mxu1  ;;  %4792 = vmatmul.mubr.msk.f32.gmra.mxu0 %vm1087_vm2, %v5057_v49 }
 0x3e8   :  { %5070 = vrsqrt.f32 %v1067_v32  ;;  %v1070_v12 = vmax.f32 %v4782_v52, 1e-24 }
 0x3e9   :  { %v5059_v11 = vpop.eup %5058  ;;  %5072 = vrsqrt.f32 %v1068_v55  ;;  %v1046_v13 = vpop.f32.mrf.mxu1 }
 0x3ea   :  { %v5061_v14 = vpop.eup %5060  ;;  %v1069_v15 = vmax.f32 %v1046_v13, 1e-24  ;;  %4794 = vmatprep.mubr.msk.f32.mxu0 %vm1087_vm2, %v5059_v11 }
 0x3eb   :  { %4795 = vmatmul.mubr.msk.f32.gmra.mxu0 %vm1087_vm2, %v5061_v14 }
 0x3ec   :  { %5074 = vrsqrt.f32 %v1069_v15 }
 0x3ed   :  { %v5063_v16 = vpop.eup %5062  ;;  %5076 = vrsqrt.f32 %v1070_v12 }
 0x3ee   :  { %v5065_v19 = vpop.eup %5064  ;;  %4797 = vmatprep.mubr.msk.f32.mxu0 %vm1087_vm2, %v5063_v16 }
 0x3ef   :  { %4798 = vmatmul.mubr.msk.f32.gmra.mxu0 %vm1087_vm2, %v5065_v19 }
 0x3f1   :  { %v5067_v20 = vpop.eup %5066 }
 0x3f2   :  { %v5069_v21 = vpop.eup %5068  ;;  %4800 = vmatprep.mubr.msk.f32.mxu0 %vm1087_vm2, %v5067_v20 }
 0x3f3   :  { %4801 = vmatmul.mubr.msk.f32.gmra.mxu0 %vm1087_vm2, %v5069_v21 }
 0x3f5   :  { %v5071_v22 = vpop.eup %5070 }
 0x3f6   :  { %v5073_v23 = vpop.eup %5072  ;;  %4803 = vmatprep.mubr.msk.f32.mxu0 %vm1087_vm2, %v5071_v22 }
 0x3f7   :  { %4804 = vmatmul.mubr.msk.f32.gmra.mxu0 %vm1087_vm2, %v5073_v23 }
 0x3f9   :  { %v5075_v24 = vpop.eup %5074 }
 0x3fa   :  { %v5077_v25 = vpop.eup %5076  ;;  %4806 = vmatprep.mubr.msk.f32.mxu0 %vm1087_vm2, %v5075_v24 }
 0x3fb   :  { %4807 = vmatmul.mubr.msk.f32.gmra.mxu0 %vm1087_vm2, %v5077_v25  ;;  %v2261_v25 = vpop.permute.xlu1 %2260 }
 0x3fc   :  { %4811 = vmatprep.mubr.msk.f32.mxu0 %vm290_vm0, %v1300_v27 }
 0x3ff   :  { %4812 = vmatmul.mubr.msk.f32.vlgmr.msra.gmra.mxu0 %vm290_vm0, %v1301_v28 }
 0x400   :  { %4818 = vmatpush3.msk.msra.mxu0 %vm1136_vm1, %v5885_v3  ;;  %4814 = vmatprep.mubr.msk.f32.mxu0 %vm290_vm0, %v1302_v29 }
 0x401   :  { %4881 = vmatprep.subr.mxu0 %v2265_v30 }
 0x403   :  { %4815 = vmatmul.mubr.msk.f32.gmra.mxu0 %vm290_vm0, %v1303_v31  ;;  %v2263_v31 = vpop.permute.xlu1 %2262 }
 0x49f   :  { %v6038_v46 = vpop.f32.mrf.mxu0 }
 0x4a1   :  { %v6040_v40 = vpop.f32.mrf.mxu0 }
 0x4a3   :  { %v6042_v43 = vpop.f32.mrf.mxu0 }
 0x4a5   :  { %v6044_v44 = vpop.f32.mrf.mxu0 }
 0x4a7   :  { %v6046_v55 = vpop.f32.mrf.mxu0 }
 0x4a9   :  { %v6048_v45 = vpop.f32.mrf.mxu0 }
 0x4ab   :  { %v6050_v49 = vpop.f32.mrf.mxu0 }
 0x4ad   :  { %v6052_v32 = vpop.f32.mrf.mxu0 }
 0x4af   :  { %v4799_v52 = vpop.f32.mrf.mxu0 }
 0x4b1   :  { %v1245_v11 = vpop.f32.mrf.mxu0 }
 0x4b3   :  { %v4802_v12 = vpop.f32.mrf.mxu0 }
 0x4b5   :  { %v1255_v13 = vpop.f32.mrf.mxu0 }
 0x4b7   :  { %v4805_v14 = vpop.f32.mrf.mxu0 }
 0x4b8   :  { %v1297_v27 = vmul.f32 %v4805_v14, %v5813_v48  ;;  %v1295_v48 = vmul.f32 %v4802_v12, %v5828_v54  ;;  %v2259_v14 = vpop.permute.xlu1 %2258 }
 0x4b9   :  { %v1265_v15 = vpop.f32.mrf.mxu0 }
 0x4bb   :  { %v4808_v16 = vpop.f32.mrf.mxu0 }
 0x4bc   :  { %v1299_v19 = vmul.f32 %v4808_v16, %v5818_v51  ;;  %v1296_v16 = vmul.f32 %v1265_v15, %v5835_v56 }
 0x4bd   :  { %v1275_v20 = vpop.f32.mrf.mxu0 }
 0x4be   :  { %v1298_v21 = vmul.f32 %v1275_v20, %v5821_v53  ;;  %4825 = vmatprep.subr.msk.mxu1 %vm290_vm0, %v1299_v19  ;;  %v1294_v20 = vmul.f32 %v1255_v13, %v5849_v59  ;;  %v1292_v13 = vmul.f32 %v1245_v11, %v5863_v62  ;;  %v1290_v11 = vmul.f32 %v6052_v32, %v5877_v2 }
 0x4bf   :  { %v4813_v22 = vpop.f32.mrf.mxu0  ;;  %4826 = vmatpush3.xpose.msk.msra.mxu1 %vm290_vm0, %v1299_v19  ;;  %v1288_v2 = vmul.f32 %v6048_v45, %v5900_v5  ;;  %v1286_v45 = vmul.f32 %v6044_v44, %v5918_v8  ;;  %v5344_v8 = vmov 1966171168  }
 0x4c0   :  { %4827 = vmatprep.subr.msk.mxu1 %vm290_vm0, %v1298_v21  ;;  %v1402_v23 = vmax.f32 %v4813_v22, 1e-24  ;;  %v2255_v22 = vpop.permute.xlu1 %2254  ;;  %v1511_v44 = vunpack.c.l.s4 %v5344_v8 }
 0x4c1   :  { %v1382_v24 = vpop.f32.mrf.mxu0 }
 0x4c2   :  { %v1401_v28 = vmax.f32 %v1382_v24, 1e-24 }
 0x4c3   :  { %v4816_v29 = vpop.f32.mrf.mxu0  ;;  %4828 = vmatpush3.xpose.msk.msra.mxu1 %vm290_vm0, %v1298_v21  ;;  %v2257_v21 = vpop.permute.xlu0 %2256 }
 0x4c4   :  { %5078 = vrsqrt.f32 %v1401_v28  ;;  %4829 = vmatprep.subr.msk.mxu1 %vm290_vm0, %v1297_v27  ;;  %v1404_v51 = vmax.f32 %v4816_v29, 1e-24  ;;  %v1512_v28 = vunpack.c.0.s8 %v1511_v44 }
 0x4c5   :  { %5080 = vrsqrt.f32 %v1402_v23  ;;  %v1392_v53 = vpop.f32.mrf.mxu0  ;;  %v1293_v23 = vmul.f32 %v4799_v52, %v5842_v58  ;;  %v2251_v58 = vpop.permute.xlu1 %2250 }
 0x4c6   :  { %v1403_v19 = vmax.f32 %v1392_v53, 1e-24 }
 0x4c7   :  { %4830 = vmatpush3.xpose.msk.msra.mxu1 %vm290_vm0, %v1297_v27  ;;  %v2253_v12 = vpop.permute.xlu0 %2252  ;;  %v1513_v27 = vlaneseq }
 0x4c8   :  { %5082 = vrsqrt.f32 %v1403_v19  ;;  %4831 = vmatprep.subr.msk.mxu1 %vm290_vm0, %v1296_v16 }
 0x4c9   :  { %5084 = vrsqrt.f32 %v1404_v51  ;;  %v2247_v62 = vpop.permute.xlu1 %2246  ;;  %v6114_v29 = vshrl.u32 %v1513_v27, 7 }
 0x4cb   :  { %4832 = vmatpush3.xpose.msk.msra.mxu1 %vm290_vm0, %v1296_v16  ;;  %v2249_v52 = vpop.permute.xlu0 %2248  ;;  %v6119_v51 = vsub.s32 0, %v6114_v29 }
 0x4cc   :  { %4833 = vmatprep.subr.msk.mxu1 %vm290_vm0, %v1295_v48 }
 0x4cd   :  { %v2243_v24 = vpop.permute.xlu1 %2242  ;;  %7513 = vst [vmem:[#allocation28_spill] sm:$0xff] %v6119_v51 }
 0x4cf   :  { %4834 = vmatpush3.xpose.msk.msra.mxu1 %vm290_vm0, %v1295_v48 }
 0x4d0   :  { %4835 = vmatprep.subr.msk.mxu1 %vm290_vm0, %v1294_v20 }
 0x4d1   :  { %v5079_v56 = vpop.eup %5078 }
 0x4d2   :  { %v5081_v15 = vpop.eup %5080  ;;  %4819 = vmatprep.mubr.msk.f32.mxu0 %vm1087_vm2, %v5079_v56 }
 0x4d3   :  { %4820 = vmatmul.mubr.msk.f32.vlgmr.msra.gmra.mxu0 %vm1087_vm2, %v5081_v15  ;;  %4836 = vmatpush3.xpose.msk.msra.mxu1 %vm290_vm0, %v1294_v20 }
 0x4d4   :  { %4882 = vmatpush3.msra.mxu0 %v2265_v30  ;;  %4837 = vmatprep.subr.msk.mxu1 %vm290_vm0, %v1293_v23  ;;  %v1291_v30 = vmul.f32 %v6050_v49, %v5856_v60  ;;  %v2245_v60 = vpop.permute.xlu0 %2244  ;;  %v1289_v49 = vmul.f32 %v6046_v55, %v5870_v0  ;;  %v2239_v0 = vpop.permute.xlu1 %2238  ;;  %v1287_v55 = vmul.f32 %v6042_v43, %v5891_v4 }
 0x4d5   :  { %v5083_v54 = vpop.eup %5082  ;;  %4883 = vmatprep.subr.mxu0 %v2263_v31  ;;  %v1285_v4 = vmul.f32 %v6038_v46, %v5910_v6  ;;  %v1284_v43 = vmul.f32 %v6040_v40, %v5930_v10  ;;  %v1515_v6 = vsub.s32 %v1512_v28, %v6114_v29 }
 0x4d6   :  { %v5085_v59 = vpop.eup %5084  ;;  %4884 = vmatpush3.msra.mxu0 %v2263_v31  ;;  %4822 = vmatprep.mubr.msk.f32.mxu0 %vm1087_vm2, %v5083_v54 }
 0x4d7   :  { %4885 = vmatprep.subr.mxu0 %v2261_v25  ;;  %4823 = vmatmul.mubr.msk.f32.gmra.mxu0 %vm1087_vm2, %v5085_v59  ;;  %v1516_v46 = vrot.slane %v5885_v3, %v1515_v6 }
 0x4d8   :  { %4838 = vmatpush3.xpose.msk.msra.mxu1 %vm290_vm0, %v1293_v23  ;;  %4886 = vmatpush3.msra.mxu0 %v2261_v25  ;;  %v2241_v32 = vpop.permute.xlu0 %2240  ;;  %v2235_v25 = vpop.permute.xlu1 %2234 }
 0x4d9   :  { %4839 = vmatprep.subr.msk.mxu1 %vm290_vm0, %v1292_v13  ;;  %4887 = vmatprep.subr.mxu0 %v2259_v14  ;;  %v1524_v10 = vrot.slane %v1516_v46, %v1515_v6  ;;  %v1517_v19 = vcombine.high %v1516_v46, %v1516_v46 }
 0x4da   :  { %4888 = vmatpush3.msra.mxu0 %v2259_v14 }
 0x4db   :  { %4889 = vmatprep.subr.mxu0 %v2257_v21  ;;  %v6122_v53 = vrot.slane %v1524_v10, %v6119_v51  ;;  %v1531_v15 = vrot.slane %v1517_v19, %v1515_v6 }
 0x4dc   :  { %4840 = vmatpush3.xpose.msk.msra.mxu1 %vm290_vm0, %v1292_v13  ;;  %4890 = vmatpush3.msra.mxu0 %v2257_v21  ;;  %v2237_v5 = vpop.permute.xlu0 %2236 }
 0x4dd   :  { %4841 = vmatprep.subr.msk.mxu1 %vm290_vm0, %v1291_v30  ;;  %4891 = vmatprep.subr.mxu0 %v2255_v22 }
 0x4de   :  { %4892 = vmatpush3.msra.mxu0 %v2255_v22 }
 0x4df   :  { %4893 = vmatprep.subr.mxu0 %v2253_v12 }
 0x4e0   :  { %4842 = vmatpush3.xpose.msk.msra.mxu1 %vm290_vm0, %v1291_v30  ;;  %4894 = vmatpush3.msra.mxu0 %v2253_v12 }
 0x4e1   :  { %4843 = vmatprep.subr.msk.mxu1 %vm290_vm0, %v1290_v11  ;;  %4895 = vmatprep.subr.mxu0 %v2251_v58 }
 0x4e2   :  { %4896 = vmatpush3.msra.mxu0 %v2251_v58 }
 0x4e3   :  { %4897 = vmatprep.subr.mxu0 %v2249_v52 }
 0x4e4   :  { %4844 = vmatpush3.xpose.msk.msra.mxu1 %vm290_vm0, %v1290_v11  ;;  %4898 = vmatpush3.msra.mxu0 %v2249_v52  ;;  %v1533_v52 = vcombine.high %v1531_v15, %v1531_v15 }
 0x4e5   :  { %4845 = vmatprep.subr.msk.mxu1 %vm290_vm0, %v1289_v49  ;;  %4899 = vmatprep.subr.mxu0 %v2247_v62 }
 0x4e6   :  { %4900 = vmatpush3.msra.mxu0 %v2247_v62 }
 0x4e7   :  { %4901 = vmatprep.subr.mxu0 %v2245_v60 }
 0x4e8   :  { %4846 = vmatpush3.xpose.msk.msra.mxu1 %vm290_vm0, %v1289_v49  ;;  %4902 = vmatpush3.msra.mxu0 %v2245_v60  ;;  %v6156_v60 = vrot.slane %v1533_v52, %v6119_v51 }
 0x4e9   :  { %4847 = vmatprep.subr.msk.mxu1 %vm290_vm0, %v1288_v2  ;;  %4903 = vmatprep.subr.mxu0 %v2243_v24 }
 0x4ea   :  { %4904 = vmatpush3.msra.mxu0 %v2243_v24 }
 0x4eb   :  { %4905 = vmatprep.subr.mxu0 %v2241_v32 }
 0x4ec   :  { %4848 = vmatpush3.xpose.msk.msra.mxu1 %vm290_vm0, %v1288_v2  ;;  %4906 = vmatpush3.msra.mxu0 %v2241_v32 }
 0x4ed   :  { %4849 = vmatprep.subr.msk.mxu1 %vm290_vm0, %v1287_v55  ;;  %4907 = vmatprep.subr.mxu0 %v2239_v0 }
 0x4ee   :  { %4908 = vmatpush3.msra.mxu0 %v2239_v0 }
 0x4ef   :  { %4909 = vmatprep.subr.mxu0 %v2237_v5 }
 0x4f0   :  { %4850 = vmatpush3.xpose.msk.msra.mxu1 %vm290_vm0, %v1287_v55  ;;  %4910 = vmatpush3.msra.mxu0 %v2237_v5  ;;  %v6169_v55 = vstv %s104_s10 }
 0x4f1   :  { %4851 = vmatprep.subr.msk.mxu1 %vm290_vm0, %v1286_v45  ;;  %4911 = vmatprep.subr.mxu0 %v2235_v25 }
 0x4f2   :  { %4912 = vmatpush3.msra.mxu0 %v2235_v25 }
 0x4f4   :  { %4852 = vmatpush3.xpose.msk.msra.mxu1 %vm290_vm0, %v1286_v45  ;;  %v6171_v45 = vstv %s4138_s23 }
 0x4f5   :  { %4853 = vmatprep.subr.msk.mxu1 %vm290_vm0, %v1285_v4 }
 0x4f8   :  { %4854 = vmatpush3.xpose.msk.msra.mxu1 %vm290_vm0, %v1285_v4 }
 0x4f9   :  { %4855 = vmatprep.subr.msk.mxu1 %vm290_vm0, %v1284_v43 }
 0x4fc   :  { %4856 = vmatpush3.xpose.msk.msra.mxu1 %vm290_vm0, %v1284_v43 }
 0x593   :  { %v4821_v40 = vpop.f32.mrf.mxu0 }
 0x594   :  { %v1507_v31 = vmul.f32 %v4821_v40, %v5990_v33  ;;  %v6133_v33 = vrot.slane %v1531_v15, %v6119_v51 }
 0x595   :  { %v1487_v16 = vpop.f32.mrf.mxu0 }
 0x596   :  { %v1506_v48 = vmul.f32 %v1487_v16, %v5994_v37  ;;  %v1555_v21 = vmul.f32 %v6122_v53, %v1507_v31  ;;  %v1567_v2 = vmul.f32 %v6156_v60, %v1507_v31 }
 0x597   :  { %v4824_v14 = vpop.f32.mrf.mxu0 }
 0x598   :  { %v1554_v20 = vmul.f32 %v6122_v53, %v1506_v48  ;;  %v1509_v3 = vmul.f32 %v4824_v14, %v5996_v1  ;;  %v1558_v59 = vmul.f32 %v6133_v33, %v1506_v48  ;;  %v1532_v1 = vcombine.high %v1524_v10, %v1524_v10 }
 0x599   :  { %v1497_v56 = vpop.f32.mrf.mxu0  ;;  %v1566_v24 = vmul.f32 %v6156_v60, %v1506_v48 }
 0x59a   :  { %v1508_v22 = vmul.f32 %v1497_v56, %v6000_v38  ;;  %4857 = vmatprep.mubr.msk.f32.mxu1 %vm290_vm0, %v1554_v20  ;;  %v1557_v54 = vmul.f32 %v6122_v53, %v1509_v3  ;;  %v1559_v38 = vmul.f32 %v6133_v33, %v1507_v31  ;;  %v6145_v13 = vrot.slane %v1532_v1, %v6119_v51 }
 0x59b   :  { %4858 = vmatmul.mubr.msk.f32.vlgmr.msra.gmra.mxu1 %vm290_vm0, %v1555_v21  ;;  %v1561_v58 = vmul.f32 %v6133_v33, %v1509_v3  ;;  %v1569_v0 = vmul.f32 %v6156_v60, %v1509_v3 }
 0x59c   :  { %v1556_v23 = vmul.f32 %v6122_v53, %v1508_v22  ;;  %v1560_v12 = vmul.f32 %v6133_v33, %v1508_v22  ;;  %v1562_v30 = vmul.f32 %v6145_v13, %v1506_v48  ;;  %v1563_v62 = vmul.f32 %v6145_v13, %v1507_v31 }
 0x59d   :  { %v1564_v11 = vmul.f32 %v6145_v13, %v1508_v22  ;;  %v1565_v49 = vmul.f32 %v6145_v13, %v1509_v3  ;;  %v1568_v32 = vmul.f32 %v6156_v60, %v1508_v22 }
 0x59e   :  { %4860 = vmatprep.mubr.msk.f32.mxu1 %vm290_vm0, %v1556_v23 }
 0x59f   :  { %4861 = vmatmul.mubr.msk.f32.gmra.mxu1 %vm290_vm0, %v1557_v54 }
 0x5a0   :  { %4863 = vmatprep.mubr.msk.f32.mxu1 %vm290_vm0, %v1558_v59 }
 0x5a3   :  { %4864 = vmatmul.mubr.msk.f32.gmra.mxu1 %vm290_vm0, %v1559_v38 }
 0x5a4   :  { %4866 = vmatprep.mubr.msk.f32.mxu1 %vm290_vm0, %v1560_v12 }
 0x5a7   :  { %4867 = vmatmul.mubr.msk.f32.gmra.mxu1 %vm290_vm0, %v1561_v58 }
 0x5a8   :  { %4869 = vmatprep.mubr.msk.f32.mxu1 %vm290_vm0, %v1562_v30 }
 0x5ab   :  { %4870 = vmatmul.mubr.msk.f32.gmra.mxu1 %vm290_vm0, %v1563_v62 }
 0x5ac   :  { %4872 = vmatprep.mubr.msk.f32.mxu1 %vm290_vm0, %v1564_v11 }
 0x5af   :  { %4873 = vmatmul.mubr.msk.f32.gmra.mxu1 %vm290_vm0, %v1565_v49 }
 0x5b0   :  { %4875 = vmatprep.mubr.msk.f32.mxu1 %vm290_vm0, %v1566_v24 }
 0x5b3   :  { %4876 = vmatmul.mubr.msk.f32.gmra.mxu1 %vm290_vm0, %v1567_v2 }
 0x5b4   :  { %4878 = vmatprep.mubr.msk.f32.mxu1 %vm290_vm0, %v1568_v32 }
 0x5b7   :  { %4879 = vmatmul.mubr.msk.f32.gmra.mxu1 %vm290_vm0, %v1569_v0 }
 0x65b   :  { %v4859_v5 = vpop.f32.mrf.mxu1 }
 0x65c   :  { %v1829_v25 = vmul.f32 %v4859_v5, %v6169_v55 }
 0x65d   :  { %v1732_v4 = vpop.f32.mrf.mxu1 }
 0x65e   :  { %v1846_v43 = vadd.f32 %v6171_v45, %v1829_v25  ;;  %v1828_v8 = vmul.f32 %v6169_v55, %v1732_v4 }
 0x65f   :  { %v4862_v44 = vpop.f32.mrf.mxu1 }
 0x660   :  { %v4236_v27 = vmul.f32 -1.442695, %v1846_v43  ;;  %v1845_v28 = vadd.f32 %v6171_v45, %v1828_v8  ;;  %v1831_v6 = vmul.f32 %v4862_v44, %v6169_v55 }
 0x661   :  { %v1742_v46 = vpop.f32.mrf.mxu1 }
 0x662   :  { %5086 = vpow2.f32 %v4236_v27  ;;  %v4235_v10 = vmul.f32 -1.442695, %v1845_v28  ;;  %v1848_v40 = vadd.f32 %v6171_v45, %v1831_v6  ;;  %v1830_v31 = vmul.f32 %v6169_v55, %v1742_v46 }
 0x663   :  { %v4865_v16 = vpop.f32.mrf.mxu1 }
 0x664   :  { %5088 = vpow2.f32 %v4235_v10  ;;  %v4238_v19 = vmul.f32 -1.442695, %v1848_v40  ;;  %v1847_v48 = vadd.f32 %v6171_v45, %v1830_v31  ;;  %v1833_v14 = vmul.f32 %v4865_v16, %v6169_v55 }
 0x665   :  { %v1752_v20 = vpop.f32.mrf.mxu1 }
 0x666   :  { %5090 = vpow2.f32 %v4238_v19  ;;  %v4237_v21 = vmul.f32 -1.442695, %v1847_v48  ;;  %v1850_v3 = vadd.f32 %v6171_v45, %v1833_v14  ;;  %v1832_v56 = vmul.f32 %v6169_v55, %v1752_v20 }
 0x667   :  { %v4868_v15 = vpop.f32.mrf.mxu1 }
 0x668   :  { %5092 = vpow2.f32 %v4237_v21  ;;  %v4240_v22 = vmul.f32 -1.442695, %v1850_v3  ;;  %v1849_v23 = vadd.f32 %v6171_v45, %v1832_v56  ;;  %v1835_v54 = vmul.f32 %v4868_v15, %v6169_v55 }
 0x669   :  { %v1762_v59 = vpop.f32.mrf.mxu1 }
 0x66a   :  { %5094 = vpow2.f32 %v4240_v22  ;;  %v4239_v1 = vmul.f32 -1.442695, %v1849_v23  ;;  %v1852_v38 = vadd.f32 %v6171_v45, %v1835_v54  ;;  %v1834_v12 = vmul.f32 %v6169_v55, %v1762_v59 }
 0x66b   :  { %v4871_v58 = vpop.f32.mrf.mxu1 }
 0x66c   :  { %5096 = vpow2.f32 %v4239_v1  ;;  %v4242_v30 = vmul.f32 -1.442695, %v1852_v38  ;;  %v1851_v52 = vadd.f32 %v6171_v45, %v1834_v12  ;;  %v1837_v62 = vmul.f32 %v4871_v58, %v6169_v55 }
 0x66d   :  { %v1772_v11 = vpop.f32.mrf.mxu1 }
 0x66e   :  { %5098 = vpow2.f32 %v4242_v30  ;;  %v4241_v49 = vmul.f32 -1.442695, %v1851_v52  ;;  %v1854_v24 = vadd.f32 %v6171_v45, %v1837_v62  ;;  %v1836_v2 = vmul.f32 %v6169_v55, %v1772_v11 }
 0x66f   :  { %v5087_v32 = vpop.eup %5086  ;;  %v4874_v0 = vpop.f32.mrf.mxu1 }
 0x670   :  { %v1910_v5 = vadd.f32 1.0, %v5087_v32  ;;  %5100 = vpow2.f32 %v4241_v49  ;;  %v4244_v25 = vmul.f32 -1.442695, %v1854_v24  ;;  %v1853_v4 = vadd.f32 %v6171_v45, %v1836_v2 }
 0x671   :  { %v5089_v43 = vpop.eup %5088  ;;  %v1839_v8 = vmul.f32 %v4874_v0, %v6169_v55  ;;  %v1782_v44 = vpop.f32.mrf.mxu1 }
 0x672   :  { %5102 = vrcp.f32 %v1910_v5  ;;  %v1909_v27 = vadd.f32 1.0, %v5089_v43  ;;  %v4243_v28 = vmul.f32 -1.442695, %v1853_v4  ;;  %v1838_v6 = vmul.f32 %v6169_v55, %v1782_v44  ;;  %v6208_v43 = vld [vmem:[%s7463_s9] sm:$0xff] }
 0x673   :  { %v5091_v46 = vpop.eup %5090  ;;  %5104 = vpow2.f32 %v4244_v25  ;;  %v1856_v10 = vadd.f32 %v6171_v45, %v1839_v8  ;;  %v4877_v40 = vpop.f32.mrf.mxu1 }
 0x674   :  { %5106 = vrcp.f32 %v1909_v27  ;;  %v1912_v31 = vadd.f32 1.0, %v5091_v46  ;;  %v1855_v16 = vadd.f32 %v6171_v45, %v1838_v6  ;;  %v1841_v19 = vmul.f32 %v4877_v40, %v6169_v55 }
 0x675   :  { %v5093_v48 = vpop.eup %5092  ;;  %5108 = vpow2.f32 %v4243_v28  ;;  %v4246_v14 = vmul.f32 -1.442695, %v1856_v10  ;;  %v1792_v20 = vpop.f32.mrf.mxu1  ;;  %v6221_v10 = vld [vmem:[%s7463_s9 + $0x10] sm:$0xff] }
 0x676   :  { %5110 = vrcp.f32 %v1912_v31  ;;  %v1911_v21 = vadd.f32 1.0, %v5093_v48  ;;  %v4245_v3 = vmul.f32 -1.442695, %v1855_v16  ;;  %v1858_v56 = vadd.f32 %v6171_v45, %v1841_v19  ;;  %v6229_v48 = vld [vmem:[%s7463_s9 + $0x18] sm:$0xff] }
 0x677   :  { %v5095_v15 = vpop.eup %5094  ;;  %5112 = vpow2.f32 %v4246_v14  ;;  %v1840_v22 = vmul.f32 %v6169_v55, %v1792_v20  ;;  %v4880_v23 = vpop.f32.mrf.mxu1 }
 0x678   :  { %5114 = vrcp.f32 %v1911_v21  ;;  %v1914_v54 = vadd.f32 1.0, %v5095_v15  ;;  %v4248_v59 = vmul.f32 -1.442695, %v1858_v56  ;;  %v1843_v1 = vmul.f32 %v4880_v23, %v6169_v55  ;;  %v6239_v15 = vld [vmem:[%s7463_s9 + $0x20] sm:$0xff] }
 0x679   :  { %v5097_v38 = vpop.eup %5096  ;;  %5116 = vpow2.f32 %v4245_v3  ;;  %v1857_v12 = vadd.f32 %v6171_v45, %v1840_v22  ;;  %v1802_v58 = vpop.f32.mrf.mxu1 }
 0x67a   :  { %5118 = vrcp.f32 %v1914_v54  ;;  %v1913_v30 = vadd.f32 1.0, %v5097_v38  ;;  %v1860_v52 = vadd.f32 %v6171_v45, %v1843_v1  ;;  %v1842_v62 = vmul.f32 %v6169_v55, %v1802_v58  ;;  %v6248_v38 = vld [vmem:[%s7463_s9 + $0x28] sm:$0xff] }
 0x67b   :  { %v5099_v11 = vpop.eup %5098  ;;  %5120 = vpow2.f32 %v4248_v59  ;;  %v4247_v49 = vmul.f32 -1.442695, %v1857_v12 }
 0x67c   :  { %5122 = vrcp.f32 %v1913_v30  ;;  %v1916_v24 = vadd.f32 1.0, %v5099_v11  ;;  %v4250_v2 = vmul.f32 -1.442695, %v1860_v52  ;;  %v1859_v32 = vadd.f32 %v6171_v45, %v1842_v62  ;;  %v6213_v45 = vld [vmem:[%s7463_s9 + $0x8] sm:$0xff]  ;;  %v6257_v11 = vld [vmem:[%s7463_s9 + $0x30] sm:$0xff] }
 0x67d   :  { %v5101_v0 = vpop.eup %5100  ;;  %5124 = vpow2.f32 %v4247_v49 }
 0x67e   :  { %5126 = vrcp.f32 %v1916_v24  ;;  %v1915_v5 = vadd.f32 1.0, %v5101_v0  ;;  %v4249_v25 = vmul.f32 -1.442695, %v1859_v32 }
 0x67f   :  { %v5103_v4 = vpop.eup %5102  ;;  %5128 = vpow2.f32 %v4250_v2 }
 0x680   :  { %v5105_v55 = vpop.eup %5104  ;;  %5130 = vrcp.f32 %v1915_v5  ;;  %v6224_v31 = vmul.f32 %v5103_v4, %v6213_v45  ;;  %v6265_v5 = vld [vmem:[%s7463_s9 + $0x38] sm:$0xff] }
 0x681   :  { %v5107_v8 = vpop.eup %5106  ;;  %5132 = vpow2.f32 %v4249_v25  ;;  %v1918_v27 = vadd.f32 1.0, %v5105_v55 }
 0x682   :  { %v5109_v44 = vpop.eup %5108  ;;  %v6216_v28 = vmul.f32 %v5107_v8, %v6208_v43 }
 0x683   :  { %v5111_v6 = vpop.eup %5110  ;;  %v1917_v46 = vadd.f32 1.0, %v5109_v44 }
 0x684   :  { %v5113_v40 = vpop.eup %5112  ;;  %v1978_v21 = vmax.f32 %v6216_v28, %v6224_v31  ;;  %v6242_v23 = vmul.f32 %v5111_v6, %v6229_v48 }
 0x685   :  { %v5115_v16 = vpop.eup %5114  ;;  %5134 = vrcp.f32 %v1917_v46  ;;  %v1920_v19 = vadd.f32 1.0, %v5113_v40  ;;  %v6279_v40 = vld [vmem:[%s7463_s9 + $0x40] sm:$0xff] }
 0x686   :  { %v5117_v14 = vpop.eup %5116  ;;  %5136 = vrcp.f32 %v1918_v27  ;;  %v6232_v20 = vmul.f32 %v5115_v16, %v6221_v10 }
 0x687   :  { %v5119_v3 = vpop.eup %5118  ;;  %v1919_v56 = vadd.f32 1.0, %v5117_v14  ;;  %5138 = vrcp.f32 %v1920_v19 }
 0x688   :  { %v5121_v22 = vpop.eup %5120  ;;  %v1979_v54 = vmax.f32 %v1978_v21, %v6232_v20  ;;  %v6260_v2 = vmul.f32 %v5119_v3, %v6248_v38  ;;  %v6285_v3 = vld [vmem:[%s7463_s9 + $0x48] sm:$0xff] }
 0x689   :  { %v5123_v59 = vpop.eup %5122  ;;  %5140 = vrcp.f32 %v1919_v56  ;;  %v1922_v1 = vadd.f32 1.0, %v5121_v22 }
 0x68a   :  { %v5125_v12 = vpop.eup %5124  ;;  %v1980_v58 = vmax.f32 %v1979_v54, %v6242_v23  ;;  %v6252_v30 = vmul.f32 %v5123_v59, %v6239_v15  ;;  %v6290_v54 = vld [vmem:[%s7463_s9 + $0x50] sm:$0xff] }
 0x68b   :  { %v5127_v52 = vpop.eup %5126  ;;  %v1921_v62 = vadd.f32 1.0, %v5125_v12  ;;  %5142 = vrcp.f32 %v1922_v1  ;;  %v6296_v12 = vadd.s32 8, %v6114_v29 }
 0x68c   :  { %v5129_v49 = vpop.eup %5128  ;;  %v1981_v24 = vrot.slane %v1980_v58, 4  ;;  %v1987_v8 = vmax.f32 %v6252_v30, %v6260_v2  ;;  %v6273_v6 = vmul.f32 %v5127_v52, %v6265_v5 }
 0x68d   :  { %v5131_v32 = vpop.eup %5130  ;;  %5144 = vrcp.f32 %v1921_v62  ;;  %v1924_v0 = vadd.f32 1.0, %v5129_v49  ;;  %v6301_v49 = vld [vmem:[%s7463_s9 + $0x58] sm:$0xff] }
 0x68e   :  { %v5133_v25 = vpop.eup %5132  ;;  %v1982_v4 = vmax.f32 %v1980_v58, %v1981_v24  ;;  %v6268_v55 = vmul.f32 %v5131_v32, %v6257_v11  ;;  %v6307_v32 = vadd.s32 16, %v6114_v29 }
 0x68f   :  { %v1923_v44 = vadd.f32 1.0, %v5133_v25  ;;  %5146 = vrcp.f32 %v1924_v0 }
 0x690   :  { %v1983_v27 = vrot.slane %v1982_v4, 2  ;;  %v1988_v46 = vmax.f32 %v1987_v8, %v6268_v55 }
 0x691   :  { %5148 = vrcp.f32 %v1923_v44  ;;  %v6323_v44 = vadd.s32 24, %v6114_v29 }
 0x692   :  { %v5135_v16 = vpop.eup %5134  ;;  %v1984_v19 = vmax.f32 %v1982_v4, %v1983_v27  ;;  %v1989_v14 = vmax.f32 %v1988_v46, %v6273_v6  ;;  %v6320_v4 = vld [vmem:[%s7463_s9 + $0x60] sm:$0xff] }
 0x693   :  { %v5137_v21 = vpop.eup %5136  ;;  %v6293_v59 = vmul.f32 %v5135_v16, %v6279_v40 }
 0x694   :  { %v1985_v56 = vrot.slane %v1984_v19, 1  ;;  %v1990_v22 = vrot.slane %v1989_v14, 4  ;;  %v5139_v1 = vpop.eup %5138  ;;  %v6304_v24 = vmul.f32 %v5137_v21, %v6285_v3 }
 0x695   :  { %v6328_v16 = vmul.f32 %v5139_v1, %v6301_v49 }
 0x696   :  { %v5141_v58 = vpop.eup %5140  ;;  %v1986_v52 = vmax.f32 %v1984_v19, %v1985_v56  ;;  %v1991_v62 = vmax.f32 %v1989_v14, %v1990_v22  ;;  %v1996_v25 = vmax.f32 %v6293_v59, %v6304_v24  ;;  %v6335_v56 = vld [vmem:[%s7463_s9 + $0x68] sm:$0xff] }
 0x697   :  { %v6310_v0 = vmul.f32 %v5141_v58, %v6290_v54 }
 0x698   :  { %vm2014_vm3 = vcmp.ge.f32.partialorder %v6216_v28, %v1986_v52  ;;  %vm2015_vm4 = vcmp.ge.f32.partialorder %v6224_v31, %v1986_v52  ;;  %vm2016_vm5 = vcmp.ge.f32.partialorder %v6232_v20, %v1986_v52  ;;  %v5143_v8 = vpop.eup %5142  ;;  %vm2017_vm6 = vcmp.ge.f32.partialorder %v6242_v23, %v1986_v52  ;;  %v6345_v52 = vld [vmem:[%s7463_s9 + $0x70] sm:$0xff] }
 0x699   :  { %v2030_v27 = vsel %vm2014_vm3, %v6114_v29, 32  ;;  %v2031_v46 = vsel %vm2015_vm4, %v6296_v12, 32  ;;  %v1992_v14 = vrot.slane %v1991_v62, 2  ;;  %v1997_v21 = vmax.f32 %v1996_v25, %v6310_v0 }
 0x69a   :  { %v5145_v19 = vpop.eup %5144  ;;  %vm2046_vm7 = vcmp.lt.s32.totalorder %v2030_v27, %v2031_v46  ;;  %v2032_v22 = vsel %vm2016_vm5, %v6307_v32, 32  ;;  %v2033_v18 = vsel %vm2017_vm6, %v6323_v44, 32  ;;  %v6349_v9 = vmul.f32 %v5143_v8, %v6335_v56 }
 0x69b   :  { %v2047_v58 = vsel %vm2046_vm7, %v2030_v27, %v2031_v46  ;;  %v6339_v51 = vmul.f32 %v5145_v19, %v6320_v4  ;;  %v1993_v1 = vmax.f32 %v1991_v62, %v1992_v14  ;;  %v1998_v17 = vmax.f32 %v1997_v21, %v6328_v16  ;;  %v6354_v62 = vld [vmem:[%s7463_s9 + $0x78] sm:$0xff] }
 0x69c   :  { %vm2048_vm8 = vcmp.lt.s32.totalorder %v2047_v58, %v2032_v22  ;;  %v5147_v25 = vpop.eup %5146 }
 0x69d   :  { %v2049_v7 = vsel %vm2048_vm8, %v2047_v58, %v2032_v22  ;;  %v1994_v46 = vrot.slane %v1993_v1, 1  ;;  %v1999_v19 = vrot.slane %v1998_v17, 4  ;;  %v2005_v61 = vmax.f32 %v6339_v51, %v6349_v9 }
 0x69e   :  { %v5149_v27 = vpop.eup %5148  ;;  %vm2050_vm9 = vcmp.lt.s32.totalorder %v2049_v7, %v2033_v18  ;;  %v6362_v57 = vmul.f32 %v5147_v25, %v6354_v62 }
 0x69f   :  { %v2051_v14 = vsel %vm2050_vm9, %v2049_v7, %v2033_v18  ;;  %v6357_v21 = vmul.f32 %v5149_v27, %v6345_v52  ;;  %v1995_v58 = vmax.f32 %v1993_v1, %v1994_v46  ;;  %v2000_v8 = vmax.f32 %v1998_v17, %v1999_v19 }
 0x6a0   :  { %v2052_v22 = vrot.slane %v2051_v14, 4 }
 0x6a1   :  { %v2006_v42 = vmax.f32 %v2005_v61, %v6357_v21  ;;  %vm2018_vm11 = vcmp.ge.f32.partialorder %v6252_v30, %v1995_v58  ;;  %vm2019_vm12 = vcmp.ge.f32.partialorder %v6260_v2, %v1995_v58  ;;  %vm2020_vm13 = vcmp.ge.f32.partialorder %v6268_v55, %v1995_v58 }
 0x6a2   :  { %vm2053_vm10 = vcmp.lt.s32.totalorder %v2051_v14, %v2052_v22  ;;  %vm2021_vm14 = vcmp.ge.f32.partialorder %v6273_v6, %v1995_v58  ;;  %v2034_v18 = vsel %vm2018_vm11, %v6114_v29, 32  ;;  %v2035_v1 = vsel %vm2019_vm12, %v6296_v12, 32 }
 0x6a3   :  { %v2054_v7 = vsel %vm2053_vm10, %v2051_v14, %v2052_v22  ;;  %vm2061_vm15 = vcmp.lt.s32.totalorder %v2034_v18, %v2035_v1  ;;  %v2036_v25 = vsel %vm2020_vm13, %v6307_v32, 32  ;;  %v2001_v61 = vrot.slane %v2000_v8, 2 }
 0x6a4   :  { %v2055_v17 = vrot.slane %v2054_v7, 2  ;;  %v2062_v27 = vsel %vm2061_vm15, %v2034_v18, %v2035_v1  ;;  %v2007_v46 = vmax.f32 %v2006_v42, %v6362_v57  ;;  %v2037_v19 = vsel %vm2021_vm14, %v6323_v44, 32 }
 0x6a5   :  { %vm2063_vm2 = vcmp.lt.s32.totalorder %v2062_v27, %v2036_v25  ;;  %v2002_v22 = vmax.f32 %v2000_v8, %v2001_v61  ;;  %v5345_v42 = vmov 0.0  }
 0x6a6   :  { %vm2056_vm1 = vcmp.lt.s32.totalorder %v2054_v7, %v2055_v17  ;;  %v2064_v14 = vsel %vm2063_vm2, %v2062_v27, %v2036_v25  ;;  %v2008_v58 = vrot.slane %v2007_v46, 4 }
 0x6a7   :  { %v2057_v41 = vsel %vm2056_vm1, %v2054_v7, %v2055_v17  ;;  %vm2065_vm3 = vcmp.lt.s32.totalorder %v2064_v14, %v2037_v19  ;;  %v2003_v26 = vrot.slane %v2002_v22, 1 }
 0x6a8   :  { %v2058_v50 = vrot.slane %v2057_v41, 1  ;;  %v2066_v35 = vsel %vm2065_vm3, %v2064_v14, %v2037_v19  ;;  %v2009_v47 = vmax.f32 %v2007_v46, %v2008_v58 }
 0x6a9   :  { %v2067_v39 = vrot.slane %v2066_v35, 4  ;;  %v2004_v18 = vmax.f32 %v2002_v22, %v2003_v26 }
 0x6aa   :  { %vm2059_vm4 = vcmp.lt.s32.totalorder %v2057_v41, %v2058_v50  ;;  %v2010_v25 = vrot.slane %v2009_v47, 2 }
 0x6ab   :  { %v2060_v63 = vsel %vm2059_vm4, %v2057_v41, %v2058_v50  ;;  %vm2068_vm9 = vcmp.lt.s32.totalorder %v2066_v35, %v2067_v39  ;;  %vm2022_vm10 = vcmp.ge.f32.partialorder %v6293_v59, %v2004_v18  ;;  %vm2023_vm11 = vcmp.ge.f32.partialorder %v6304_v24, %v2004_v18 }
 0x6ac   :  { %vm2109_vm5 = vcmp.eq.s32.totalorder %v6323_v44, %v2060_v63  ;;  %vm2107_vm6 = vcmp.eq.s32.totalorder %v6296_v12, %v2060_v63  ;;  %vm2106_vm7 = vcmp.eq.s32.totalorder %v6114_v29, %v2060_v63  ;;  %vm2108_vm8 = vcmp.eq.s32.totalorder %v6307_v32, %v2060_v63 }
 0x6ad   :  { %v4254_v8 = vsel %vm2109_vm5, 1.0, %v5345_v42  ;;  %v4252_v7 = vsel %vm2107_vm6, 1.0, %v5345_v42  ;;  %v4251_v1 = vsel %vm2106_vm7, 1.0, %v5345_v42  ;;  %v4253_v17 = vsel %vm2108_vm8, 1.0, %v5345_v42 }
 0x6ae   :  { %v2157_v50 = vmul.f32 %v4254_v8, %v6229_v48  ;;  %v2155_v26 = vmul.f32 %v4252_v7, %v6213_v45  ;;  %v2154_v41 = vmul.f32 %v4251_v1, %v6208_v43  ;;  %v2156_v27 = vmul.f32 %v4253_v17, %v6221_v10 }
 0x6af   :  { %vm2024_vm12 = vcmp.ge.f32.partialorder %v6310_v0, %v2004_v18  ;;  %v2038_v43 = vsel %vm2022_vm10, %v6114_v29, 32  ;;  %v2069_v45 = vsel %vm2068_vm9, %v2066_v35, %v2067_v39  ;;  %v2039_v10 = vsel %vm2023_vm11, %v6296_v12, 32 }
 0x6b0   :  { %2192 = vadd.xlane.f32.xlu0 %v2157_v50  ;;  %2188 = vadd.xlane.f32.xlu1 %v2155_v26  ;;  %v6389_v63 = vmul.f32 %v2155_v26, %v6224_v31  ;;  %v6392_v61 = vmul.f32 %v2154_v41, %v6216_v28  ;;  %v2070_v48 = vrot.slane %v2069_v45, 2  ;;  %vm2025_vm13 = vcmp.ge.f32.partialorder %v6328_v16, %v2004_v18 }
 0x6b1   :  { %vm2076_vm14 = vcmp.lt.s32.totalorder %v2038_v43, %v2039_v10  ;;  %v6401_v31 = vmul.f32 %v2156_v27, %v6232_v20  ;;  %v2040_v28 = vsel %vm2024_vm12, %v6307_v32, 32  ;;  %v2011_v19 = vmax.f32 %v2009_v47, %v2010_v25 }
 0x6b2   :  { %4913 = vmatprep.mubr.f32.mxu0 %v6392_v61  ;;  %v2077_v46 = vsel %vm2076_vm14, %v2038_v43, %v2039_v10  ;;  %v6405_v14 = vmul.f32 %v2157_v50, %v6242_v23  ;;  %vm2071_vm15 = vcmp.lt.s32.totalorder %v2069_v45, %v2070_v48  ;;  %v2041_v35 = vsel %vm2025_vm13, %v6323_v44, 32 }
 0x6b3   :  { %4914 = vmatmul.mubr.f32.vlgmr.msra.gmra.mxu0 %v6389_v63  ;;  %vm2078_vm1 = vcmp.lt.s32.totalorder %v2077_v46, %v2040_v28  ;;  %v2072_v39 = vsel %vm2071_vm15, %v2069_v45, %v2070_v48  ;;  %v2012_v58 = vrot.slane %v2011_v19, 1 }
 0x6b4   :  { %2190 = vadd.xlane.f32.xlu0 %v2156_v27  ;;  %2186 = vadd.xlane.f32.xlu1 %v2154_v41  ;;  %v2079_v22 = vsel %vm2078_vm1, %v2077_v46, %v2040_v28  ;;  %v2073_v20 = vrot.slane %v2072_v39, 1 }
 0x6b5   :  { %4916 = vmatprep.mubr.f32.mxu0 %v6401_v31  ;;  %vm2080_vm2 = vcmp.lt.s32.totalorder %v2079_v22, %v2041_v35  ;;  %v2013_v47 = vmax.f32 %v2011_v19, %v2012_v58 }
 0x6b6   :  { %v2081_v18 = vsel %vm2080_vm2, %v2079_v22, %v2041_v35  ;;  %vm2074_vm3 = vcmp.lt.s32.totalorder %v2072_v39, %v2073_v20 }
 0x6b7   :  { %4917 = vmatmul.mubr.f32.gmra.mxu0 %v6405_v14  ;;  %v2075_v23 = vsel %vm2074_vm3, %v2072_v39, %v2073_v20  ;;  %v2082_v8 = vrot.slane %v2081_v18, 4  ;;  %vm2026_vm4 = vcmp.ge.f32.partialorder %v6339_v51, %v2013_v47  ;;  %vm2027_vm5 = vcmp.ge.f32.partialorder %v6349_v9, %v2013_v47 }
 0x6b8   :  { %vm2112_vm6 = vcmp.eq.s32.totalorder %v6307_v32, %v2075_v23  ;;  %vm2113_vm7 = vcmp.eq.s32.totalorder %v6323_v44, %v2075_v23  ;;  %vm2110_vm8 = vcmp.eq.s32.totalorder %v6114_v29, %v2075_v23  ;;  %vm2111_vm9 = vcmp.eq.s32.totalorder %v6296_v12, %v2075_v23 }
 0x6b9   :  { %v4257_v7 = vsel %vm2112_vm6, 1.0, %v5345_v42  ;;  %v4258_v1 = vsel %vm2113_vm7, 1.0, %v5345_v42  ;;  %v4255_v17 = vsel %vm2110_vm8, 1.0, %v5345_v42  ;;  %v4256_v50 = vsel %vm2111_vm9, 1.0, %v5345_v42 }
 0x6ba   :  { %v2160_v26 = vmul.f32 %v4257_v7, %v6257_v11  ;;  %v2161_v41 = vmul.f32 %v4258_v1, %v6265_v5  ;;  %v2158_v25 = vmul.f32 %v4255_v17, %v6239_v15  ;;  %v2159_v27 = vmul.f32 %v4256_v50, %v6248_v38 }
 0x6bb   :  { %vm2083_vm10 = vcmp.lt.s32.totalorder %v2081_v18, %v2082_v8  ;;  %vm2028_vm11 = vcmp.ge.f32.partialorder %v6357_v21, %v2013_v47  ;;  %v2042_v43 = vsel %vm2026_vm4, %v6114_v29, 32  ;;  %v2043_v45 = vsel %vm2027_vm5, %v6296_v12, 32 }
 0x6bc   :  { %2198 = vadd.xlane.f32.xlu0 %v2160_v26  ;;  %2200 = vadd.xlane.f32.xlu1 %v2161_v41  ;;  %v6432_v11 = vmul.f32 %v2158_v25, %v6252_v30  ;;  %v6435_v15 = vmul.f32 %v2159_v27, %v6260_v2  ;;  %v2084_v38 = vsel %vm2083_vm10, %v2081_v18, %v2082_v8  ;;  %v2044_v48 = vsel %vm2028_vm11, %v6307_v32, 32 }
 0x6bd   :  { %vm2029_vm12 = vcmp.ge.f32.partialorder %v6362_v57, %v2013_v47  ;;  %vm2091_vm13 = vcmp.lt.s32.totalorder %v2042_v43, %v2043_v45  ;;  %v6439_v5 = vmul.f32 %v2160_v26, %v6268_v55  ;;  %v2085_v10 = vrot.slane %v2084_v38, 2 }
 0x6be   :  { %4919 = vmatprep.mubr.f32.mxu0 %v6432_v11  ;;  %v2092_v28 = vsel %vm2091_vm13, %v2042_v43, %v2043_v45  ;;  %v2045_v30 = vsel %vm2029_vm12, %v6323_v44, 32  ;;  %v6447_v46 = vmul.f32 %v2161_v41, %v6273_v6 }
 0x6bf   :  { %4920 = vmatmul.mubr.f32.gmra.mxu0 %v6435_v15  ;;  %vm2093_vm14 = vcmp.lt.s32.totalorder %v2092_v28, %v2044_v48  ;;  %vm2086_vm15 = vcmp.lt.s32.totalorder %v2084_v38, %v2085_v10 }
 0x6c0   :  { %2196 = vadd.xlane.f32.xlu0 %v2159_v27  ;;  %4922 = vmatprep.mubr.f32.mxu0 %v6439_v5  ;;  %v2094_v2 = vsel %vm2093_vm14, %v2092_v28, %v2044_v48  ;;  %v2087_v55 = vsel %vm2086_vm15, %v2084_v38, %v2085_v10  ;;  %v2743_v38 = vld [vmem:[#allocation7 + $0x18] sm:$0xff]  ;;  %v2741_v48 = vld [vmem:[#allocation7 + $0x8] sm:$0xff] }
 0x6c1   :  { %vm2095_vm1 = vcmp.lt.s32.totalorder %v2094_v2, %v2045_v30  ;;  %v2088_v19 = vrot.slane %v2087_v55, 1 }
 0x6c2   :  { %v2096_v39 = vsel %vm2095_vm1, %v2094_v2, %v2045_v30 }
 0x6c3   :  { %4923 = vmatmul.mubr.f32.gmra.mxu0 %v6447_v46  ;;  %v2097_v35 = vrot.slane %v2096_v39, 4  ;;  %vm2089_vm2 = vcmp.lt.s32.totalorder %v2087_v55, %v2088_v19 }
 0x6c4   :  { %2194 = vadd.xlane.f32.xlu0 %v2158_v25  ;;  %v2090_v22 = vsel %vm2089_vm2, %v2087_v55, %v2088_v19 }
 0x6c5   :  { %vm2098_vm3 = vcmp.lt.s32.totalorder %v2096_v39, %v2097_v35  ;;  %vm2116_vm4 = vcmp.eq.s32.totalorder %v6307_v32, %v2090_v22  ;;  %vm2114_vm5 = vcmp.eq.s32.totalorder %v6114_v29, %v2090_v22  ;;  %vm2115_vm6 = vcmp.eq.s32.totalorder %v6296_v12, %v2090_v22 }
 0x6c6   :  { %vm2117_vm7 = vcmp.eq.s32.totalorder %v6323_v44, %v2090_v22  ;;  %v4261_v6 = vsel %vm2116_vm4, 1.0, %v5345_v42  ;;  %v4259_v58 = vsel %vm2114_vm5, 1.0, %v5345_v42  ;;  %v4260_v20 = vsel %vm2115_vm6, 1.0, %v5345_v42 }
 0x6c7   :  { %v4262_v18 = vsel %vm2117_vm7, 1.0, %v5345_v42  ;;  %v2164_v47 = vmul.f32 %v4261_v6, %v6290_v54  ;;  %v2162_v23 = vmul.f32 %v4259_v58, %v6279_v40  ;;  %v2163_v8 = vmul.f32 %v4260_v20, %v6285_v3 }
 0x6c8   :  { %v2165_v7 = vmul.f32 %v4262_v18, %v6301_v49  ;;  %v2099_v1 = vsel %vm2098_vm3, %v2096_v39, %v2097_v35 }
 0x6c9   :  { %2206 = vadd.xlane.f32.xlu1 %v2164_v47  ;;  %v2178_v17 = vmul.f32 %v2162_v23, %v6293_v59  ;;  %v2179_v50 = vmul.f32 %v2163_v8, %v6304_v24  ;;  %v2100_v26 = vrot.slane %v2099_v1, 2  ;;  %v2180_v41 = vmul.f32 %v2164_v47, %v6310_v0 }
 0x6ca   :  { %2208 = vadd.xlane.f32.xlu0 %v2165_v7  ;;  %v2181_v3 = vmul.f32 %v2165_v7, %v6328_v16 }
 0x6cb   :  { %4925 = vmatprep.mubr.f32.mxu0 %v2178_v17  ;;  %vm2101_vm8 = vcmp.lt.s32.totalorder %v2099_v1, %v2100_v26 }
 0x6cc   :  { %4926 = vmatmul.mubr.f32.gmra.mxu0 %v2179_v50  ;;  %v2102_v40 = vsel %vm2101_vm8, %v2099_v1, %v2100_v26 }
 0x6cd   :  { %2204 = vadd.xlane.f32.xlu1 %v2163_v8  ;;  %4928 = vmatprep.mubr.f32.mxu0 %v2180_v41  ;;  %v2103_v54 = vrot.slane %v2102_v40, 1 }
 0x6cf   :  { %vm2104_vm9 = vcmp.lt.s32.totalorder %v2102_v40, %v2103_v54 }
 0x6d0   :  { %4929 = vmatmul.mubr.f32.gmra.mxu0 %v2181_v3  ;;  %v2105_v49 = vsel %vm2104_vm9, %v2102_v40, %v2103_v54 }
 0x6d1   :  { %2202 = vadd.xlane.f32.xlu1 %v2162_v23  ;;  %vm2121_vm10 = vcmp.eq.s32.totalorder %v6323_v44, %v2105_v49  ;;  %vm2118_vm11 = vcmp.eq.s32.totalorder %v6114_v29, %v2105_v49  ;;  %vm2119_vm12 = vcmp.eq.s32.totalorder %v6296_v12, %v2105_v49  ;;  %vm2120_vm13 = vcmp.eq.s32.totalorder %v6307_v32, %v2105_v49 }
 0x6d2   :  { %v4266_v59 = vsel %vm2121_vm10, 1.0, %v5345_v42  ;;  %v4263_v24 = vsel %vm2118_vm11, 1.0, %v5345_v42  ;;  %v4264_v0 = vsel %vm2119_vm12, 1.0, %v5345_v42  ;;  %v4265_v16 = vsel %vm2120_vm13, 1.0, %v5345_v42 }
 0x6d3   :  { %v2169_v25 = vmul.f32 %v4266_v59, %v6354_v62  ;;  %v2166_v27 = vmul.f32 %v4263_v24, %v6320_v4  ;;  %v2167_v44 = vmul.f32 %v4264_v0, %v6335_v56  ;;  %v2168_v43 = vmul.f32 %v4265_v16, %v6345_v52 }
 0x6d5   :  { %2216 = vadd.xlane.f32.xlu0 %v2169_v25  ;;  %v2182_v12 = vmul.f32 %v2166_v27, %v6339_v51  ;;  %v2183_v32 = vmul.f32 %v2167_v44, %v6349_v9  ;;  %2210 = vadd.xlane.f32.xlu1 %v2166_v27  ;;  %v2184_v45 = vmul.f32 %v2168_v43, %v6357_v21  ;;  %v6494_v51 = vpop.permute.xlu1 %2521 }
 0x6d6   :  { %v2185_v62 = vmul.f32 %v2169_v25, %v6362_v57  ;;  %v6492_v57 = vpop.permute.xlu0 %2525 }
 0x6d7   :  { %4931 = vmatprep.mubr.f32.mxu0 %v2182_v12 }
 0x6d8   :  { %4932 = vmatmul.mubr.f32.gmra.mxu0 %v2183_v32 }
 0x6d9   :  { %2214 = vadd.xlane.f32.xlu0 %v2168_v43  ;;  %4934 = vmatprep.mubr.f32.mxu0 %v2184_v45  ;;  %v6496_v4 = vpop.permute.xlu1 %2523 }
 0x6dc   :  { %4935 = vmatmul.mubr.f32.gmra.mxu0 %v2185_v62 }
 0x6dd   :  { %2212 = vadd.xlane.f32.xlu0 %v2167_v44 }
 0x6e6   :  { %2519 = vrot.lane.b32.xlu1 %v5994_v37, %s5343_s22 }
 0x70a   :  { %2563 = vxpose.xlu0.b32.start [1/16] %v6392_v61, 128  ;;  %v2746_v61 = vld [vmem:[#allocation7 + $0x30] sm:$0xff] }
 0x70e   :  { %2564 = vxpose.xlu0.b32.cont [2/16] %v6389_v63, 128  ;;  %v2747_v63 = vld [vmem:[#allocation7 + $0x38] sm:$0xff] }
 0x70f   :  { %4993 = vmatprep.subr.mxu1 %v2747_v63 }
 0x710   :  { %4994 = vmatpush3.msra.mxu1 %v2747_v63 }
 0x711   :  { %4995 = vmatprep.subr.mxu1 %v2746_v61 }
 0x712   :  { %2565 = vxpose.xlu0.b32.cont [3/16] %v6401_v31, 128  ;;  %v2745_v31 = vld [vmem:[#allocation7 + $0x28] sm:$0xff]  ;;  %4996 = vmatpush3.msra.mxu1 %v2746_v61 }
 0x713   :  { %4997 = vmatprep.subr.mxu1 %v2745_v31 }
 0x714   :  { %4998 = vmatpush3.msra.mxu1 %v2745_v31 }
 0x716   :  { %2566 = vxpose.xlu0.b32.cont [4/16] %v6405_v14, 128 }
 0x71a   :  { %2567 = vxpose.xlu0.b32.cont [5/16] %v6432_v11, 128  ;;  %v2744_v11 = vld [vmem:[#allocation7 + $0x20] sm:$0xff] }
 0x71b   :  { %4999 = vmatprep.subr.mxu1 %v2744_v11 }
 0x71c   :  { %5000 = vmatpush3.msra.mxu1 %v2744_v11 }
 0x71d   :  { %5001 = vmatprep.subr.mxu1 %v2743_v38 }
 0x71e   :  { %2568 = vxpose.xlu0.b32.cont [6/16] %v6435_v15, 128  ;;  %5002 = vmatpush3.msra.mxu1 %v2743_v38 }
 0x722   :  { %2569 = vxpose.xlu0.b32.cont [7/16] %v6439_v5, 128  ;;  %v2742_v5 = vld [vmem:[#allocation7 + $0x10] sm:$0xff] }
 0x723   :  { %5003 = vmatprep.subr.mxu1 %v2742_v5 }
 0x724   :  { %5004 = vmatpush3.msra.mxu1 %v2742_v5 }
 0x725   :  { %5005 = vmatprep.subr.mxu1 %v2741_v48 }
 0x726   :  { %2570 = vxpose.xlu0.b32.cont [8/16] %v6447_v46, 128  ;;  %5006 = vmatpush3.msra.mxu1 %v2741_v48 }
 0x72a   :  { %2571 = vxpose.xlu0.b32.cont [9/16] %v2178_v17, 128 }
 0x72e   :  { %2572 = vxpose.xlu0.b32.cont [10/16] %v2179_v50, 128 }
 0x732   :  { %2573 = vxpose.xlu0.b32.cont [11/16] %v2180_v41, 128 }
 0x736   :  { %2574 = vxpose.xlu0.b32.cont [12/16] %v2181_v3, 128 }
 0x739   :  { %v2193_v9 = vpop.xlane.xlu0 %2192  ;;  %v2189_v52 = vpop.xlane.xlu1 %2188 }
 0x73a   :  { %2575 = vxpose.xlu0.b32.cont [13/16] %v2182_v12, 128  ;;  %v2474_v18 = vmul.f32 %v2193_v9, %v6122_v53  ;;  %v2472_v8 = vmul.f32 %v2189_v52, %v6122_v53 }
 0x73c   :  { %v2508_v40 = vsel %vm290_vm0, %v2474_v18, 0.0  ;;  %v2494_v25 = vsel %vm290_vm0, %v2472_v8, 0.0 }
 0x73d   :  { %v2191_v37 = vpop.xlane.xlu0 %2190  ;;  %v2187_v14 = vpop.xlane.xlu1 %2186 }
 0x73e   :  { %2576 = vxpose.xlu0.b32.cont [14/16] %v2183_v32, 128  ;;  %v2471_v17 = vmul.f32 %v2187_v14, %v6122_v53  ;;  %v2473_v49 = vmul.f32 %v2191_v37, %v6122_v53 }
 0x740   :  { %v2487_v32 = vsel %vm290_vm0, %v2471_v17, 0.0  ;;  %v2501_v63 = vsel %vm290_vm0, %v2473_v49, 0.0 }
 0x742   :  { %2577 = vxpose.xlu0.b32.cont [15/16] %v2184_v45, 128 }
 0x745   :  { %v2199_v56 = vpop.xlane.xlu0 %2198  ;;  %v2201_v10 = vpop.xlane.xlu1 %2200 }
 0x746   :  { %2578 = vxpose.xlu0.b32.end [16/16] %v2185_v62, 128  ;;  %v2478_v47 = vmul.f32 %v2201_v10, %v6133_v33  ;;  %v2477_v50 = vmul.f32 %v2199_v56, %v6133_v33 }
 0x748   :  { %v2509_v59 = vsel %vm290_vm0, %v2478_v47, 0.0  ;;  %v2502_v45 = vsel %vm290_vm0, %v2477_v50, 0.0 }
 0x749   :  { %v2197_v21 = vpop.xlane.xlu0 %2196  ;;  %v2510_v37 = vadd.f32 %v2509_v59, %v2508_v40  ;;  %v2503_v11 = vadd.f32 %v2502_v45, %v2501_v63 }
 0x74a   :  { %v2476_v3 = vmul.f32 %v2197_v21, %v6133_v33 }
 0x74c   :  { %v2495_v56 = vsel %vm290_vm0, %v2476_v3, 0.0 }
 0x74d   :  { %v2195_v15 = vpop.xlane.xlu0 %2194  ;;  %v2496_v48 = vadd.f32 %v2495_v56, %v2494_v25 }
 0x74e   :  { %v2475_v7 = vmul.f32 %v2195_v15, %v6133_v33 }
 0x750   :  { %v2488_v27 = vsel %vm290_vm0, %v2475_v7, 0.0 }
 0x751   :  { %v2489_v61 = vadd.f32 %v2488_v27, %v2487_v32 }
 0x752   :  { %v2207_v46 = vpop.xlane.xlu1 %2206 }
 0x753   :  { %v2209_v30 = vpop.xlane.xlu0 %2208  ;;  %v2481_v24 = vmul.f32 %v2207_v46, %v6145_v13 }
 0x754   :  { %v2482_v26 = vmul.f32 %v2209_v30, %v6145_v13 }
 0x755   :  { %v2504_v31 = vsel %vm290_vm0, %v2481_v24, 0.0 }
 0x756   :  { %v2205_v39 = vpop.xlane.xlu1 %2204  ;;  %v2511_v62 = vsel %vm290_vm0, %v2482_v26, 0.0 }
 0x757   :  { %v2480_v44 = vmul.f32 %v2205_v39, %v6145_v13  ;;  %v2512_v15 = vadd.f32 %v2511_v62, %v2510_v37 }
 0x759   :  { %v2497_v38 = vsel %vm290_vm0, %v2480_v44, 0.0 }
 0x75a   :  { %v2203_v58 = vpop.xlane.xlu1 %2202  ;;  %v2498_v47 = vadd.f32 %v2497_v38, %v2496_v48 }
 0x75b   :  { %v2479_v54 = vmul.f32 %v2203_v58, %v6145_v13 }
 0x75d   :  { %v2490_v52 = vsel %vm290_vm0, %v2479_v54, 0.0 }
 0x75e   :  { %v2217_v19 = vpop.xlane.xlu0 %2216  ;;  %v2211_v41 = vpop.xlane.xlu1 %2210  ;;  %v2491_v30 = vadd.f32 %v2490_v52, %v2489_v61 }
 0x75f   :  { %v2486_v0 = vmul.f32 %v2217_v19, %v6156_v60  ;;  %v2483_v43 = vmul.f32 %v2211_v41, %v6156_v60  ;;  %v2505_v19 = vadd.f32 %v2504_v31, %v2503_v11 }
 0x761   :  { %v2513_v14 = vsel %vm290_vm0, %v2486_v0, 0.0  ;;  %v2492_v5 = vsel %vm290_vm0, %v2483_v43, 0.0 }
 0x762   :  { %v2215_v22 = vpop.xlane.xlu0 %2214  ;;  %v2514_v39 = vadd.f32 %v2513_v14, %v2512_v15 }
 0x763   :  { %v2485_v9 = vmul.f32 %v2215_v22, %v6156_v60 }
 0x764   :  { %v2538_v50 = vadd.f32 1.0, %v2514_v39 }
 0x765   :  { %v2506_v46 = vsel %vm290_vm0, %v2485_v9, 0.0 }
 0x766   :  { %v2213_v23 = vpop.xlane.xlu0 %2212  ;;  %v2507_v8 = vadd.f32 %v2506_v46, %v2505_v19  ;;  %5150 = vrcp.f32 %v2538_v50 }
 0x767   :  { %v2484_v21 = vmul.f32 %v2213_v23, %v6156_v60  ;;  %v2493_v23 = vadd.f32 %v2492_v5, %v2491_v30 }
 0x768   :  { %v2537_v41 = vadd.f32 1.0, %v2507_v8 }
 0x769   :  { %v2499_v22 = vsel %vm290_vm0, %v2484_v21, 0.0  ;;  %v2535_v26 = vadd.f32 1.0, %v2493_v23 }
 0x76a   :  { %v2500_v7 = vadd.f32 %v2499_v22, %v2498_v47 }
 0x76b   :  { %5152 = vrcp.f32 %v2535_v26 }
 0x76c   :  { %v2536_v54 = vadd.f32 1.0, %v2500_v7  ;;  %5154 = vrcp.f32 %v2537_v41 }
 0x76e   :  { %5156 = vrcp.f32 %v2536_v54 }
 0x773   :  { %v6498_v28 = vpop.f32.mrf.mxu0 }
 0x774   :  { %v2428_v49 = vmul.f32 %v6498_v28, %v6122_v53 }
 0x775   :  { %v6500_v2 = vpop.f32.mrf.mxu0 }
 0x776   :  { %v2427_v25 = vmul.f32 %v6500_v2, %v6122_v53 }
 0x777   :  { %v6502_v55 = vpop.f32.mrf.mxu0 }
 0x778   :  { %v2443_v37 = vsel %vm290_vm0, %v2427_v25, 0.0 }
 0x779   :  { %v6504_v35 = vpop.f32.mrf.mxu0 }
 0x77a   :  { %v2429_v43 = vmul.f32 %v6504_v35, %v6122_v53 }
 0x77f   :  { %v4921_v6 = vpop.f32.mrf.mxu0 }
 0x780   :  { %v2432_v40 = vmul.f32 %v4921_v6, %v6133_v33  ;;  %v2430_v6 = vmul.f32 %v6502_v55, %v6122_v53 }
 0x781   :  { %v2368_v20 = vpop.f32.mrf.mxu0 }
 0x782   :  { %v2431_v59 = vmul.f32 %v2368_v20, %v6133_v33  ;;  %v2451_v28 = vsel %vm290_vm0, %v2432_v40, 0.0  ;;  %v2464_v56 = vsel %vm290_vm0, %v2430_v6, 0.0  ;;  %v5151_v40 = vpop.eup %5150 }
 0x783   :  { %v4924_v1 = vpop.f32.mrf.mxu0 }
 0x784   :  { %v2434_v0 = vmul.f32 %v4924_v1, %v6133_v33  ;;  %v2450_v1 = vsel %vm290_vm0, %v2428_v49, 0.0  ;;  %v2444_v2 = vsel %vm290_vm0, %v2431_v59, 0.0 }
 0x785   :  { %v2378_v12 = vpop.f32.mrf.mxu0  ;;  %v2452_v52 = vadd.f32 %v2451_v28, %v2450_v1  ;;  %v2445_v11 = vadd.f32 %v2444_v2, %v2443_v37 }
 0x786   :  { %v2579_v16 = vpop.trf.xlu0  ;;  %v2433_v27 = vmul.f32 %v2378_v12, %v6133_v33  ;;  %v2465_v55 = vsel %vm290_vm0, %v2434_v0, 0.0  ;;  %v2520_v0 = vpop.permute.xlu1 %2519 }
 0x787   :  { %4969 = vmatprep.mubr.f32.mxu0 %v2579_v16  ;;  %v2466_v15 = vadd.f32 %v2465_v55, %v2464_v56 }
 0x788   :  { %v2458_v35 = vsel %vm290_vm0, %v2433_v27, 0.0 }
 0x78a   :  { %v6538_v18 = vpop.trf.xlu0 }
 0x78c   :  { %v4927_v10 = vpop.f32.mrf.mxu0 }
 0x78d   :  { %v2436_v16 = vmul.f32 %v4927_v10, %v6145_v13  ;;  %v2457_v10 = vsel %vm290_vm0, %v2429_v43, 0.0 }
 0x78e   :  { %v2388_v58 = vpop.f32.mrf.mxu0  ;;  %v6541_v3 = vpop.trf.xlu0  ;;  %v2459_v19 = vadd.f32 %v2458_v35, %v2457_v10 }
 0x78f   :  { %v2435_v20 = vmul.f32 %v2388_v58, %v6145_v13  ;;  %v2453_v12 = vsel %vm290_vm0, %v2436_v16, 0.0 }
 0x790   :  { %v4930_v17 = vpop.f32.mrf.mxu0  ;;  %v2454_v38 = vadd.f32 %v2453_v12, %v2452_v52 }
 0x791   :  { %v2438_v44 = vmul.f32 %v4930_v17, %v6145_v13  ;;  %v2446_v63 = vsel %vm290_vm0, %v2435_v20, 0.0 }
 0x792   :  { %v2398_v24 = vpop.f32.mrf.mxu0  ;;  %v6564_v9 = vpop.trf.xlu0  ;;  %v2447_v39 = vadd.f32 %v2446_v63, %v2445_v11 }
 0x793   :  { %v2437_v45 = vmul.f32 %v2398_v24, %v6145_v13  ;;  %v2467_v61 = vsel %vm290_vm0, %v2438_v44, 0.0  ;;  %v5153_v24 = vpop.eup %5152 }
 0x794   :  { %v2468_v22 = vadd.f32 %v2467_v61, %v2466_v15  ;;  %v5155_v16 = vpop.eup %5154 }
 0x795   :  { %v2460_v48 = vsel %vm290_vm0, %v2437_v45, 0.0  ;;  %v5157_v28 = vpop.eup %5156 }
 0x796   :  { %v6579_v7 = vpop.trf.xlu0  ;;  %v2461_v17 = vadd.f32 %v2460_v48, %v2459_v19 }
 0x798   :  { %v4933_v32 = vpop.f32.mrf.mxu0 }
 0x799   :  { %v2440_v62 = vmul.f32 %v4933_v32, %v6156_v60 }
 0x79a   :  { %v2408_v21 = vpop.f32.mrf.mxu0  ;;  %v2584_v20 = vpop.trf.xlu0 }
 0x79b   :  { %v2455_v31 = vsel %vm290_vm0, %v2440_v62, 0.0  ;;  %v2439_v14 = vmul.f32 %v2408_v21, %v6156_v60 }
 0x79c   :  { %v4936_v5 = vpop.f32.mrf.mxu0  ;;  %v2456_v58 = vadd.f32 %v2455_v31, %v2454_v38 }
 0x79d   :  { %v2448_v30 = vsel %vm290_vm0, %v2439_v14, 0.0  ;;  %v2442_v46 = vmul.f32 %v4936_v5, %v6156_v60 }
 0x79e   :  { %v2418_v47 = vpop.f32.mrf.mxu0  ;;  %v2449_v50 = vadd.f32 %v2448_v30, %v2447_v39  ;;  %v2532_v54 = vadd.f32 %v6494_v51, %v2456_v58  ;;  %v2585_v32 = vpop.trf.xlu0 }
 0x79f   :  { %v2469_v23 = vsel %vm290_vm0, %v2442_v46, 0.0  ;;  %v2441_v8 = vmul.f32 %v2418_v47, %v6156_v60 }
 0x7a0   :  { %v2470_v26 = vadd.f32 %v2469_v23, %v2468_v22  ;;  %v2531_v25 = vadd.f32 %v2520_v0, %v2449_v50  ;;  %v2542_v44 = vmul.f32 %v5157_v28, %v2532_v54 }
 0x7a1   :  { %v2462_v41 = vsel %vm290_vm0, %v2441_v8, 0.0 }
 0x7a2   :  { %v2534_v49 = vadd.f32 %v6492_v57, %v2470_v26  ;;  %v2463_v59 = vadd.f32 %v2462_v41, %v2461_v17  ;;  %v2540_v2 = vmul.f32 %v5153_v24, %v2531_v25  ;;  %v2560_v57 = vmul.f32 %v2542_v44, %v6156_v60  ;;  %v2586_v45 = vpop.trf.xlu0  ;;  %v6625_v41 = vld [vmem:[%s7466_s12] ss:$0 sm:$0xff] }
 0x7a3   :  { %v2556_v62 = vmul.f32 %v2542_v44, %v6145_v13  ;;  %v2552_v35 = vmul.f32 %v2542_v44, %v6133_v33  ;;  %v2548_v31 = vmul.f32 %v2542_v44, %v6122_v53 }
 0x7a4   :  { %v2546_v6 = vmul.f32 %v5151_v40, %v2534_v49  ;;  %v2533_v27 = vadd.f32 %v6496_v4, %v2463_v59  ;;  %v2559_v55 = vmul.f32 %v2540_v2, %v6156_v60  ;;  %v2555_v37 = vmul.f32 %v2540_v2, %v6145_v13 }
 0x7a5   :  { %v2551_v21 = vmul.f32 %v2540_v2, %v6133_v33  ;;  %v2547_v11 = vmul.f32 %v2540_v2, %v6122_v53 }
 0x7a6   :  { %v2544_v1 = vmul.f32 %v5155_v16, %v2533_v27  ;;  %v2562_v43 = vmul.f32 %v2546_v6, %v6156_v60  ;;  %v2558_v4 = vmul.f32 %v2546_v6, %v6145_v13  ;;  %v2587_v56 = vpop.trf.xlu0 }
 0x7a8   :  { %4937 = vmatprep.subr.mxu0 %v2562_v43  ;;  %v2561_v51 = vmul.f32 %v2544_v1, %v6156_v60  ;;  %v2557_v12 = vmul.f32 %v2544_v1, %v6145_v13  ;;  %v2554_v60 = vmul.f32 %v2546_v6, %v6133_v33  ;;  %v2553_v52 = vmul.f32 %v2544_v1, %v6133_v33 }
 0x7a9   :  { %4938 = vmatpush3.msra.mxu0 %v2562_v43  ;;  %v2550_v13 = vmul.f32 %v2546_v6, %v6122_v53  ;;  %v2549_v61 = vmul.f32 %v2544_v1, %v6122_v53 }
 0x7aa   :  { %4939 = vmatprep.subr.mxu0 %v2561_v51  ;;  %v2588_v63 = vpop.trf.xlu0 }
 0x7ab   :  { %4940 = vmatpush3.msra.mxu0 %v2561_v51  ;;  %v7515_v51 = vld [vmem:[#allocation19_spill] sm:$0xff] }
 0x7ac   :  { %4941 = vmatprep.subr.mxu0 %v2560_v57 }
 0x7ad   :  { %4942 = vmatpush3.msra.mxu0 %v2560_v57 }
 0x7ae   :  { %4943 = vmatprep.subr.mxu0 %v2559_v55  ;;  %v2589_v14 = vpop.trf.xlu0 }
 0x7af   :  { %4944 = vmatpush3.msra.mxu0 %v2559_v55 }
 0x7b0   :  { %4945 = vmatprep.subr.mxu0 %v2558_v4 }
 0x7b1   :  { %4946 = vmatpush3.msra.mxu0 %v2558_v4  ;;  %v7516_v4 = vld [vmem:[#allocation15_spill] sm:$0xff] }
 0x7b2   :  { %4947 = vmatprep.subr.mxu0 %v2557_v12  ;;  %v2590_v33 = vpop.trf.xlu0 }
 0x7b3   :  { %4948 = vmatpush3.msra.mxu0 %v2557_v12 }
 0x7b4   :  { %4949 = vmatprep.subr.mxu0 %v2556_v62 }
 0x7b5   :  { %4950 = vmatpush3.msra.mxu0 %v2556_v62 }
 0x7b6   :  { %4951 = vmatprep.subr.mxu0 %v2555_v37  ;;  %v2591_v15 = vpop.trf.xlu0 }
 0x7b7   :  { %4952 = vmatpush3.msra.mxu0 %v2555_v37 }
 0x7b8   :  { %4953 = vmatprep.subr.mxu0 %v2554_v60 }
 0x7b9   :  { %4954 = vmatpush3.msra.mxu0 %v2554_v60 }
 0x7ba   :  { %4955 = vmatprep.subr.mxu0 %v2553_v52  ;;  %v2592_v38 = vpop.trf.xlu0 }
 0x7bb   :  { %4956 = vmatpush3.msra.mxu0 %v2553_v52 }
 0x7bc   :  { %4957 = vmatprep.subr.mxu0 %v2552_v35 }
 0x7bd   :  { %4958 = vmatpush3.msra.mxu0 %v2552_v35 }
 0x7be   :  { %4959 = vmatprep.subr.mxu0 %v2551_v21  ;;  %v2593_v53 = vpop.trf.xlu0 }
 0x7bf   :  { %4960 = vmatpush3.msra.mxu0 %v2551_v21 }
 0x7c0   :  { %4961 = vmatprep.subr.mxu0 %v2550_v13 }
 0x7c1   :  { %4962 = vmatpush3.msra.mxu0 %v2550_v13 }
 0x7c2   :  { %4963 = vmatprep.subr.mxu0 %v2549_v61 }
 0x7c3   :  { %4964 = vmatpush3.msra.mxu0 %v2549_v61 }
 0x7c4   :  { %4965 = vmatprep.subr.mxu0 %v2548_v31 }
 0x7c5   :  { %4966 = vmatpush3.msra.mxu0 %v2548_v31  ;;  %v7517_v31 = vld [vmem:[#allocation24_spill] sm:$0xff] }
 0x7c6   :  { %4967 = vmatprep.subr.mxu0 %v2547_v11 }
 0x7c7   :  { %4968 = vmatpush3.msra.mxu0 %v2547_v11 }
 0x7c8   :  { %4970 = vmatmul.mubr.f32.vlgmr.msra.gmra.mxu0 %v6538_v18  ;;  %v2594_v18 = vpop.trf.xlu0 }
 0x7c9   :  { %4972 = vmatprep.mubr.f32.mxu0 %v6541_v3  ;;  %v2740_v3 = vld [vmem:[#allocation7] sm:$0xff] }
 0x7ca   :  { %5007 = vmatprep.subr.mxu1 %v2740_v3 }
 0x7cb   :  { %5008 = vmatpush3.msra.mxu1 %v2740_v3 }
 0x7cc   :  { %4973 = vmatmul.mubr.f32.gmra.mxu0 %v6564_v9 }
 0x7cd   :  { %4975 = vmatprep.mubr.f32.mxu0 %v6579_v7 }
 0x7d0   :  { %4976 = vmatmul.mubr.f32.gmra.mxu0 %v2584_v20 }
 0x7d1   :  { %4978 = vmatprep.mubr.f32.mxu0 %v2585_v32 }
 0x7d4   :  { %4979 = vmatmul.mubr.f32.gmra.mxu0 %v2586_v45 }
 0x7d5   :  { %4981 = vmatprep.mubr.f32.mxu0 %v2587_v56 }
 0x7d8   :  { %4982 = vmatmul.mubr.f32.gmra.mxu0 %v2588_v63 }
 0x7d9   :  { %4984 = vmatprep.mubr.f32.mxu0 %v2589_v14 }
 0x7dc   :  { %4985 = vmatmul.mubr.f32.gmra.mxu0 %v2590_v33 }
 0x7dd   :  { %4987 = vmatprep.mubr.f32.mxu0 %v2591_v15 }
 0x7e0   :  { %4988 = vmatmul.mubr.f32.gmra.mxu0 %v2592_v38  ;;  %v7518_v38 = vld [vmem:[#allocation25_spill] sm:$0xff] }
 0x7e1   :  { %4990 = vmatprep.mubr.f32.mxu0 %v2593_v53 }
 0x7e4   :  { %4991 = vmatmul.mubr.f32.gmra.mxu0 %v2594_v18  ;;  %v7519_v18 = vld [vmem:[#allocation16_spill] sm:$0xff] }
 0x7e5   :  { %3374 = vmatprep.mubr.f32.mxu0 %v5345_v42 }
 0x888   :  { %v4971_v9 = vpop.f32.mrf.mxu0 }
 0x88a   :  { %v2661_v5 = vpop.f32.mrf.mxu0 }
 0x88b   :  { %5009 = vmatprep.mubr.msk.f32.mxu1 %vm290_vm0, %v2661_v5 }
 0x88c   :  { %v4974_v10 = vpop.f32.mrf.mxu0  ;;  %5010 = vmatmul.mubr.msk.f32.vlgmr.msra.gmra.mxu1 %vm290_vm0, %v4971_v9 }
 0x88e   :  { %v2671_v48 = vpop.f32.mrf.mxu0 }
 0x88f   :  { %5012 = vmatprep.mubr.msk.f32.mxu1 %vm290_vm0, %v2671_v48  ;;  %v7520_v48 = vld [vmem:[#allocation26_spill] sm:$0xff] }
 0x890   :  { %v4977_v30 = vpop.f32.mrf.mxu0  ;;  %5013 = vmatmul.mubr.msk.f32.gmra.mxu1 %vm290_vm0, %v4974_v10 }
 0x892   :  { %v2681_v46 = vpop.f32.mrf.mxu0 }
 0x893   :  { %5015 = vmatprep.mubr.msk.f32.mxu1 %vm290_vm0, %v2681_v46 }
 0x894   :  { %v4980_v19 = vpop.f32.mrf.mxu0  ;;  %5016 = vmatmul.mubr.msk.f32.gmra.mxu1 %vm290_vm0, %v4977_v30 }
 0x896   :  { %v2691_v39 = vpop.f32.mrf.mxu0 }
 0x897   :  { %5018 = vmatprep.mubr.msk.f32.mxu1 %vm290_vm0, %v2691_v39 }
 0x898   :  { %v4983_v22 = vpop.f32.mrf.mxu0  ;;  %5019 = vmatmul.mubr.msk.f32.gmra.mxu1 %vm290_vm0, %v4980_v19 }
 0x89a   :  { %v2701_v58 = vpop.f32.mrf.mxu0 }
 0x89b   :  { %5021 = vmatprep.mubr.msk.f32.mxu1 %vm290_vm0, %v2701_v58  ;;  %v7521_v58 = vld [vmem:[#allocation27_spill] sm:$0xff] }
 0x89c   :  { %v4986_v47 = vpop.f32.mrf.mxu0  ;;  %5022 = vmatmul.mubr.msk.f32.gmra.mxu1 %vm290_vm0, %v4983_v22 }
 0x89e   :  { %v2711_v23 = vpop.f32.mrf.mxu0 }
 0x89f   :  { %5024 = vmatprep.mubr.msk.f32.mxu1 %vm290_vm0, %v2711_v23 }
 0x8a0   :  { %v4989_v8 = vpop.f32.mrf.mxu0  ;;  %5025 = vmatmul.mubr.msk.f32.gmra.mxu1 %vm290_vm0, %v4986_v47 }
 0x8a2   :  { %v2721_v7 = vpop.f32.mrf.mxu0 }
 0x8a3   :  { %5027 = vmatprep.mubr.msk.f32.mxu1 %vm290_vm0, %v2721_v7 }
 0x8a4   :  { %v4992_v17 = vpop.f32.mrf.mxu0  ;;  %5028 = vmatmul.mubr.msk.f32.gmra.mxu1 %vm290_vm0, %v4989_v8 }
 0x8a6   :  { %v2731_v50 = vpop.f32.mrf.mxu0 }
 0x8a7   :  { %5030 = vmatprep.mubr.msk.f32.mxu1 %vm290_vm0, %v2731_v50 }
 0x8a8   :  { %5031 = vmatmul.mubr.msk.f32.gmra.mxu1 %vm290_vm0, %v4992_v17  ;;  %v7522_v17 = vld [vmem:[#allocation17_spill] sm:$0xff] }
 0x94c   :  { %v5011_v26 = vpop.f32.mrf.mxu1 }
 0x94d   :  { %v2942_v40 = vadd.f32 %v5011_v26, %v5564_v34 }
 0x94e   :  { %v2862_v54 = vpop.f32.mrf.mxu1 }
 0x94f   :  { %v6629_v49 = vadd.f32 %v6625_v41, %v2942_v40  ;;  %v2941_v59 = vadd.f32 %v2862_v54, %v5567_v36  ;;  %v7514_v36 = vld [vmem:[#allocation14_spill] sm:$0xff] }
 0x950   :  { %v5014_v24 = vpop.f32.mrf.mxu1 }
 0x951   :  { %v6633_v0 = vadd.f32 %v6625_v41, %v2941_v59  ;;  %v2983_v16 = vsel %vm290_vm0, %v6629_v49, 0.0  ;;  %v3055_v34 = vmul.f32 %v6629_v49, %v6629_v49  ;;  %v2944_v44 = vadd.f32 %v5014_v24, %v7514_v36 }
 0x952   :  { %2984 = vadd.xlane.f32.xlu1 %v2983_v16  ;;  %v2872_v25 = vpop.f32.mrf.mxu1 }
 0x953   :  { %v2980_v27 = vsel %vm290_vm0, %v6633_v0, 0.0  ;;  %v3073_v1 = vsel %vm290_vm0, %v3055_v34, 0.0  ;;  %v3054_v43 = vmul.f32 %v6633_v0, %v6633_v0  ;;  %v6647_v55 = vadd.f32 %v6625_v41, %v2944_v44  ;;  %v7523_v34 = vld [vmem:[#allocation18_spill] sm:$0xff] }
 0x954   :  { %v5017_v6 = vpop.f32.mrf.mxu1  ;;  %v2943_v12 = vadd.f32 %v2872_v25, %v7516_v4 }
 0x955   :  { %v3070_v62 = vsel %vm290_vm0, %v3054_v43, 0.0  ;;  %v2989_v35 = vsel %vm290_vm0, %v6647_v55, 0.0  ;;  %v3057_v61 = vmul.f32 %v6647_v55, %v6647_v55  ;;  %v2946_v3 = vadd.f32 %v5017_v6, %v7519_v18 }
 0x956   :  { %2981 = vadd.xlane.f32.xlu1 %v2980_v27  ;;  %v2882_v28 = vpop.f32.mrf.mxu1  ;;  %v6659_v52 = vadd.f32 %v6625_v41, %v2943_v12 }
 0x957   :  { %v3079_v5 = vsel %vm290_vm0, %v3057_v61, 0.0  ;;  %v6693_v7 = vadd.f32 %v6625_v41, %v2946_v3  ;;  %v2945_v50 = vadd.f32 %v2882_v28, %v7522_v17 }
 0x958   :  { %v5020_v20 = vpop.f32.mrf.mxu1  ;;  %v2986_v11 = vsel %vm290_vm0, %v6659_v52, 0.0  ;;  %v3056_v19 = vmul.f32 %v6659_v52, %v6659_v52 }
 0x959   :  { %v6704_v24 = vadd.f32 %v6625_v41, %v2945_v50  ;;  %v2995_v16 = vsel %vm290_vm0, %v6693_v7, 0.0  ;;  %v3059_v27 = vmul.f32 %v6693_v7, %v6693_v7  ;;  %v2948_v28 = vadd.f32 %v5020_v20, %v7523_v34  ;;  %v3242_v50 = vld [vmem:[%s7469_s15 + $0x40] sm:$0xff]  ;;  %v3235_v34 = vld [vmem:[%s7469_s15 + $0x8] sm:$0xff] }
 0x95a   :  { %3074 = vadd.xlane.f32.xlu1 %v3073_v1  ;;  %v2892_v2 = vpop.f32.mrf.mxu1  ;;  %v3076_v40 = vsel %vm290_vm0, %v3056_v19, 0.0  ;;  %v3247_v19 = vld [vmem:[%s7469_s15 + $0x68] sm:$0xff] }
 0x95b   :  { %v2947_v57 = vadd.f32 %v2892_v2, %v7515_v51  ;;  %v2992_v6 = vsel %vm290_vm0, %v6704_v24, 0.0  ;;  %v3085_v36 = vsel %vm290_vm0, %v3059_v27, 0.0  ;;  %v3058_v44 = vmul.f32 %v6704_v24, %v6704_v24  ;;  %v7524_v51 = vld [vmem:[#allocation21_spill] sm:$0xff]  ;;  %v3236_v27 = vld [vmem:[%s7469_s15 + $0x10] sm:$0xff] }
 0x95c   :  { %v5023_v32 = vpop.f32.mrf.mxu1  ;;  %v6718_v1 = vadd.f32 %v6625_v41, %v2948_v28 }
 0x95d   :  { %v6651_v45 = vadd.f32 %v6625_v41, %v2947_v57  ;;  %v3082_v43 = vsel %vm290_vm0, %v3058_v44, 0.0  ;;  %v2950_v57 = vadd.f32 %v5023_v32, %v7524_v51  ;;  %v3234_v44 = vld [vmem:[%s7469_s15] sm:$0xff] }
 0x95e   :  { %3071 = vadd.xlane.f32.xlu1 %v3070_v62  ;;  %v2902_v37 = vpop.f32.mrf.mxu1  ;;  %v3001_v2 = vsel %vm290_vm0, %v6718_v1, 0.0  ;;  %v3061_v4 = vmul.f32 %v6718_v1, %v6718_v1  ;;  %v7525_v62 = vld [vmem:[#allocation20_spill] sm:$0xff] }
 0x95f   :  { %v3060_v60 = vmul.f32 %v6651_v45, %v6651_v45  ;;  %v2998_v20 = vsel %vm290_vm0, %v6651_v45, 0.0  ;;  %v6729_v12 = vadd.f32 %v6625_v41, %v2950_v57 }
 0x960   :  { %v6656_v56 = vpop.f32.mrf.mxu1 }
 0x961   :  { %v3088_v21 = vsel %vm290_vm0, %v3060_v60, 0.0  ;;  %v2949_v60 = vadd.f32 %v2902_v37, %v7525_v62  ;;  %v3007_v32 = vsel %vm290_vm0, %v6729_v12, 0.0  ;;  %v3063_v61 = vmul.f32 %v6729_v12, %v6729_v12 }
 0x962   :  { %2990 = vadd.xlane.f32.xlu1 %v2989_v35  ;;  %3089 = vadd.xlane.f32.xlu0 %v3088_v21  ;;  %v6664_v63 = vpop.f32.mrf.mxu1  ;;  %v3091_v35 = vsel %vm290_vm0, %v3061_v4, 0.0 }
 0x963   :  { %v6734_v21 = vadd.f32 %v6625_v41, %v2949_v60 }
 0x964   :  { %v5029_v13 = vpop.f32.mrf.mxu1 }
 0x965   :  { %v2954_v14 = vadd.f32 %v5029_v13, %v7517_v31  ;;  %v3004_v13 = vsel %vm290_vm0, %v6734_v21, 0.0  ;;  %v7526_v31 = vld [vmem:[#allocation23_spill] sm:$0xff] }
 0x966   :  { %2987 = vadd.xlane.f32.xlu1 %v2986_v11  ;;  %v2922_v33 = vpop.f32.mrf.mxu1  ;;  %v2952_v37 = vadd.f32 %v6656_v56, %v7526_v31  ;;  %v3062_v11 = vmul.f32 %v6734_v21, %v6734_v21 }
 0x967   :  { %v6672_v15 = vadd.f32 %v6625_v41, %v2954_v14  ;;  %v2953_v53 = vadd.f32 %v2922_v33, %v7518_v38  ;;  %v3097_v14 = vsel %vm290_vm0, %v3063_v61, 0.0  ;;  %v7527_v38 = vld [vmem:[#allocation22_spill] sm:$0xff] }
 0x968   :  { %v5032_v9 = vpop.f32.mrf.mxu1  ;;  %v6748_v33 = vadd.f32 %v6625_v41, %v2952_v37  ;;  %v3094_v18 = vsel %vm290_vm0, %v3062_v11, 0.0 }
 0x969   :  { %v6678_v10 = vadd.f32 %v6625_v41, %v2953_v53  ;;  %v2956_v30 = vadd.f32 %v5032_v9, %v7520_v48  ;;  %v3067_v46 = vmul.f32 %v6672_v15, %v6672_v15  ;;  %v2951_v53 = vadd.f32 %v6664_v63, %v7527_v38 }
 0x96a   :  { %3080 = vadd.xlane.f32.xlu1 %v3079_v5  ;;  %v2932_v39 = vpop.f32.mrf.mxu1  ;;  %v3013_v56 = vsel %vm290_vm0, %v6748_v33, 0.0  ;;  %v3065_v5 = vmul.f32 %v6748_v33, %v6748_v33 }
 0x96b   :  { %v6686_v22 = vadd.f32 %v6625_v41, %v2956_v30  ;;  %v2955_v47 = vadd.f32 %v2932_v39, %v7521_v58  ;;  %v3109_v23 = vsel %vm290_vm0, %v3067_v46, 0.0  ;;  %v3066_v8 = vmul.f32 %v6678_v10, %v6678_v10  ;;  %v3249_v30 = vld [vmem:[%s7469_s15 + $0x78] sm:$0xff]  ;;  %v3248_v46 = vld [vmem:[%s7469_s15 + $0x70] sm:$0xff]  ;;  %v3246_v58 = vld [vmem:[%s7469_s15 + $0x60] sm:$0xff] }
 0x96c   :  { %3110 = vadd.xlane.f32.xlu0 %v3109_v23  ;;  %v6754_v3 = vadd.f32 %v6625_v41, %v2951_v53  ;;  %v3103_v48 = vsel %vm290_vm0, %v3065_v5, 0.0  ;;  %v3019_v39 = vsel %vm290_vm0, %v6672_v15, 0.0  ;;  %3326 = vmatprep.subr.mxu0 %v3249_v30  ;;  %v3244_v23 = vld [vmem:[%s7469_s15 + $0x50] sm:$0xff]  ;;  %v3016_v17 = vsel %vm290_vm0, %v6678_v10, 0.0 }
 0x96d   :  { %v6697_v26 = vadd.f32 %v6625_v41, %v2955_v47  ;;  %v3106_v54 = vsel %vm290_vm0, %v3066_v8, 0.0  ;;  %3327 = vmatpush1.msra.mxu0 %v3248_v46  ;;  %v3245_v47 = vld [vmem:[%s7469_s15 + $0x58] sm:$0xff]  ;;  %v3243_v8 = vld [vmem:[%s7469_s15 + $0x48] sm:$0xff] }
 0x96e   :  { %3077 = vadd.xlane.f32.xlu1 %v3076_v40  ;;  %v3010_v9 = vsel %vm290_vm0, %v6754_v3, 0.0  ;;  %v3064_v63 = vmul.f32 %v6754_v3, %v6754_v3  ;;  %3328 = vmatprep.subr.mxu0 %v3247_v19  ;;  %v3241_v40 = vld [vmem:[%s7469_s15 + $0x38] sm:$0xff] }
 0x96f   :  { %v3068_v59 = vmul.f32 %v6697_v26, %v6697_v26  ;;  %3329 = vmatpush1.msra.mxu0 %v3246_v58  ;;  %v3022_v28 = vsel %vm290_vm0, %v6697_v26, 0.0 }
 0x970   :  { %3107 = vadd.xlane.f32.xlu0 %v3106_v54  ;;  %v3100_v41 = vsel %vm290_vm0, %v3064_v63, 0.0  ;;  %3330 = vmatprep.subr.mxu0 %v3245_v47  ;;  %v3025_v54 = vsel %vm290_vm0, %v6686_v22, 0.0 }
 0x971   :  { %v3112_v25 = vsel %vm290_vm0, %v3068_v59, 0.0  ;;  %3331 = vmatpush1.msra.mxu0 %v3244_v23  ;;  %v3240_v59 = vld [vmem:[%s7469_s15 + $0x30] sm:$0xff] }
 0x972   :  { %2996 = vadd.xlane.f32.xlu1 %v2995_v16  ;;  %3332 = vmatprep.subr.mxu0 %v3243_v8  ;;  %v3239_v16 = vld [vmem:[%s7469_s15 + $0x28] sm:$0xff] }
 0x973   :  { %3333 = vmatpush1.msra.mxu0 %v3242_v50 }
 0x974   :  { %3113 = vadd.xlane.f32.xlu0 %v3112_v25  ;;  %3334 = vmatprep.subr.mxu0 %v3241_v40  ;;  %v3238_v25 = vld [vmem:[%s7469_s15 + $0x20] sm:$0xff] }
 0x975   :  { %3335 = vmatpush1.msra.mxu0 %v3240_v59 }
 0x976   :  { %2993 = vadd.xlane.f32.xlu1 %v2992_v6  ;;  %3336 = vmatprep.subr.mxu0 %v3239_v16  ;;  %v3237_v6 = vld [vmem:[%s7469_s15 + $0x18] sm:$0xff] }
 0x977   :  { %3337 = vmatpush1.msra.mxu0 %v3238_v25 }
 0x978   :  { %3338 = vmatprep.subr.mxu0 %v3237_v6 }
 0x979   :  { %3339 = vmatpush1.msra.mxu0 %v3236_v27 }
 0x97a   :  { %3086 = vadd.xlane.f32.xlu1 %v3085_v36  ;;  %v3069_v36 = vmul.f32 %v6686_v22, %v6686_v22  ;;  %3340 = vmatprep.subr.mxu0 %v3235_v34 }
 0x97b   :  { %3341 = vmatpush1.msra.mxu0 %v3234_v44 }
 0x97e   :  { %3083 = vadd.xlane.f32.xlu1 %v3082_v43  ;;  %v3115_v43 = vsel %vm290_vm0, %v3069_v36, 0.0 }
 0x982   :  { %3002 = vadd.xlane.f32.xlu1 %v3001_v2 }
 0x986   :  { %2999 = vadd.xlane.f32.xlu1 %v2998_v20 }
 0x98a   :  { %3092 = vadd.xlane.f32.xlu1 %v3091_v35 }
 0x98e   :  { %3008 = vadd.xlane.f32.xlu1 %v3007_v32 }
 0x992   :  { %3005 = vadd.xlane.f32.xlu1 %v3004_v13 }
 0x996   :  { %3098 = vadd.xlane.f32.xlu1 %v3097_v14 }
 0x99a   :  { %3095 = vadd.xlane.f32.xlu1 %v3094_v18 }
 0x99e   :  { %3014 = vadd.xlane.f32.xlu1 %v3013_v56 }
 0x9a2   :  { %3011 = vadd.xlane.f32.xlu1 %v3010_v9 }
 0x9a6   :  { %3104 = vadd.xlane.f32.xlu1 %v3103_v48 }
 0x9aa   :  { %3101 = vadd.xlane.f32.xlu1 %v3100_v41 }
 0x9ae   :  { %3020 = vadd.xlane.f32.xlu1 %v3019_v39 }
 0x9b2   :  { %3017 = vadd.xlane.f32.xlu1 %v3016_v17 }
 0x9b6   :  { %3026 = vadd.xlane.f32.xlu1 %v3025_v54 }
 0x9ba   :  { %3023 = vadd.xlane.f32.xlu1 %v3022_v28 }
 0x9be   :  { %3116 = vadd.xlane.f32.xlu1 %v3115_v43 }
 0x9db   :  { %v2985_v2 = vpop.xlane.xlu1 %2984 }
 0x9df   :  { %v2982_v51 = vpop.xlane.xlu1 %2981 }
 0x9e0   :  { %v3028_v61 = vadd.f32 %v2985_v2, %v2982_v51 }
 0x9e3   :  { %v3075_v57 = vpop.xlane.xlu1 %3074 }
 0x9e7   :  { %v3072_v20 = vpop.xlane.xlu1 %3071 }
 0x9e8   :  { %v3118_v31 = vadd.f32 %v3075_v57, %v3072_v20 }
 0x9eb   :  { %v2991_v4 = vpop.xlane.xlu1 %2990  ;;  %v3090_v46 = vpop.xlane.xlu0 %3089 }
 0x9ef   :  { %v2988_v62 = vpop.xlane.xlu1 %2987 }
 0x9f0   :  { %v3029_v14 = vadd.f32 %v3028_v61, %v2988_v62 }
 0x9f2   :  { %v3030_v53 = vadd.f32 %v3029_v14, %v2991_v4  ;;  %v6838_v14 = vld [vmem:[%s7467_s13] ss:$0 sm:$0xff] }
 0x9f3   :  { %v3081_v60 = vpop.xlane.xlu1 %3080 }
 0x9f7   :  { %v3078_v35 = vpop.xlane.xlu1 %3077 }
 0x9f8   :  { %v3119_v11 = vadd.f32 %v3118_v31, %v3078_v35 }
 0x9fa   :  { %v3120_v18 = vadd.f32 %v3119_v11, %v3081_v60 }
 0x9fb   :  { %v2997_v32 = vpop.xlane.xlu1 %2996 }
 0x9ff   :  { %v2994_v13 = vpop.xlane.xlu1 %2993 }
 0xa00   :  { %v3031_v56 = vadd.f32 %v3030_v53, %v2994_v13 }
 0xa02   :  { %v3032_v63 = vadd.f32 %v3031_v56, %v2997_v32  ;;  %v3111_v56 = vpop.xlane.xlu0 %3110 }
 0xa03   :  { %v3087_v37 = vpop.xlane.xlu1 %3086 }
 0xa07   :  { %v3084_v38 = vpop.xlane.xlu1 %3083 }
 0xa08   :  { %v3121_v9 = vadd.f32 %v3120_v18, %v3084_v38 }
 0xa0a   :  { %v3122_v48 = vadd.f32 %v3121_v9, %v3087_v37 }
 0xa0b   :  { %v3003_v5 = vpop.xlane.xlu1 %3002 }
 0xa0c   :  { %v3123_v39 = vadd.f32 %v3122_v48, %v3090_v46 }
 0xa0f   :  { %v3000_v41 = vpop.xlane.xlu1 %2999 }
 0xa10   :  { %v3033_v30 = vadd.f32 %v3032_v63, %v3000_v41 }
 0xa12   :  { %v3034_v19 = vadd.f32 %v3033_v30, %v3003_v5  ;;  %v6845_v5 = vld [vmem:[%s7468_s14] ss:$0 sm:$0xff] }
 0xa13   :  { %v3093_v58 = vpop.xlane.xlu1 %3092 }
 0xa14   :  { %v3035_v47 = vrot.slane %v3034_v19, 4  ;;  %v3124_v23 = vadd.f32 %v3123_v39, %v3093_v58 }
 0xa16   :  { %v3036_v8 = vadd.f32 %v3035_v47, %v3034_v19  ;;  %v3125_v17 = vrot.slane %v3124_v23, 4 }
 0xa17   :  { %v3009_v50 = vpop.xlane.xlu1 %3008 }
 0xa18   :  { %v3037_v40 = vrot.slane %v3036_v8, 2  ;;  %v3126_v54 = vadd.f32 %v3125_v17, %v3124_v23 }
 0xa1a   :  { %v3038_v59 = vadd.f32 %v3037_v40, %v3036_v8  ;;  %v3127_v16 = vrot.slane %v3126_v54, 2  ;;  %v3108_v8 = vpop.xlane.xlu0 %3107 }
 0xa1b   :  { %v3006_v25 = vpop.xlane.xlu1 %3005 }
 0xa1c   :  { %v3039_v6 = vrot.slane %v3038_v59, 1  ;;  %v3128_v27 = vadd.f32 %v3127_v16, %v3126_v54  ;;  %v3041_v11 = vadd.f32 %v3009_v50, %v3006_v25 }
 0xa1e   :  { %v3040_v34 = vadd.f32 %v3039_v6, %v3038_v59  ;;  %v3129_v28 = vrot.slane %v3128_v27, 1 }
 0xa1f   :  { %v3099_v36 = vpop.xlane.xlu1 %3098 }
 0xa20   :  { %v6825_v44 = vmul.f32 0.00024414063, %v3040_v34  ;;  %v3130_v43 = vadd.f32 %v3129_v28, %v3128_v27 }
 0xa22   :  { %v3148_v2 = vmul.f32 %v6825_v44, %v6825_v44  ;;  %v3146_v51 = vmul.f32 0.00024414063, %v3130_v43  ;;  %v3152_v61 = vsub.f32 %v6633_v0, %v6825_v44  ;;  %v3153_v31 = vsub.f32 %v6629_v49, %v6825_v44 }
 0xa23   :  { %v3096_v57 = vpop.xlane.xlu1 %3095  ;;  %v3154_v41 = vsub.f32 %v6659_v52, %v6825_v44  ;;  %v3155_v47 = vsub.f32 %v6647_v55, %v6825_v44  ;;  %v3156_v25 = vsub.f32 %v6704_v24, %v6825_v44 }
 0xa24   :  { %v3150_v20 = vsub.f32 %v3146_v51, %v3148_v2  ;;  %v3131_v13 = vadd.f32 %v3099_v36, %v3096_v57  ;;  %v3157_v2 = vsub.f32 %v6693_v7, %v6825_v44  ;;  %v3114_v57 = vpop.xlane.xlu0 %3113 }
 0xa26   :  { %v3168_v4 = vadd.f32 1e-05, %v3150_v20 }
 0xa27   :  { %v3015_v62 = vpop.xlane.xlu1 %3014 }
 0xa28   :  { %5158 = vrsqrt.f32 %v3168_v4 }
 0xa2b   :  { %v3012_v60 = vpop.xlane.xlu1 %3011 }
 0xa2c   :  { %v3042_v48 = vadd.f32 %v3041_v11, %v3012_v60 }
 0xa2e   :  { %v3043_v23 = vadd.f32 %v3042_v48, %v3015_v62 }
 0xa2f   :  { %v3105_v35 = vpop.xlane.xlu1 %3104 }
 0xa33   :  { %v3102_v32 = vpop.xlane.xlu1 %3101 }
 0xa34   :  { %v3132_v38 = vadd.f32 %v3131_v13, %v3102_v32  ;;  %v3158_v13 = vsub.f32 %v6651_v45, %v6825_v44 }
 0xa35   :  { %v6833_v37 = vpop.eup %5158 }
 0xa36   :  { %v3172_v53 = vmul.f32 %v6833_v37, %v3152_v61  ;;  %v3173_v18 = vmul.f32 %v6833_v37, %v3153_v31  ;;  %v3133_v30 = vadd.f32 %v3132_v38, %v3105_v35  ;;  %v3174_v39 = vmul.f32 %v6833_v37, %v3154_v41 }
 0xa37   :  { %v3021_v9 = vpop.xlane.xlu1 %3020  ;;  %v3175_v17 = vmul.f32 %v6833_v37, %v3155_v47  ;;  %v3176_v6 = vmul.f32 %v6833_v37, %v3156_v25  ;;  %v3177_v20 = vmul.f32 %v6833_v37, %v3157_v2  ;;  %v3178_v11 = vmul.f32 %v6833_v37, %v3158_v13 }
 0xa38   :  { %v3195_v63 = vmul.f32 %v6838_v14, %v3172_v53  ;;  %v3196_v19 = vmul.f32 %v6838_v14, %v3173_v18  ;;  %v3134_v50 = vadd.f32 %v3133_v30, %v3108_v8  ;;  %v3197_v59 = vmul.f32 %v6838_v14, %v3174_v39 }
 0xa39   :  { %v3198_v36 = vmul.f32 %v6838_v14, %v3175_v17  ;;  %v3199_v35 = vmul.f32 %v6838_v14, %v3176_v6  ;;  %v3201_v41 = vmul.f32 %v6838_v14, %v3178_v11 }
 0xa3a   :  { %v3218_v46 = vadd.f32 %v6845_v5, %v3195_v63  ;;  %v3219_v54 = vadd.f32 %v6845_v5, %v3196_v19  ;;  %v3220_v34 = vadd.f32 %v6845_v5, %v3197_v59  ;;  %v3135_v28 = vadd.f32 %v3134_v50, %v3111_v56 }
 0xa3b   :  { %v3018_v58 = vpop.xlane.xlu1 %3017  ;;  %v3221_v60 = vadd.f32 %v6845_v5, %v3198_v36  ;;  %v3222_v18 = vadd.f32 %v6845_v5, %v3199_v35  ;;  %v3200_v56 = vmul.f32 %v6838_v14, %v3177_v20  ;;  %v3159_v63 = vsub.f32 %v6718_v1, %v6825_v44 }
 0xa3c   :  { %4286 = vmatmul.mubr.msk.f32.vlgmr.msra.gmra.mxu0 %vm290_vm0, %v3218_v46  ;;  %v3044_v40 = vadd.f32 %v3043_v23, %v3018_v58  ;;  %v3136_v62 = vadd.f32 %v3135_v28, %v3114_v57  ;;  %v3224_v44 = vadd.f32 %v6845_v5, %v3201_v41 }
 0xa3d   :  { %3380 = vmatprep.mubr.f32.mxu0 %v5345_v42  ;;  %v3223_v19 = vadd.f32 %v6845_v5, %v3200_v56  ;;  %v3179_v39 = vmul.f32 %v6833_v37, %v3159_v63 }
 0xa3e   :  { %v3045_v27 = vadd.f32 %v3044_v40, %v3021_v9 }
 0xa3f   :  { %v3027_v16 = vpop.xlane.xlu1 %3026  ;;  %v3202_v17 = vmul.f32 %v6838_v14, %v3179_v39 }
 0xa40   :  { %4287 = vmatmul.mubr.msk.f32.gmra.mxu0 %vm290_vm0, %v3219_v54 }
 0xa41   :  { %3386 = vmatprep.mubr.f32.mxu0 %v5345_v42  ;;  %v3225_v59 = vadd.f32 %v6845_v5, %v3202_v17  ;;  %v3772_v17 = vld [vmem:[%s7471_s17 + $0x68] sm:$0xff] }
 0xa43   :  { %v3024_v43 = vpop.xlane.xlu1 %3023 }
 0xa44   :  { %v3046_v51 = vadd.f32 %v3045_v27, %v3024_v43  ;;  %4288 = vmatmul.mubr.msk.f32.gmra.mxu0 %vm290_vm0, %v3220_v34 }
 0xa45   :  { %3392 = vmatprep.mubr.f32.mxu0 %v5345_v42 }
 0xa46   :  { %v3047_v4 = vadd.f32 %v3046_v51, %v3027_v16 }
 0xa47   :  { %v3117_v32 = vpop.xlane.xlu1 %3116 }
 0xa48   :  { %v3048_v61 = vrot.slane %v3047_v4, 4  ;;  %v3137_v31 = vadd.f32 %v3136_v62, %v3117_v32  ;;  %4289 = vmatmul.mubr.msk.f32.gmra.mxu0 %vm290_vm0, %v3221_v60 }
 0xa49   :  { %3398 = vmatprep.mubr.f32.mxu0 %v5345_v42 }
 0xa4a   :  { %v3049_v38 = vadd.f32 %v3048_v61, %v3047_v4  ;;  %v3138_v53 = vrot.slane %v3137_v31, 4 }
 0xa4c   :  { %v3050_v9 = vrot.slane %v3049_v38, 2  ;;  %v3139_v48 = vadd.f32 %v3138_v53, %v3137_v31  ;;  %4290 = vmatmul.mubr.msk.f32.gmra.mxu0 %vm290_vm0, %v3222_v18 }
 0xa4d   :  { %3404 = vmatprep.mubr.f32.mxu0 %v5345_v42 }
 0xa4e   :  { %v3051_v30 = vadd.f32 %v3050_v9, %v3049_v38  ;;  %v3140_v46 = vrot.slane %v3139_v48, 2 }
 0xa50   :  { %v3052_v58 = vrot.slane %v3051_v30, 1  ;;  %v3141_v47 = vadd.f32 %v3140_v46, %v3139_v48  ;;  %4291 = vmatmul.mubr.msk.f32.gmra.mxu0 %vm290_vm0, %v3223_v19 }
 0xa51   :  { %3410 = vmatprep.mubr.f32.mxu0 %v5345_v42 }
 0xa52   :  { %v3053_v23 = vadd.f32 %v3052_v58, %v3051_v30  ;;  %v3142_v8 = vrot.slane %v3141_v47, 1 }
 0xa54   :  { %v3145_v50 = vmul.f32 0.00024414063, %v3053_v23  ;;  %v3143_v40 = vadd.f32 %v3142_v8, %v3141_v47  ;;  %4292 = vmatmul.mubr.msk.f32.gmra.mxu0 %vm290_vm0, %v3224_v44  ;;  %v3789_v23 = vld [vmem:[%s7471_s17 + $0xf0] sm:$0xff]  ;;  %v3788_v44 = vld [vmem:[%s7471_s17 + $0xe8] sm:$0xff] }
 0xa55   :  { %3416 = vmatprep.mubr.f32.mxu0 %v5345_v42  ;;  %v3773_v8 = vld [vmem:[%s7471_s17 + $0x70] sm:$0xff] }
 0xa56   :  { %v3149_v54 = vmul.f32 %v3145_v50, %v3145_v50  ;;  %v3147_v37 = vmul.f32 0.00024414063, %v3143_v40  ;;  %v3160_v6 = vsub.f32 %v6734_v21, %v3145_v50  ;;  %v3161_v27 = vsub.f32 %v6729_v12, %v3145_v50  ;;  %v3786_v40 = vld [vmem:[%s7471_s17 + $0xd8] sm:$0xff] }
 0xa57   :  { %v3163_v34 = vsub.f32 %v6748_v33, %v3145_v50  ;;  %v3164_v36 = vsub.f32 %v6678_v10, %v3145_v50  ;;  %v3165_v43 = vsub.f32 %v6672_v15, %v3145_v50  ;;  %v3166_v2 = vsub.f32 %v6697_v26, %v3145_v50 }
 0xa58   :  { %v3151_v16 = vsub.f32 %v3147_v37, %v3149_v54  ;;  %4293 = vmatmul.mubr.msk.f32.gmra.mxu0 %vm290_vm0, %v3225_v59  ;;  %v3167_v51 = vsub.f32 %v6686_v22, %v3145_v50  ;;  %v3162_v61 = vsub.f32 %v6754_v3, %v3145_v50  ;;  %v3787_v50 = vld [vmem:[%s7471_s17 + $0xe0] sm:$0xff]  ;;  %v3770_v54 = vld [vmem:[%s7471_s17 + $0x58] sm:$0xff]  ;;  %v3785_v37 = vld [vmem:[%s7471_s17 + $0xd0] sm:$0xff] }
 0xa59   :  { %3422 = vmatprep.mubr.f32.mxu0 %v5345_v42  ;;  %v3769_v59 = vld [vmem:[%s7471_s17 + $0x50] sm:$0xff] }
 0xa5a   :  { %v3169_v25 = vadd.f32 1e-05, %v3151_v16  ;;  %v3784_v16 = vld [vmem:[%s7471_s17 + $0xc8] sm:$0xff] }
 0xa5c   :  { %5160 = vrsqrt.f32 %v3169_v25  ;;  %v3768_v25 = vld [vmem:[%s7471_s17 + $0x48] sm:$0xff] }
 0xa69   :  { %v5161_v28 = vpop.eup %5160 }
 0xa6a   :  { %v3180_v57 = vmul.f32 %v5161_v28, %v3160_v6  ;;  %v3181_v20 = vmul.f32 %v5161_v28, %v3161_v27  ;;  %v3183_v4 = vmul.f32 %v5161_v28, %v3163_v34  ;;  %v3184_v62 = vmul.f32 %v5161_v28, %v3164_v36  ;;  %v3783_v6 = vld [vmem:[%s7471_s17 + $0xc0] sm:$0xff]  ;;  %v3782_v34 = vld [vmem:[%s7471_s17 + $0xb8] sm:$0xff]  ;;  %v3781_v36 = vld [vmem:[%s7471_s17 + $0xb0] sm:$0xff] }
 0xa6b   :  { %v3185_v60 = vmul.f32 %v5161_v28, %v3165_v43  ;;  %v3186_v35 = vmul.f32 %v5161_v28, %v3166_v2  ;;  %v3187_v32 = vmul.f32 %v5161_v28, %v3167_v51  ;;  %v3182_v48 = vmul.f32 %v5161_v28, %v3162_v61  ;;  %v3767_v27 = vld [vmem:[%s7471_s17 + $0x40] sm:$0xff]  ;;  %v3766_v28 = vld [vmem:[%s7471_s17 + $0x38] sm:$0xff]  ;;  %v3765_v43 = vld [vmem:[%s7471_s17 + $0x30] sm:$0xff] }
 0xa6c   :  { %v3203_v13 = vmul.f32 %v6838_v14, %v3180_v57  ;;  %v3206_v31 = vmul.f32 %v6838_v14, %v3183_v4  ;;  %v3207_v11 = vmul.f32 %v6838_v14, %v3184_v62  ;;  %v3204_v9 = vmul.f32 %v6838_v14, %v3181_v20  ;;  %v3780_v2 = vld [vmem:[%s7471_s17 + $0xa8] sm:$0xff]  ;;  %v3779_v57 = vld [vmem:[%s7471_s17 + $0xa0] sm:$0xff]  ;;  %v3778_v4 = vld [vmem:[%s7471_s17 + $0x98] sm:$0xff] }
 0xa6d   :  { %v3208_v38 = vmul.f32 %v6838_v14, %v3185_v60  ;;  %v3209_v53 = vmul.f32 %v6838_v14, %v3186_v35  ;;  %v3210_v18 = vmul.f32 %v6838_v14, %v3187_v32  ;;  %v3205_v58 = vmul.f32 %v6838_v14, %v3182_v48  ;;  %v3790_v14 = vld [vmem:[%s7471_s17 + $0xf8] sm:$0xff]  ;;  %v3764_v51 = vld [vmem:[%s7471_s17 + $0x28] sm:$0xff]  ;;  %v3763_v20 = vld [vmem:[%s7471_s17 + $0x20] sm:$0xff] }
 0xa6e   :  { %v3226_v56 = vadd.f32 %v6845_v5, %v3203_v13  ;;  %v3229_v63 = vadd.f32 %v6845_v5, %v3206_v31  ;;  %v3230_v41 = vadd.f32 %v6845_v5, %v3207_v11  ;;  %v3227_v39 = vadd.f32 %v6845_v5, %v3204_v9  ;;  %4543 = vmatprep.subr.mxu1 %v3790_v14  ;;  %v3762_v62 = vld [vmem:[%s7471_s17 + $0x18] sm:$0xff]  ;;  %v3777_v60 = vld [vmem:[%s7471_s17 + $0x90] sm:$0xff]  ;;  %v3776_v32 = vld [vmem:[%s7471_s17 + $0x88] sm:$0xff] }
 0xa6f   :  { %v3231_v30 = vadd.f32 %v6845_v5, %v3208_v38  ;;  %v3232_v46 = vadd.f32 %v6845_v5, %v3209_v53  ;;  %v3233_v19 = vadd.f32 %v6845_v5, %v3210_v18  ;;  %v3228_v47 = vadd.f32 %v6845_v5, %v3205_v58  ;;  %v3774_v5 = vld [vmem:[%s7471_s17 + $0x78] sm:$0xff]  ;;  %v3761_v35 = vld [vmem:[%s7471_s17 + $0x10] sm:$0xff]  ;;  %v3760_v13 = vld [vmem:[%s7471_s17 + $0x8] sm:$0xff] }
 0xa70   :  { %4294 = vmatmul.mubr.msk.f32.gmra.mxu0 %vm290_vm0, %v3226_v56  ;;  %4544 = vmatpush3.msra.mxu1 %v3774_v5  ;;  %v3775_v61 = vld [vmem:[%s7471_s17 + $0x80] sm:$0xff]  ;;  %v3258_v38 = vsub.s32 1, %v6114_v29  ;;  %v7528_v53 = vld [vmem:[#allocation28_spill] sm:$0xff] }
 0xa71   :  { %3428 = vmatprep.mubr.f32.mxu0 %v5345_v42  ;;  %4545 = vmatprep.subr.mxu1 %v3789_v23  ;;  %v3759_v31 = vld [vmem:[%s7471_s17] sm:$0xff] }
 0xa72   :  { %4546 = vmatpush3.msra.mxu1 %v3773_v8  ;;  %v3250_v11 = vld [vmem:[%s7470_s16] sm:$0x3] }
 0xa73   :  { %4547 = vmatprep.subr.mxu1 %v3788_v44  ;;  %v7037_v18 = vrot.slane %v3250_v11, %v7528_v53  ;;  %v7039_v56 = vrot.slane %v3250_v11, %v3258_v38 }
 0xa74   :  { %4295 = vmatmul.mubr.msk.f32.gmra.mxu0 %vm290_vm0, %v3227_v39  ;;  %4548 = vmatpush3.msra.mxu1 %v3772_v17 }
 0xa75   :  { %3434 = vmatprep.mubr.f32.mxu0 %v5345_v42  ;;  %4549 = vmatprep.subr.mxu1 %v3787_v50 }
 0xa78   :  { %4296 = vmatmul.mubr.msk.f32.gmra.mxu0 %vm290_vm0, %v3228_v47 }
 0xa79   :  { %3440 = vmatprep.mubr.f32.mxu0 %v5345_v42 }
 0xa7c   :  { %4297 = vmatmul.mubr.msk.f32.gmra.mxu0 %vm290_vm0, %v3229_v63 }
 0xa7d   :  { %3446 = vmatprep.mubr.f32.mxu0 %v5345_v42 }
 0xa80   :  { %4298 = vmatmul.mubr.msk.f32.gmra.mxu0 %vm290_vm0, %v3230_v41 }
 0xa81   :  { %3452 = vmatprep.mubr.f32.mxu0 %v5345_v42 }
 0xa84   :  { %4299 = vmatmul.mubr.msk.f32.gmra.mxu0 %vm290_vm0, %v3231_v30 }
 0xa85   :  { %3458 = vmatprep.mubr.f32.mxu0 %v5345_v42 }
 0xa88   :  { %4300 = vmatmul.mubr.msk.f32.gmra.mxu0 %vm290_vm0, %v3232_v46 }
 0xa89   :  { %3464 = vmatprep.mubr.f32.mxu0 %v5345_v42  ;;  %v3771_v42 = vld [vmem:[%s7471_s17 + $0x60] sm:$0xff] }
 0xa8a   :  { %4550 = vmatpush3.msra.mxu1 %v3771_v42 }
 0xa8b   :  { %4551 = vmatprep.subr.mxu1 %v3786_v40 }
 0xa8c   :  { %4301 = vmatmul.mubr.msk.f32.gmra.mxu0 %vm290_vm0, %v3233_v19  ;;  %4552 = vmatpush3.msra.mxu1 %v3770_v54 }
 0xa8d   :  { %4553 = vmatprep.subr.mxu1 %v3785_v37 }
 0xa8e   :  { %4554 = vmatpush3.msra.mxu1 %v3769_v59 }
 0xa8f   :  { %4555 = vmatprep.subr.mxu1 %v3784_v16 }
 0xa90   :  { %4556 = vmatpush3.msra.mxu1 %v3768_v25 }
 0xa91   :  { %4557 = vmatprep.subr.mxu1 %v3783_v6 }
 0xa92   :  { %4558 = vmatpush3.msra.mxu1 %v3767_v27 }
 0xa93   :  { %4559 = vmatprep.subr.mxu1 %v3782_v34 }
 0xa94   :  { %4560 = vmatpush3.msra.mxu1 %v3766_v28 }
 0xa95   :  { %4561 = vmatprep.subr.mxu1 %v3781_v36 }
 0xa96   :  { %4562 = vmatpush3.msra.mxu1 %v3765_v43 }
 0xa97   :  { %4563 = vmatprep.subr.mxu1 %v3780_v2 }
 0xa98   :  { %4564 = vmatpush3.msra.mxu1 %v3764_v51 }
 0xa99   :  { %4565 = vmatprep.subr.mxu1 %v3779_v57 }
 0xa9a   :  { %4566 = vmatpush3.msra.mxu1 %v3763_v20 }
 0xa9b   :  { %4567 = vmatprep.subr.mxu1 %v3778_v4 }
 0xa9c   :  { %4568 = vmatpush3.msra.mxu1 %v3762_v62 }
 0xa9d   :  { %4569 = vmatprep.subr.mxu1 %v3777_v60 }
 0xa9e   :  { %4570 = vmatpush3.msra.mxu1 %v3761_v35 }
 0xa9f   :  { %4571 = vmatprep.subr.mxu1 %v3776_v32 }
 0xaa0   :  { %4572 = vmatpush3.msra.mxu1 %v3760_v13 }
 0xaa1   :  { %4573 = vmatprep.subr.mxu1 %v3775_v61 }
 0xaa2   :  { %4574 = vmatpush3.msra.mxu1 %v3759_v31 }
 0xafc   :  { %v3376_v9 = vpop.f32.mrf.mxu0 }
 0xafd   :  { %v7042_v48 = vadd.f32 %v3376_v9, %v7037_v18 }
 0xafe   :  { %v3378_v63 = vpop.f32.mrf.mxu0 }
 0xaff   :  { %v3471_v41 = vmul.f32 %v7042_v48, %v7042_v48  ;;  %v7047_v30 = vadd.f32 %v3378_v63, %v7039_v56 }
 0xb00   :  { %v3382_v46 = vpop.f32.mrf.mxu0 }
 0xb01   :  { %v3503_v19 = vmul.f32 %v3471_v41, %v7042_v48  ;;  %v3472_v29 = vmul.f32 %v7047_v30, %v7047_v30  ;;  %v7053_v39 = vadd.f32 %v3382_v46, %v7037_v18 }
 0xb02   :  { %v3384_v58 = vpop.f32.mrf.mxu0 }
 0xb03   :  { %v3535_v47 = vmul.f32 0.044715, %v3503_v19  ;;  %v3504_v14 = vmul.f32 %v3472_v29, %v7047_v30  ;;  %v3473_v5 = vmul.f32 %v7053_v39, %v7053_v39  ;;  %v7059_v23 = vadd.f32 %v3384_v58, %v7039_v56 }
 0xb04   :  { %v3388_v8 = vpop.f32.mrf.mxu0 }
 0xb05   :  { %v3567_v44 = vadd.f32 %v3535_v47, %v7042_v48  ;;  %v3536_v17 = vmul.f32 0.044715, %v3504_v14  ;;  %v3505_v50 = vmul.f32 %v3473_v5, %v7053_v39  ;;  %v3474_v42 = vmul.f32 %v7059_v23, %v7059_v23 }
 0xb06   :  { %v7066_v40 = vadd.f32 %v3388_v8, %v7037_v18  ;;  %v3390_v54 = vpop.f32.mrf.mxu0 }
 0xb07   :  { %v3599_v37 = vmul.f32 0.7978846, %v3567_v44  ;;  %v3568_v59 = vadd.f32 %v3536_v17, %v7047_v30  ;;  %v3537_v16 = vmul.f32 0.044715, %v3505_v50  ;;  %v3506_v25 = vmul.f32 %v3474_v42, %v7059_v23 }
 0xb08   :  { %v3475_v6 = vmul.f32 %v7066_v40, %v7066_v40  ;;  %v7073_v27 = vadd.f32 %v3390_v54, %v7039_v56  ;;  %v3394_v34 = vpop.f32.mrf.mxu0 }
 0xb09   :  { %5162 = vtanh.f32 %v3599_v37  ;;  %v3600_v28 = vmul.f32 0.7978846, %v3568_v59  ;;  %v3569_v36 = vadd.f32 %v3537_v16, %v7053_v39  ;;  %v3538_v43 = vmul.f32 0.044715, %v3506_v25 }
 0xb0a   :  { %v3507_v2 = vmul.f32 %v3475_v6, %v7066_v40  ;;  %v3476_v51 = vmul.f32 %v7073_v27, %v7073_v27  ;;  %v7080_v57 = vadd.f32 %v3394_v34, %v7037_v18  ;;  %v3396_v20 = vpop.f32.mrf.mxu0 }
 0xb0b   :  { %v3570_v4 = vadd.f32 %v3538_v43, %v7059_v23  ;;  %v7084_v62 = vadd.f32 %v3396_v20, %v7039_v56  ;;  %v3601_v60 = vmul.f32 0.7978846, %v3569_v36  ;;  %5164 = vtanh.f32 %v3600_v28 }
 0xb0c   :  { %v3539_v35 = vmul.f32 0.044715, %v3507_v2  ;;  %v3508_v32 = vmul.f32 %v3476_v51, %v7073_v27  ;;  %v3477_v13 = vmul.f32 %v7080_v57, %v7080_v57  ;;  %v3400_v61 = vpop.f32.mrf.mxu0 }
 0xb0d   :  { %v3602_v31 = vmul.f32 0.7978846, %v3570_v4  ;;  %v3478_v11 = vmul.f32 %v7084_v62, %v7084_v62  ;;  %v7092_v38 = vadd.f32 %v3400_v61, %v7037_v18 }
 0xb0e   :  { %v3571_v53 = vadd.f32 %v3539_v35, %v7066_v40  ;;  %v3540_v9 = vmul.f32 0.044715, %v3508_v32  ;;  %v3509_v63 = vmul.f32 %v3477_v13, %v7080_v57  ;;  %v3402_v41 = vpop.f32.mrf.mxu0 }
 0xb0f   :  { %5166 = vtanh.f32 %v3602_v31  ;;  %v3510_v46 = vmul.f32 %v3478_v11, %v7084_v62  ;;  %v3479_v19 = vmul.f32 %v7092_v38, %v7092_v38  ;;  %v7100_v29 = vadd.f32 %v3402_v41, %v7039_v56 }
 0xb10   :  { %5168 = vtanh.f32 %v3601_v60  ;;  %v3603_v58 = vmul.f32 0.7978846, %v3571_v53  ;;  %v3572_v47 = vadd.f32 %v3540_v9, %v7073_v27  ;;  %v3541_v14 = vmul.f32 0.044715, %v3509_v63  ;;  %v3406_v5 = vpop.f32.mrf.mxu0 }
 0xb11   :  { %v3542_v8 = vmul.f32 0.044715, %v3510_v46  ;;  %v3511_v44 = vmul.f32 %v3479_v19, %v7092_v38  ;;  %v3480_v17 = vmul.f32 %v7100_v29, %v7100_v29  ;;  %v7107_v50 = vadd.f32 %v3406_v5, %v7037_v18 }
 0xb12   :  { %5170 = vtanh.f32 %v3603_v58  ;;  %v3604_v42 = vmul.f32 0.7978846, %v3572_v47  ;;  %v3573_v54 = vadd.f32 %v3541_v14, %v7080_v57  ;;  %v3408_v37 = vpop.f32.mrf.mxu0 }
 0xb13   :  { %v3574_v59 = vadd.f32 %v3542_v8, %v7084_v62  ;;  %v3543_v16 = vmul.f32 0.044715, %v3511_v44  ;;  %v3512_v25 = vmul.f32 %v3480_v17, %v7100_v29  ;;  %v3481_v6 = vmul.f32 %v7107_v50, %v7107_v50 }
 0xb14   :  { %5172 = vtanh.f32 %v3604_v42  ;;  %v3605_v34 = vmul.f32 0.7978846, %v3573_v54  ;;  %v7115_v28 = vadd.f32 %v3408_v37, %v7039_v56  ;;  %v3412_v36 = vpop.f32.mrf.mxu0 }
 0xb15   :  { %v3606_v43 = vmul.f32 0.7978846, %v3574_v59  ;;  %v3575_v2 = vadd.f32 %v3543_v16, %v7092_v38  ;;  %v3544_v51 = vmul.f32 0.044715, %v3512_v25  ;;  %v3513_v20 = vmul.f32 %v3481_v6, %v7107_v50 }
 0xb16   :  { %v5163_v4 = vpop.eup %5162  ;;  %5174 = vtanh.f32 %v3605_v34  ;;  %v3482_v60 = vmul.f32 %v7115_v28, %v7115_v28  ;;  %v7122_v35 = vadd.f32 %v3412_v36, %v7037_v18  ;;  %v3414_v32 = vpop.f32.mrf.mxu0 }
 0xb17   :  { %v3663_v13 = vadd.f32 1.0, %v5163_v4  ;;  %5176 = vtanh.f32 %v3606_v43  ;;  %v3607_v61 = vmul.f32 0.7978846, %v3575_v2  ;;  %v3576_v31 = vadd.f32 %v3544_v51, %v7100_v29 }
 0xb18   :  { %v3545_v11 = vmul.f32 0.044715, %v3513_v20  ;;  %v3514_v53 = vmul.f32 %v3482_v60, %v7115_v28  ;;  %v3483_v9 = vmul.f32 %v7122_v35, %v7122_v35  ;;  %v7129_v63 = vadd.f32 %v3414_v32, %v7039_v56  ;;  %v3418_v41 = vpop.f32.mrf.mxu0  ;;  %v5165_v47 = vpop.eup %5164 }
 0xb19   :  { %v3695_v46 = vmul.f32 0.5, %v3663_v13  ;;  %5178 = vtanh.f32 %v3607_v61  ;;  %v3608_v19 = vmul.f32 0.7978846, %v3576_v31  ;;  %v7132_v58 = vadd.f32 %v3418_v41, %v7037_v18 }
 0xb1a   :  { %v3577_v14 = vadd.f32 %v3545_v11, %v7107_v50  ;;  %v3546_v5 = vmul.f32 0.044715, %v3514_v53  ;;  %v3515_v8 = vmul.f32 %v3483_v9, %v7122_v35  ;;  %v3484_v44 = vmul.f32 %v7129_v63, %v7129_v63  ;;  %v3420_v17 = vpop.f32.mrf.mxu0 }
 0xb1b   :  { %v3727_v42 = vmul.f32 %v3695_v46, %v7042_v48  ;;  %5180 = vtanh.f32 %v3608_v19  ;;  %v3485_v54 = vmul.f32 %v7132_v58, %v7132_v58  ;;  %v7142_v37 = vadd.f32 %v3420_v17, %v7039_v56 }
 0xb1c   :  { %v5167_v59 = vpop.eup %5166  ;;  %v3609_v16 = vmul.f32 0.7978846, %v3577_v14  ;;  %v3578_v25 = vadd.f32 %v3546_v5, %v7115_v28  ;;  %v3547_v6 = vmul.f32 0.044715, %v3515_v8  ;;  %v3516_v34 = vmul.f32 %v3484_v44, %v7129_v63 }
 0xb1d   :  { %v5169_v36 = vpop.eup %5168  ;;  %v3517_v43 = vmul.f32 %v3485_v54, %v7132_v58  ;;  %v3486_v48 = vmul.f32 %v7142_v37, %v7142_v37  ;;  %v3664_v2 = vadd.f32 1.0, %v5165_v47  ;;  %v3666_v51 = vadd.f32 1.0, %v5167_v59 }
 0xb1e   :  { %5182 = vtanh.f32 %v3609_v16  ;;  %v3610_v20 = vmul.f32 0.7978846, %v3578_v25  ;;  %v3579_v4 = vadd.f32 %v3547_v6, %v7122_v35  ;;  %v3548_v60 = vmul.f32 0.044715, %v3516_v34 }
 0xb1f   :  { %v5171_v32 = vpop.eup %5170  ;;  %v3549_v13 = vmul.f32 0.044715, %v3517_v43  ;;  %v3518_v61 = vmul.f32 %v3486_v48, %v7142_v37  ;;  %v3696_v31 = vmul.f32 0.5, %v3664_v2  ;;  %v3698_v11 = vmul.f32 0.5, %v3666_v51 }
 0xb20   :  { %5184 = vtanh.f32 %v3610_v20  ;;  %v3611_v53 = vmul.f32 0.7978846, %v3579_v4  ;;  %v3580_v9 = vadd.f32 %v3548_v60, %v7129_v63  ;;  %v3665_v41 = vadd.f32 1.0, %v5169_v36 }
 0xb21   :  { %v5173_v46 = vpop.eup %5172  ;;  %v3581_v19 = vadd.f32 %v3549_v13, %v7132_v58  ;;  %v3550_v47 = vmul.f32 0.044715, %v3518_v61  ;;  %v3728_v14 = vmul.f32 %v3696_v31, %v7047_v30  ;;  %v3730_v5 = vmul.f32 %v3698_v11, %v7059_v23 }
 0xb22   :  { %5186 = vtanh.f32 %v3611_v53  ;;  %v3612_v8 = vmul.f32 0.7978846, %v3580_v9  ;;  %v3697_v44 = vmul.f32 0.5, %v3665_v41  ;;  %v3668_v17 = vadd.f32 1.0, %v5173_v46 }
 0xb23   :  { %v5175_v54 = vpop.eup %5174  ;;  %v3613_v59 = vmul.f32 0.7978846, %v3581_v19  ;;  %v3582_v16 = vadd.f32 %v3550_v47, %v7142_v37  ;;  %3862 = vmatprep.mubr.f32.mxu1 %v3728_v14  ;;  %v3667_v25 = vadd.f32 1.0, %v5171_v32 }
 0xb24   :  { %v5177_v6 = vpop.eup %5176  ;;  %5188 = vtanh.f32 %v3612_v8  ;;  %3863 = vmatmul.mubr.f32.vlgmr.msra.gmra.mxu1 %v3727_v42  ;;  %v3700_v34 = vmul.f32 0.5, %v3668_v17  ;;  %v3729_v30 = vmul.f32 %v3697_v44, %v7053_v39  ;;  %v3669_v51 = vadd.f32 1.0, %v5175_v54 }
 0xb25   :  { %v3614_v36 = vmul.f32 0.7978846, %v3582_v16  ;;  %3867 = vmatprep.mubr.f32.mxu1 %v3730_v5  ;;  %v3670_v43 = vadd.f32 1.0, %v5177_v6  ;;  %5190 = vtanh.f32 %v3613_v59  ;;  %v3699_v2 = vmul.f32 0.5, %v3667_v25 }
 0xb26   :  { %v5179_v23 = vpop.eup %5178  ;;  %v3732_v48 = vmul.f32 %v3700_v34, %v7073_v27  ;;  %v3701_v61 = vmul.f32 0.5, %v3669_v51 }
 0xb27   :  { %5192 = vtanh.f32 %v3614_v36  ;;  %v3702_v20 = vmul.f32 0.5, %v3670_v43  ;;  %v3671_v32 = vadd.f32 1.0, %v5179_v23  ;;  %v3731_v13 = vmul.f32 %v3699_v2, %v7066_v40 }
 0xb28   :  { %v5181_v4 = vpop.eup %5180  ;;  %3868 = vmatmul.mubr.f32.gmra.mxu1 %v3729_v30  ;;  %v3733_v9 = vmul.f32 %v3701_v61, %v7080_v57 }
 0xb29   :  { %3872 = vmatprep.mubr.f32.mxu1 %v3732_v48  ;;  %v3734_v60 = vmul.f32 %v3702_v20, %v7084_v62  ;;  %v3672_v42 = vadd.f32 1.0, %v5181_v4  ;;  %v3703_v53 = vmul.f32 0.5, %v3671_v32 }
 0xb2b   :  { %v5183_v39 = vpop.eup %5182  ;;  %v3704_v31 = vmul.f32 0.5, %v3672_v42  ;;  %v3735_v5 = vmul.f32 %v3703_v53, %v7092_v38 }
 0xb2c   :  { %3873 = vmatmul.mubr.f32.gmra.mxu1 %v3731_v13  ;;  %v3673_v46 = vadd.f32 1.0, %v5183_v39 }
 0xb2d   :  { %v5185_v11 = vpop.eup %5184  ;;  %3877 = vmatprep.mubr.f32.mxu1 %v3734_v60  ;;  %v3736_v27 = vmul.f32 %v3704_v31, %v7100_v29 }
 0xb2e   :  { %v3674_v41 = vadd.f32 1.0, %v5185_v11  ;;  %v3705_v29 = vmul.f32 0.5, %v3673_v46 }
 0xb2f   :  { %v5187_v19 = vpop.eup %5186 }
 0xb30   :  { %3878 = vmatmul.mubr.f32.gmra.mxu1 %v3733_v9  ;;  %v3424_v62 = vpop.f32.mrf.mxu0  ;;  %v3706_v47 = vmul.f32 0.5, %v3674_v41  ;;  %v3675_v54 = vadd.f32 1.0, %v5187_v19  ;;  %v3737_v43 = vmul.f32 %v3705_v29, %v7107_v50 }
 0xb31   :  { %v5189_v14 = vpop.eup %5188  ;;  %3882 = vmatprep.mubr.f32.mxu1 %v3736_v27  ;;  %v7163_v40 = vadd.f32 %v3424_v62, %v7037_v18 }
 0xb32   :  { %v3426_v8 = vpop.f32.mrf.mxu0  ;;  %v3738_v44 = vmul.f32 %v3706_v47, %v7115_v28  ;;  %v3676_v17 = vadd.f32 1.0, %v5189_v14  ;;  %v5191_v57 = vpop.eup %5190  ;;  %v3707_v2 = vmul.f32 0.5, %v3675_v54 }
 0xb33   :  { %v3487_v59 = vmul.f32 %v7163_v40, %v7163_v40  ;;  %v7170_v16 = vadd.f32 %v3426_v8, %v7039_v56  ;;  %v3677_v51 = vadd.f32 1.0, %v5191_v57 }
 0xb34   :  { %v5193_v25 = vpop.eup %5192  ;;  %3883 = vmatmul.mubr.f32.gmra.mxu1 %v3735_v5  ;;  %v3430_v6 = vpop.f32.mrf.mxu0  ;;  %v3708_v34 = vmul.f32 0.5, %v3676_v17  ;;  %v3739_v11 = vmul.f32 %v3707_v2, %v7122_v35 }
 0xb35   :  { %v3519_v36 = vmul.f32 %v3487_v59, %v7163_v40  ;;  %v3488_v38 = vmul.f32 %v7170_v16, %v7170_v16  ;;  %3887 = vmatprep.mubr.f32.mxu1 %v3738_v44  ;;  %v7176_v28 = vadd.f32 %v3430_v6, %v7037_v18  ;;  %v3678_v30 = vadd.f32 1.0, %v5193_v25 }
 0xb36   :  { %v3432_v23 = vpop.f32.mrf.mxu0  ;;  %v3740_v48 = vmul.f32 %v3708_v34, %v7129_v63  ;;  %v3709_v9 = vmul.f32 0.5, %v3677_v51 }
 0xb37   :  { %v3551_v20 = vmul.f32 0.044715, %v3519_v36  ;;  %v3520_v4 = vmul.f32 %v3488_v38, %v7170_v16  ;;  %v3489_v60 = vmul.f32 %v7176_v28, %v7176_v28  ;;  %v7184_v42 = vadd.f32 %v3432_v23, %v7039_v56 }
 0xb38   :  { %3888 = vmatmul.mubr.f32.gmra.mxu1 %v3737_v43  ;;  %v3436_v32 = vpop.f32.mrf.mxu0  ;;  %v3710_v13 = vmul.f32 0.5, %v3678_v30  ;;  %v3741_v54 = vmul.f32 %v3709_v9, %v7132_v58 }
 0xb39   :  { %v3583_v61 = vadd.f32 %v3551_v20, %v7163_v40  ;;  %v3552_v50 = vmul.f32 0.044715, %v3520_v4  ;;  %v3521_v39 = vmul.f32 %v3489_v60, %v7176_v28  ;;  %v3490_v63 = vmul.f32 %v7184_v42, %v7184_v42  ;;  %3892 = vmatprep.mubr.f32.mxu1 %v3740_v48 }
 0xb3a   :  { %v7191_v31 = vadd.f32 %v3436_v32, %v7037_v18  ;;  %v3438_v27 = vpop.f32.mrf.mxu0  ;;  %v3742_v53 = vmul.f32 %v3710_v13, %v7142_v37 }
 0xb3b   :  { %v3615_v41 = vmul.f32 0.7978846, %v3583_v61  ;;  %v3584_v46 = vadd.f32 %v3552_v50, %v7170_v16  ;;  %v3553_v19 = vmul.f32 0.044715, %v3521_v39  ;;  %v3522_v62 = vmul.f32 %v3490_v63, %v7184_v42 }
 0xb3c   :  { %v3491_v47 = vmul.f32 %v7191_v31, %v7191_v31  ;;  %3893 = vmatmul.mubr.f32.gmra.mxu1 %v3739_v11  ;;  %v7200_v14 = vadd.f32 %v3438_v27, %v7039_v56  ;;  %v3442_v5 = vpop.f32.mrf.mxu0 }
 0xb3d   :  { %5194 = vtanh.f32 %v3615_v41  ;;  %v3616_v35 = vmul.f32 0.7978846, %v3584_v46  ;;  %v3585_v8 = vadd.f32 %v3553_v19, %v7176_v28  ;;  %v3554_v37 = vmul.f32 0.044715, %v3522_v62  ;;  %3897 = vmatprep.mubr.f32.mxu1 %v3742_v53 }
 0xb3e   :  { %v3523_v44 = vmul.f32 %v3491_v47, %v7191_v31  ;;  %v3492_v29 = vmul.f32 %v7200_v14, %v7200_v14  ;;  %v7207_v17 = vadd.f32 %v3442_v5, %v7037_v18  ;;  %v3444_v57 = vpop.f32.mrf.mxu0 }
 0xb3f   :  { %5196 = vtanh.f32 %v3616_v35  ;;  %v3586_v59 = vadd.f32 %v3554_v37, %v7184_v42  ;;  %v7212_v25 = vadd.f32 %v3444_v57, %v7039_v56  ;;  %v3617_v6 = vmul.f32 0.7978846, %v3585_v8 }
 0xb40   :  { %v3555_v34 = vmul.f32 0.044715, %v3523_v44  ;;  %v3524_v36 = vmul.f32 %v3492_v29, %v7200_v14  ;;  %v3493_v38 = vmul.f32 %v7207_v17, %v7207_v17  ;;  %3898 = vmatmul.mubr.f32.gmra.mxu1 %v3741_v54  ;;  %v3448_v30 = vpop.f32.mrf.mxu0 }
 0xb41   :  { %v3618_v43 = vmul.f32 0.7978846, %v3586_v59  ;;  %v3494_v58 = vmul.f32 %v7212_v25, %v7212_v25  ;;  %v7220_v23 = vadd.f32 %v3448_v30, %v7037_v18 }
 0xb42   :  { %v3587_v48 = vadd.f32 %v3555_v34, %v7191_v31  ;;  %v3556_v2 = vmul.f32 0.044715, %v3524_v36  ;;  %v3525_v51 = vmul.f32 %v3493_v38, %v7207_v17  ;;  %v3450_v20 = vpop.f32.mrf.mxu0 }
 0xb43   :  { %5198 = vtanh.f32 %v3618_v43  ;;  %v3526_v4 = vmul.f32 %v3494_v58, %v7212_v25  ;;  %v3495_v60 = vmul.f32 %v7220_v23, %v7220_v23  ;;  %v7228_v32 = vadd.f32 %v3450_v20, %v7039_v56 }
 0xb44   :  { %5200 = vtanh.f32 %v3617_v6  ;;  %v3619_v13 = vmul.f32 0.7978846, %v3587_v48  ;;  %v3588_v61 = vadd.f32 %v3556_v2, %v7200_v14  ;;  %v3557_v50 = vmul.f32 0.044715, %v3525_v51  ;;  %v3454_v39 = vpop.f32.mrf.mxu0 }
 0xb45   :  { %v3558_v63 = vmul.f32 0.044715, %v3526_v4  ;;  %v3527_v11 = vmul.f32 %v3495_v60, %v7220_v23  ;;  %v3496_v27 = vmul.f32 %v7228_v32, %v7228_v32  ;;  %v7235_v53 = vadd.f32 %v3454_v39, %v7037_v18 }
 0xb46   :  { %5202 = vtanh.f32 %v3619_v13  ;;  %v3620_v9 = vmul.f32 0.7978846, %v3588_v61  ;;  %v3589_v41 = vadd.f32 %v3557_v50, %v7207_v17  ;;  %v3456_v46 = vpop.f32.mrf.mxu0 }
 0xb47   :  { %v3590_v19 = vadd.f32 %v3558_v63, %v7212_v25  ;;  %v3559_v62 = vmul.f32 0.044715, %v3527_v11  ;;  %v3528_v47 = vmul.f32 %v3496_v27, %v7228_v32  ;;  %v3497_v5 = vmul.f32 %v7235_v53, %v7235_v53 }
 0xb48   :  { %5204 = vtanh.f32 %v3620_v9  ;;  %v3621_v35 = vmul.f32 0.7978846, %v3589_v41  ;;  %v7243_v8 = vadd.f32 %v3456_v46, %v7039_v56  ;;  %v3460_v37 = vpop.f32.mrf.mxu0 }
 0xb49   :  { %v3622_v44 = vmul.f32 0.7978846, %v3590_v19  ;;  %v3591_v29 = vadd.f32 %v3559_v62, %v7220_v23  ;;  %v3560_v54 = vmul.f32 0.044715, %v3528_v47  ;;  %v3529_v57 = vmul.f32 %v3497_v5, %v7235_v53 }
 0xb4a   :  { %v5195_v59 = vpop.eup %5194  ;;  %5206 = vtanh.f32 %v3621_v35  ;;  %v3498_v6 = vmul.f32 %v7243_v8, %v7243_v8  ;;  %v7250_v34 = vadd.f32 %v3460_v37, %v7037_v18  ;;  %v3462_v36 = vpop.f32.mrf.mxu0 }
 0xb4b   :  { %5208 = vtanh.f32 %v3622_v44  ;;  %v3623_v38 = vmul.f32 0.7978846, %v3591_v29  ;;  %v3592_v30 = vadd.f32 %v3560_v54, %v7228_v32  ;;  %v3561_v43 = vmul.f32 0.044715, %v3529_v57 }
 0xb4c   :  { %v5197_v58 = vpop.eup %5196  ;;  %v3530_v48 = vmul.f32 %v3498_v6, %v7243_v8  ;;  %v3499_v2 = vmul.f32 %v7250_v34, %v7250_v34  ;;  %v7257_v51 = vadd.f32 %v3462_v36, %v7039_v56  ;;  %v3466_v20 = vpop.f32.mrf.mxu0  ;;  %v3679_v4 = vadd.f32 1.0, %v5195_v59 }
 0xb4d   :  { %5210 = vtanh.f32 %v3623_v38  ;;  %v3624_v60 = vmul.f32 0.7978846, %v3592_v30  ;;  %v3593_v13 = vadd.f32 %v3561_v43, %v7235_v53  ;;  %v7261_v61 = vadd.f32 %v3466_v20, %v7037_v18 }
 0xb4e   :  { %v3562_v50 = vmul.f32 0.044715, %v3530_v48  ;;  %v3531_v39 = vmul.f32 %v3499_v2, %v7250_v34  ;;  %v3500_v63 = vmul.f32 %v7257_v51, %v7257_v51  ;;  %v3468_v11 = vpop.f32.mrf.mxu0  ;;  %v3680_v27 = vadd.f32 1.0, %v5197_v58 }
 0xb4f   :  { %5212 = vtanh.f32 %v3624_v60  ;;  %v3625_v9 = vmul.f32 0.7978846, %v3593_v13  ;;  %v3501_v41 = vmul.f32 %v7261_v61, %v7261_v61  ;;  %v7269_v46 = vadd.f32 %v3468_v11, %v7039_v56 }
 0xb50   :  { %v5199_v19 = vpop.eup %5198  ;;  %v3594_v18 = vadd.f32 %v3562_v50, %v7243_v8  ;;  %v3563_v62 = vmul.f32 0.044715, %v3531_v39  ;;  %v3532_v47 = vmul.f32 %v3500_v63, %v7257_v51  ;;  %v3712_v5 = vmul.f32 0.5, %v3680_v27 }
 0xb51   :  { %v5201_v35 = vpop.eup %5200  ;;  %5214 = vtanh.f32 %v3625_v9  ;;  %v3533_v37 = vmul.f32 %v3501_v41, %v7261_v61  ;;  %v3502_v44 = vmul.f32 %v7269_v46, %v7269_v46  ;;  %v3711_v29 = vmul.f32 0.5, %v3679_v4 }
 0xb52   :  { %v3626_v54 = vmul.f32 0.7978846, %v3594_v18  ;;  %v3595_v57 = vadd.f32 %v3563_v62, %v7250_v34  ;;  %v3564_v56 = vmul.f32 0.044715, %v3532_v47  ;;  %v3744_v59 = vmul.f32 %v3712_v5, %v7170_v16 }
 0xb53   :  { %v5203_v6 = vpop.eup %5202  ;;  %v3565_v36 = vmul.f32 0.044715, %v3533_v37  ;;  %v3534_v38 = vmul.f32 %v3502_v44, %v7269_v46  ;;  %v3743_v30 = vmul.f32 %v3711_v29, %v7163_v40  ;;  %v3682_v43 = vadd.f32 1.0, %v5199_v19 }
 0xb54   :  { %5216 = vtanh.f32 %v3626_v54  ;;  %v3627_v58 = vmul.f32 0.7978846, %v3595_v57  ;;  %v3596_v48 = vadd.f32 %v3564_v56, %v7257_v51  ;;  %3902 = vmatprep.mubr.f32.mxu1 %v3744_v59  ;;  %v3681_v2 = vadd.f32 1.0, %v5201_v35 }
 0xb55   :  { %v5205_v20 = vpop.eup %5204  ;;  %v3597_v4 = vadd.f32 %v3565_v36, %v7261_v61  ;;  %v3566_v60 = vmul.f32 0.044715, %v3534_v38  ;;  %3903 = vmatmul.mubr.f32.gmra.mxu1 %v3743_v30  ;;  %v3714_v13 = vmul.f32 0.5, %v3682_v43  ;;  %v3683_v16 = vadd.f32 1.0, %v5203_v6 }
 0xb56   :  { %5218 = vtanh.f32 %v3627_v58  ;;  %v3628_v50 = vmul.f32 0.7978846, %v3596_v48  ;;  %v3713_v39 = vmul.f32 0.5, %v3681_v2  ;;  %v3684_v63 = vadd.f32 1.0, %v5205_v20 }
 0xb57   :  { %v5207_v11 = vpop.eup %5206  ;;  %v3629_v40 = vmul.f32 0.7978846, %v3597_v4  ;;  %v3598_v27 = vadd.f32 %v3566_v60, %v7269_v46  ;;  %v3746_v9 = vmul.f32 %v3714_v13, %v7184_v42  ;;  %v3715_v41 = vmul.f32 0.5, %v3683_v16 }
 0xb58   :  { %v5209_v19 = vpop.eup %5208  ;;  %5220 = vtanh.f32 %v3628_v50  ;;  %v3745_v18 = vmul.f32 %v3713_v39, %v7176_v28  ;;  %v3716_v62 = vmul.f32 0.5, %v3684_v63  ;;  %v3685_v47 = vadd.f32 1.0, %v5207_v11 }
 0xb59   :  { %5222 = vtanh.f32 %v3629_v40  ;;  %v3630_v5 = vmul.f32 0.7978846, %v3598_v27  ;;  %3907 = vmatprep.mubr.f32.mxu1 %v3746_v9  ;;  %v3686_v35 = vadd.f32 1.0, %v5209_v19  ;;  %v3747_v42 = vmul.f32 %v3715_v41, %v7191_v31 }
 0xb5a   :  { %v5211_v37 = vpop.eup %5210  ;;  %3908 = vmatmul.mubr.f32.gmra.mxu1 %v3745_v18  ;;  %v3748_v44 = vmul.f32 %v3716_v62, %v7200_v14  ;;  %v3717_v57 = vmul.f32 0.5, %v3685_v47  ;;  %v7300_v18 = vld [vmem:[%s7472_s18] ss:$0 sm:$0xff]  ;;  %s5346_s18 = smov [#allocation9]  }
 0xb5b   :  { %5224 = vtanh.f32 %v3630_v5  ;;  %v3718_v29 = vmul.f32 0.5, %v3686_v35  ;;  %v3687_v56 = vadd.f32 1.0, %v5211_v37  ;;  %s4124_s10 = sshll.u32 %s5346_s18, 4  ;;  %s4125_s10 = int_to_ptr.vmem [resolvable:$true] %s4124_s10 }
 0xb5c   :  { %v5213_v54 = vpop.eup %5212  ;;  %3912 = vmatprep.mubr.f32.mxu1 %v3748_v44  ;;  %v3749_v38 = vmul.f32 %v3717_v57, %v7207_v17  ;;  %s5310_s23 = scalar_lea.vmem %s4125_s10, 2048  ;;  %p5315_p2 = scmp.lt.s32.totalorder %s4125_s10, %s4125_s10 }
 0xb5d   :  { %v3750_v28 = vmul.f32 %v3718_v29, %v7212_v25  ;;  %v3688_v59 = vadd.f32 1.0, %v5213_v54  ;;  %v3719_v30 = vmul.f32 0.5, %v3687_v56  ;;  %p5311_p1 = scmp.ne.s32.totalorder %s4125_s10, %s5310_s23  ;;  %p5316_p3 = scmp.lt.s32.totalorder %s5310_s23, %s5310_s23 }
 0xb5e   :  { %v5215_v6 = vpop.eup %5214  ;;  %3913 = vmatmul.mubr.f32.gmra.mxu1 %v3747_v42 }
 0xb5f   :  { %3917 = vmatprep.mubr.f32.mxu1 %v3750_v28  ;;  %v3720_v36 = vmul.f32 0.5, %v3688_v59  ;;  %v3689_v43 = vadd.f32 1.0, %v5215_v6  ;;  %v3751_v31 = vmul.f32 %v3719_v30, %v7220_v23  ;;  %p5317_p4 = por %p5316_p3, %p5315_p2 }
 0xb61   :  { %v5217_v14 = vpop.eup %5216  ;;  %v3752_v58 = vmul.f32 %v3720_v36, %v7228_v32  ;;  %v3721_v25 = vmul.f32 0.5, %v3689_v43  ;;  %p5318_p5 = pnand %p5317_p4, %p5311_p1 }
 0xb62   :  { %3918 = vmatmul.mubr.f32.gmra.mxu1 %v3749_v38  ;;  %v3690_v48 = vadd.f32 1.0, %v5217_v14 }
 0xb63   :  { %v5219_v2 = vpop.eup %5218  ;;  %3922 = vmatprep.mubr.f32.mxu1 %v3752_v58  ;;  %v3753_v39 = vmul.f32 %v3721_v25, %v7235_v53 }
 0xb64   :  { %v3722_v20 = vmul.f32 0.5, %v3690_v48  ;;  %v3691_v4 = vadd.f32 1.0, %v5219_v2 }
 0xb65   :  { %v5221_v60 = vpop.eup %5220 }
 0xb66   :  { %v5223_v13 = vpop.eup %5222  ;;  %3923 = vmatmul.mubr.f32.gmra.mxu1 %v3751_v31  ;;  %v3754_v16 = vmul.f32 %v3722_v20, %v7243_v8  ;;  %v3692_v17 = vadd.f32 1.0, %v5221_v60  ;;  %v3723_v63 = vmul.f32 0.5, %v3691_v4 }
 0xb67   :  { %v3693_v11 = vadd.f32 1.0, %v5223_v13 }
 0xb68   :  { %v5225_v50 = vpop.eup %5224  ;;  %3927 = vmatprep.mubr.f32.mxu1 %v3754_v16  ;;  %v3724_v32 = vmul.f32 0.5, %v3692_v17  ;;  %v3755_v9 = vmul.f32 %v3723_v63, %v7250_v34 }
 0xb69   :  { %v3694_v40 = vadd.f32 1.0, %v5225_v50  ;;  %v3725_v41 = vmul.f32 0.5, %v3693_v11 }
 0xb6a   :  { %3928 = vmatmul.mubr.f32.gmra.mxu1 %v3753_v39  ;;  %v3756_v23 = vmul.f32 %v3724_v32, %v7257_v51 }
 0xb6b   :  { %v3726_v27 = vmul.f32 0.5, %v3694_v40  ;;  %v3757_v8 = vmul.f32 %v3725_v41, %v7261_v61 }
 0xb6c   :  { %3932 = vmatprep.mubr.f32.mxu1 %v3756_v23 }
 0xb6d   :  { %v3758_v19 = vmul.f32 %v3726_v27, %v7269_v46 }
 0xb6e   :  { %3933 = vmatmul.mubr.f32.gmra.mxu1 %v3755_v9 }
 0xb6f   :  { %3937 = vmatprep.mubr.f32.mxu1 %v3758_v19 }
 0xb72   :  { %3938 = vmatmul.mubr.f32.gmra.mxu1 %v3757_v8 }
 0xbe4   :  { %v4575_v53 = vpop.f32.mrf.mxu1 }
 0xbe6   :  { %v4576_v62 = vpop.f32.mrf.mxu1 }
 0xbe7   :  { %v4577_v51 = vadd.f32 %v4576_v62, %v4575_v53 }
 0xbe8   :  { %v4578_v47 = vpop.f32.mrf.mxu1 }
 0xbe9   :  { %v7303_v5 = vadd.f32 %v4577_v51, %v7300_v18 }
 0xbea   :  { %v4579_v34 = vpop.f32.mrf.mxu1 }
 0xbeb   :  { %v3943_v46 = vmul.f32 %v7303_v5, %v7303_v5  ;;  %v4580_v35 = vadd.f32 %v4579_v34, %v4578_v47 }
 0xbec   :  { %v4581_v37 = vpop.f32.mrf.mxu1 }
 0xbed   :  { %v3959_v61 = vmul.f32 %v3943_v46, %v7303_v5  ;;  %v7309_v44 = vadd.f32 %v4580_v35, %v7300_v18 }
 0xbee   :  { %v4582_v29 = vpop.f32.mrf.mxu1 }
 0xbef   :  { %v3975_v54 = vmul.f32 0.044715, %v3959_v61  ;;  %v3944_v42 = vmul.f32 %v7309_v44, %v7309_v44  ;;  %v4583_v57 = vadd.f32 %v4582_v29, %v4581_v37 }
 0xbf0   :  { %v4584_v56 = vpop.f32.mrf.mxu1 }
 0xbf1   :  { %v3991_v28 = vadd.f32 %v3975_v54, %v7303_v5  ;;  %v3960_v59 = vmul.f32 %v3944_v42, %v7309_v44  ;;  %v7316_v6 = vadd.f32 %v4583_v57, %v7300_v18 }
 0xbf2   :  { %v4585_v36 = vpop.f32.mrf.mxu1 }
 0xbf3   :  { %v4007_v38 = vmul.f32 0.7978846, %v3991_v28  ;;  %v3976_v30 = vmul.f32 0.044715, %v3960_v59  ;;  %v3945_v43 = vmul.f32 %v7316_v6, %v7316_v6  ;;  %v4586_v14 = vadd.f32 %v4585_v36, %v4584_v56 }
 0xbf4   :  { %v4587_v58 = vpop.f32.mrf.mxu1 }
 0xbf5   :  { %5226 = vtanh.f32 %v4007_v38  ;;  %v3992_v48 = vadd.f32 %v3976_v30, %v7309_v44  ;;  %v3961_v2 = vmul.f32 %v3945_v43, %v7316_v6  ;;  %v7323_v31 = vadd.f32 %v4586_v14, %v7300_v18 }
 0xbf6   :  { %v4588_v20 = vpop.f32.mrf.mxu1 }
 0xbf7   :  { %v4008_v25 = vmul.f32 0.7978846, %v3992_v48  ;;  %v3977_v4 = vmul.f32 0.044715, %v3961_v2  ;;  %v3946_v60 = vmul.f32 %v7323_v31, %v7323_v31  ;;  %v4589_v13 = vadd.f32 %v4588_v20, %v4587_v58 }
 0xbf8   :  { %v4590_v16 = vpop.f32.mrf.mxu1 }
 0xbf9   :  { %5228 = vtanh.f32 %v4008_v25  ;;  %v3993_v17 = vadd.f32 %v3977_v4, %v7316_v6  ;;  %v3962_v50 = vmul.f32 %v3946_v60, %v7323_v31  ;;  %v7330_v39 = vadd.f32 %v4589_v13, %v7300_v18 }
 0xbfa   :  { %v4591_v32 = vpop.f32.mrf.mxu1 }
 0xbfb   :  { %v4009_v63 = vmul.f32 0.7978846, %v3993_v17  ;;  %v3978_v11 = vmul.f32 0.044715, %v3962_v50  ;;  %v3947_v40 = vmul.f32 %v7330_v39, %v7330_v39  ;;  %v4592_v23 = vadd.f32 %v4591_v32, %v4590_v16 }
 0xbfc   :  { %v4593_v27 = vpop.f32.mrf.mxu1 }
 0xbfd   :  { %5230 = vtanh.f32 %v4009_v63  ;;  %v3994_v9 = vadd.f32 %v3978_v11, %v7323_v31  ;;  %v3963_v41 = vmul.f32 %v3947_v40, %v7330_v39  ;;  %v7337_v19 = vadd.f32 %v4592_v23, %v7300_v18 }
 0xbfe   :  { %v4594_v8 = vpop.f32.mrf.mxu1 }
 0xbff   :  { %v4010_v53 = vmul.f32 0.7978846, %v3994_v9  ;;  %v3979_v62 = vmul.f32 0.044715, %v3963_v41  ;;  %v3948_v51 = vmul.f32 %v7337_v19, %v7337_v19  ;;  %v4595_v47 = vadd.f32 %v4594_v8, %v4593_v27 }
 0xc00   :  { %v4596_v34 = vpop.f32.mrf.mxu1 }
 0xc01   :  { %5232 = vtanh.f32 %v4010_v53  ;;  %v3995_v46 = vadd.f32 %v3979_v62, %v7330_v39  ;;  %v3964_v35 = vmul.f32 %v3948_v51, %v7337_v19  ;;  %v7344_v37 = vadd.f32 %v4595_v47, %v7300_v18 }
 0xc02   :  { %v5227_v61 = vpop.eup %5226  ;;  %v4597_v29 = vpop.f32.mrf.mxu1 }
 0xc03   :  { %v4039_v54 = vadd.f32 1.0, %v5227_v61  ;;  %v4011_v42 = vmul.f32 0.7978846, %v3995_v46  ;;  %v3980_v57 = vmul.f32 0.044715, %v3964_v35  ;;  %v3949_v56 = vmul.f32 %v7344_v37, %v7344_v37 }
 0xc04   :  { %v4598_v28 = vadd.f32 %v4597_v29, %v4596_v34 }
 0xc05   :  { %v4055_v59 = vmul.f32 0.5, %v4039_v54  ;;  %5234 = vtanh.f32 %v4011_v42  ;;  %v3996_v36 = vadd.f32 %v3980_v57, %v7337_v19  ;;  %v3965_v38 = vmul.f32 %v3949_v56, %v7344_v37 }
 0xc06   :  { %v5229_v30 = vpop.eup %5228  ;;  %v7351_v43 = vadd.f32 %v4598_v28, %v7300_v18 }
 0xc07   :  { %v4071_v14 = vmul.f32 %v4055_v59, %v7303_v5  ;;  %v4040_v58 = vadd.f32 1.0, %v5229_v30  ;;  %v4012_v48 = vmul.f32 0.7978846, %v3996_v36  ;;  %v3981_v2 = vmul.f32 0.044715, %v3965_v38 }
 0xc08   :  { %v3950_v20 = vmul.f32 %v7351_v43, %v7351_v43 }
 0xc09   :  { %v4087_v25 = vadd.f32 %v4071_v14, %v6633_v0  ;;  %v4056_v4 = vmul.f32 0.5, %v4040_v58  ;;  %5236 = vtanh.f32 %v4012_v48  ;;  %v3997_v60 = vadd.f32 %v3981_v2, %v7344_v37 }
 0xc0a   :  { %v5231_v13 = vpop.eup %5230  ;;  %v3966_v16 = vmul.f32 %v3950_v20, %v7351_v43 }
 0xc0b   :  { %4103 = vst.msk [vmem:[#allocation9] sm:$0xff] %vm290_vm0, %v4087_v25  ;;  %v4072_v17 = vmul.f32 %v4056_v4, %v7309_v44  ;;  %v4041_v5 = vadd.f32 1.0, %v5231_v13  ;;  %v4013_v50 = vmul.f32 0.7978846, %v3997_v60 }
 0xc0c   :  { %v3982_v32 = vmul.f32 0.044715, %v3966_v16 }
 0xc0d   :  { %v4088_v63 = vadd.f32 %v4072_v17, %v6629_v49  ;;  %v4057_v11 = vmul.f32 0.5, %v4041_v5  ;;  %5238 = vtanh.f32 %v4013_v50 }
 0xc0e   :  { %v5233_v40 = vpop.eup %5232  ;;  %v3998_v0 = vadd.f32 %v3982_v32, %v7351_v43 }
 0xc0f   :  { %4104 = vst.msk [vmem:[#allocation9 + $0x8] sm:$0xff] %vm290_vm0, %v4088_v63  ;;  %v4073_v23 = vmul.f32 %v4057_v11, %v7316_v6  ;;  %v4042_v27 = vadd.f32 1.0, %v5233_v40 }
 0xc10   :  { %v4014_v9 = vmul.f32 0.7978846, %v3998_v0 }
 0xc11   :  { %v4089_v41 = vadd.f32 %v4073_v23, %v6659_v52  ;;  %v4058_v8 = vmul.f32 0.5, %v4042_v27 }
 0xc12   :  { %v5235_v44 = vpop.eup %5234  ;;  %5240 = vtanh.f32 %v4014_v9 }
 0xc13   :  { %4105 = vst.msk [vmem:[#allocation9 + $0x10] sm:$0xff] %vm290_vm0, %v4089_v41  ;;  %v4074_v49 = vmul.f32 %v4058_v8, %v7323_v31  ;;  %v4043_v53 = vadd.f32 1.0, %v5235_v44 }
 0xc15   :  { %v4090_v62 = vadd.f32 %v4074_v49, %v6647_v55  ;;  %v4059_v51 = vmul.f32 0.5, %v4043_v53  ;;  %v4599_v47 = vpop.f32.mrf.mxu1 }
 0xc16   :  { %v5237_v34 = vpop.eup %5236 }
 0xc17   :  { %4106 = vst.msk [vmem:[#allocation9 + $0x18] sm:$0xff] %vm290_vm0, %v4090_v62  ;;  %v4075_v6 = vmul.f32 %v4059_v51, %v7330_v39  ;;  %v4044_v46 = vadd.f32 1.0, %v5237_v34  ;;  %v4600_v35 = vpop.f32.mrf.mxu1 }
 0xc18   :  { %v4601_v52 = vadd.f32 %v4600_v35, %v4599_v47 }
 0xc19   :  { %v4091_v61 = vadd.f32 %v4075_v6, %v6704_v24  ;;  %v4060_v29 = vmul.f32 0.5, %v4044_v46 }
 0xc1a   :  { %v5239_v54 = vpop.eup %5238  ;;  %v7373_v42 = vadd.f32 %v4601_v52, %v7300_v18  ;;  %v4602_v31 = vpop.f32.mrf.mxu1 }
 0xc1b   :  { %4107 = vst.msk [vmem:[#allocation9 + $0x20] sm:$0xff] %vm290_vm0, %v4091_v61  ;;  %v4076_v55 = vmul.f32 %v4060_v29, %v7337_v19  ;;  %v4045_v57 = vadd.f32 1.0, %v5239_v54 }
 0xc1c   :  { %v3951_v56 = vmul.f32 %v7373_v42, %v7373_v42  ;;  %v4603_v39 = vpop.f32.mrf.mxu1 }
 0xc1d   :  { %v4092_v28 = vadd.f32 %v4076_v55, %v6693_v7  ;;  %v4061_v59 = vmul.f32 0.5, %v4045_v57  ;;  %v4604_v36 = vadd.f32 %v4603_v39, %v4602_v31 }
 0xc1e   :  { %v3967_v24 = vmul.f32 %v3951_v56, %v7373_v42  ;;  %v4605_v38 = vpop.f32.mrf.mxu1 }
 0xc1f   :  { %v5241_v30 = vpop.eup %5240  ;;  %4108 = vst.msk [vmem:[#allocation9 + $0x28] sm:$0xff] %vm290_vm0, %v4092_v28  ;;  %v4077_v14 = vmul.f32 %v4061_v59, %v7344_v37  ;;  %v7384_v58 = vadd.f32 %v4604_v36, %v7300_v18 }
 0xc20   :  { %v4046_v19 = vadd.f32 1.0, %v5241_v30  ;;  %v3983_v48 = vmul.f32 0.044715, %v3967_v24  ;;  %v4606_v2 = vpop.f32.mrf.mxu1 }
 0xc21   :  { %v4093_v20 = vadd.f32 %v4077_v14, %v6651_v45  ;;  %v3952_v7 = vmul.f32 %v7384_v58, %v7384_v58  ;;  %v4607_v25 = vadd.f32 %v4606_v2, %v4605_v38 }
 0xc22   :  { %v4062_v4 = vmul.f32 0.5, %v4046_v19  ;;  %v3999_v60 = vadd.f32 %v3983_v48, %v7373_v42  ;;  %v4608_v13 = vpop.f32.mrf.mxu1 }
 0xc23   :  { %4109 = vst.msk [vmem:[#allocation9 + $0x30] sm:$0xff] %vm290_vm0, %v4093_v20  ;;  %v3968_v37 = vmul.f32 %v3952_v7, %v7384_v58  ;;  %v7393_v16 = vadd.f32 %v4607_v25, %v7300_v18 }
 0xc24   :  { %v4078_v17 = vmul.f32 %v4062_v4, %v7351_v43  ;;  %v4015_v5 = vmul.f32 0.7978846, %v3999_v60  ;;  %v4609_v50 = vpop.f32.mrf.mxu1 }
 0xc25   :  { %v3984_v45 = vmul.f32 0.044715, %v3968_v37  ;;  %v3953_v32 = vmul.f32 %v7393_v16, %v7393_v16  ;;  %v4610_v63 = vadd.f32 %v4609_v50, %v4608_v13 }
 0xc26   :  { %v4094_v11 = vadd.f32 %v4078_v17, %v6718_v1  ;;  %5242 = vtanh.f32 %v4015_v5  ;;  %v4611_v40 = vpop.f32.mrf.mxu1 }
 0xc27   :  { %v4000_v0 = vadd.f32 %v3984_v45, %v7384_v58  ;;  %v3969_v23 = vmul.f32 %v3953_v32, %v7393_v16  ;;  %v7402_v27 = vadd.f32 %v4610_v63, %v7300_v18 }
 0xc28   :  { %4110 = vst.msk [vmem:[#allocation9 + $0x38] sm:$0xff] %vm290_vm0, %v4094_v11  ;;  %v4612_v43 = vpop.f32.mrf.mxu1 }
 0xc29   :  { %v4016_v9 = vmul.f32 0.7978846, %v4000_v0  ;;  %v3985_v41 = vmul.f32 0.044715, %v3969_v23  ;;  %v3954_v8 = vmul.f32 %v7402_v27, %v7402_v27  ;;  %v4613_v44 = vadd.f32 %v4612_v43, %v4611_v40 }
 0xc2a   :  { %v4614_v49 = vpop.f32.mrf.mxu1 }
 0xc2b   :  { %5244 = vtanh.f32 %v4016_v9  ;;  %v4001_v1 = vadd.f32 %v3985_v41, %v7393_v16  ;;  %v3970_v53 = vmul.f32 %v3954_v8, %v7402_v27  ;;  %v7410_v62 = vadd.f32 %v4613_v44, %v7300_v18 }
 0xc2c   :  { %v4615_v51 = vpop.f32.mrf.mxu1 }
 0xc2d   :  { %v4017_v47 = vmul.f32 0.7978846, %v4001_v1  ;;  %v3986_v34 = vmul.f32 0.044715, %v3970_v53  ;;  %v3955_v6 = vmul.f32 %v7410_v62, %v7410_v62  ;;  %v4616_v46 = vadd.f32 %v4615_v51, %v4614_v49 }
 0xc2e   :  { %v4617_v35 = vpop.f32.mrf.mxu1 }
 0xc2f   :  { %5246 = vtanh.f32 %v4017_v47  ;;  %v4002_v52 = vadd.f32 %v3986_v34, %v7402_v27  ;;  %v3971_v61 = vmul.f32 %v3955_v6, %v7410_v62  ;;  %v7417_v29 = vadd.f32 %v4616_v46, %v7300_v18 }
 0xc30   :  { %v4618_v54 = vpop.f32.mrf.mxu1 }
 0xc31   :  { %v4018_v31 = vmul.f32 0.7978846, %v4002_v52  ;;  %v3987_v55 = vmul.f32 0.044715, %v3971_v61  ;;  %v3956_v57 = vmul.f32 %v7417_v29, %v7417_v29  ;;  %v4619_v56 = vadd.f32 %v4618_v54, %v4617_v35 }
 0xc32   :  { %v4620_v39 = vpop.f32.mrf.mxu1 }
 0xc33   :  { %v5243_v28 = vpop.eup %5242  ;;  %5248 = vtanh.f32 %v4018_v31  ;;  %v4003_v59 = vadd.f32 %v3987_v55, %v7410_v62  ;;  %v3972_v36 = vmul.f32 %v3956_v57, %v7417_v29  ;;  %v3935_v24 = vadd.f32 %v4619_v56, %v7300_v18 }
 0xc34   :  { %v4047_v38 = vadd.f32 1.0, %v5243_v28  ;;  %v4621_v30 = vpop.f32.mrf.mxu1 }
 0xc35   :  { %v4019_v14 = vmul.f32 0.7978846, %v4003_v59  ;;  %v3988_v19 = vmul.f32 0.044715, %v3972_v36  ;;  %v3957_v48 = vmul.f32 %v3935_v24, %v3935_v24  ;;  %v4622_v2 = vadd.f32 %v4621_v30, %v4620_v39 }
 0xc36   :  { %v4063_v20 = vmul.f32 0.5, %v4047_v38 }
 0xc37   :  { %5250 = vtanh.f32 %v4019_v14  ;;  %v4004_v7 = vadd.f32 %v3988_v19, %v7417_v29  ;;  %v3973_v25 = vmul.f32 %v3957_v48, %v3935_v24  ;;  %v3940_v4 = vadd.f32 %v4622_v2, %v7300_v18 }
 0xc38   :  { %v5245_v60 = vpop.eup %5244  ;;  %v4079_v13 = vmul.f32 %v4063_v20, %v7373_v42 }
 0xc39   :  { %v4048_v37 = vadd.f32 1.0, %v5245_v60  ;;  %v4020_v17 = vmul.f32 0.7978846, %v4004_v7  ;;  %v3989_v5 = vmul.f32 0.044715, %v3973_v25  ;;  %v3958_v50 = vmul.f32 %v3940_v4, %v3940_v4 }
 0xc3a   :  { %v4095_v45 = vadd.f32 %v4079_v13, %v6734_v21 }
 0xc3b   :  { %v4064_v32 = vmul.f32 0.5, %v4048_v37  ;;  %5252 = vtanh.f32 %v4020_v17  ;;  %v4005_v63 = vadd.f32 %v3989_v5, %v3935_v24  ;;  %v3974_v11 = vmul.f32 %v3958_v50, %v3940_v4 }
 0xc3c   :  { %v5247_v40 = vpop.eup %5246  ;;  %4111 = vst.msk [vmem:[#allocation9 + $0x40] sm:$0xff] %vm290_vm0, %v4095_v45 }
 0xc3d   :  { %v4080_v0 = vmul.f32 %v4064_v32, %v7384_v58  ;;  %v4049_v23 = vadd.f32 1.0, %v5247_v40  ;;  %v4021_v18 = vmul.f32 0.7978846, %v4005_v63  ;;  %v3990_v43 = vmul.f32 0.044715, %v3974_v11 }
 0xc3f   :  { %v4096_v42 = vadd.f32 %v4080_v0, %v6729_v12  ;;  %v4065_v9 = vmul.f32 0.5, %v4049_v23  ;;  %5254 = vtanh.f32 %v4021_v18  ;;  %v4006_v41 = vadd.f32 %v3990_v43, %v3940_v4 }
 0xc40   :  { %v5249_v8 = vpop.eup %5248 }
 0xc41   :  { %4112 = vst.msk [vmem:[#allocation9 + $0x48] sm:$0xff] %vm290_vm0, %v4096_v42  ;;  %v4081_v21 = vmul.f32 %v4065_v9, %v7393_v16  ;;  %v4050_v44 = vadd.f32 1.0, %v5249_v8  ;;  %v4022_v49 = vmul.f32 0.7978846, %v4006_v41 }
 0xc43   :  { %v4097_v1 = vadd.f32 %v4081_v21, %v6754_v3  ;;  %v4066_v53 = vmul.f32 0.5, %v4050_v44  ;;  %5256 = vtanh.f32 %v4022_v49 }
 0xc44   :  { %v5251_v58 = vpop.eup %5250 }
 0xc45   :  { %4113 = vst.msk [vmem:[#allocation9 + $0x50] sm:$0xff] %vm290_vm0, %v4097_v1  ;;  %v4082_v51 = vmul.f32 %v4066_v53, %v7402_v27  ;;  %v4051_v12 = vadd.f32 1.0, %v5251_v58 }
 0xc47   :  { %v4098_v47 = vadd.f32 %v4082_v51, %v6748_v33  ;;  %v4067_v34 = vmul.f32 0.5, %v4051_v12 }
 0xc48   :  { %v5253_v6 = vpop.eup %5252 }
 0xc49   :  { %4114 = vst.msk [vmem:[#allocation9 + $0x58] sm:$0xff] %vm290_vm0, %v4098_v47  ;;  %v4083_v16 = vmul.f32 %v4067_v34, %v7410_v62  ;;  %v4052_v46 = vadd.f32 1.0, %v5253_v6 }
 0xc4b   :  { %v4099_v35 = vadd.f32 %v4083_v16, %v6678_v10  ;;  %v4068_v3 = vmul.f32 0.5, %v4052_v46 }
 0xc4c   :  { %v5255_v52 = vpop.eup %5254 }
 0xc4d   :  { %4115 = vst.msk [vmem:[#allocation9 + $0x60] sm:$0xff] %vm290_vm0, %v4099_v35  ;;  %v4084_v61 = vmul.f32 %v4068_v3, %v7417_v29  ;;  %v4053_v54 = vadd.f32 1.0, %v5255_v52 }
 0xc4f   :  { %v4100_v27 = vadd.f32 %v4084_v61, %v6672_v15  ;;  %v4069_v31 = vmul.f32 0.5, %v4053_v54 }
 0xc50   :  { %v5257_v33 = vpop.eup %5256 }
 0xc51   :  { %4116 = vst.msk [vmem:[#allocation9 + $0x68] sm:$0xff] %vm290_vm0, %v4100_v27  ;;  %v4085_v55 = vmul.f32 %v4069_v31, %v3935_v24  ;;  %v4054_v57 = vadd.f32 1.0, %v5257_v33 }
 0xc53   :  { %v4101_v62 = vadd.f32 %v4085_v55, %v6697_v26  ;;  %v4070_v56 = vmul.f32 0.5, %v4054_v57 }
 0xc55   :  { %4117 = vst.msk [vmem:[#allocation9 + $0x70] sm:$0xff] %vm290_vm0, %v4101_v62  ;;  %v4086_v10 = vmul.f32 %v4070_v56, %v3940_v4 }
 0xc57   :  { %v4102_v39 = vadd.f32 %v4086_v10, %v6686_v22 }
 0xc59   :  { %4118 = vst.msk [vmem:[#allocation9 + $0x78] sm:$0xff] %vm290_vm0, %v4102_v39 }
 0xc5a   :  { %5321 = shalt.err (!%p5318_p5)
}
 0xc5b   :  { %4130 = dma.vmem_to_hbm [thread:$0]  %s4125_s10, 2048, %s7473_s19, [#allocation4], %s5340_s25, %s5340_s25, %s5341_s3  }
 0xc5c   :  { %5336 = dma.done.wait [#allocation4], 2048  }
 0xc5d   :  { %5337 = vsyncadd [#allocation4], 4294965248 }
 0xc5e   :  { %4134 = vsyncpa [#allocation3], 1 }
 0xc5f   :  { %4135 = vsyncpa [#allocation8], 1 }
 0xc60   :  { %4136 = vsyncpa [#allocation4], 1 }
 0xc61   :  { %4137 = vsyncpa [#allocation5], 1 }

</bundles_post_ra>
